<compile_context>
chip_gen: v7x
topology: tpu7x:2x2x1
jax: 0.10.0
libtpu: 0.0.40
codegen_flags: <defaults>
</compile_context>

<pallas_src>
import functools

import jax
import jax.numpy as jnp
from jax import lax
from jax.experimental import pallas as pl
from jax.experimental.pallas import tpu as pltpu

KSIZE = 7
PAD = 3


def _spatial_attention_kernel(w_ref, x_ref, o_ref, ext_ref, *, W):
    # w_ref  : SMEM (2*K*K,) f32 flattened conv weight ([in_ch, ky, kx] order)
    # x_ref  : VMEM (nb, C, H*W)     lane-dense input block
    # o_ref  : VMEM (nb, 1, H*W)     lane-dense output block
    # ext_ref: VMEM (nb, 2, H*W + 2*(PAD*W + PAD)) f32 scratch (flat padded maps)
    nb, C, HW = x_ref.shape
    K = KSIZE
    margin = PAD * W + PAD          # flat offset of the map inside the scratch

    # ---- channel mean / max, lane-dense, accumulated in f32 (chunked in C) ----
    row_bytes = nb * HW * 4
    c_chunk = max(1, min(C, (128 * 1024) // max(row_bytes, 1)))
    sum_f = jnp.zeros((nb, HW), jnp.float32)
    max_f = jnp.full((nb, HW), -jnp.inf, jnp.float32)
    for c0 in range(0, C, c_chunk):
        cc = min(c_chunk, C - c0)
        blk = x_ref[:, c0:c0 + cc, :].astype(jnp.float32)      # (nb, cc, HW)
        sum_f = sum_f + jnp.sum(blk, axis=1)
        max_f = jnp.maximum(max_f, jnp.max(blk, axis=1))
    avg = sum_f * (1.0 / C)

    # ---- flat [avg, max] maps with zero margins (handles vertical padding) ----
    ext_ref[...] = jnp.zeros_like(ext_ref)
    ext_ref[:, 0, margin:margin + HW] = avg
    ext_ref[:, 1, margin:margin + HW] = max_f

    # ---- conv weights: read all 98 SMEM scalars once, before the tap loop ----
    w_avg = [[w_ref[dy * K + dx] for dx in range(K)] for dy in range(K)]
    w_max = [[w_ref[K * K + dy * K + dx] for dx in range(K)] for dy in range(K)]

    # ---- per-dx column-validity masks (handle horizontal zero padding) ----
    col = lax.broadcasted_iota(jnp.int32, (1, HW), 1) % W
    masks = [(col + (dx - PAD) >= 0) & (col + (dx - PAD) < W) for dx in range(K)]

    # ---- 7x7 conv as 49 lane-shifted MACs in the flat layout ----
    acc = jnp.zeros((nb, HW), jnp.float32)
    for dy in range(K):
        start = margin + (dy - PAD) * W - PAD
        a_band = ext_ref[:, 0, start:start + HW + K - 1]        # (nb, HW + 6)
        m_band = ext_ref[:, 1, start:start + HW + K - 1]
        for dx in range(K):
            tap = (w_avg[dy][dx] * a_band[:, dx:dx + HW]
                   + w_max[dy][dx] * m_band[:, dx:dx + HW])
            if dx == PAD:                      # mask is all-true at the center column
                acc = acc + tap
            else:
                acc = acc + jnp.where(masks[dx], tap, 0.0)

    o_ref[:, 0, :] = jax.nn.sigmoid(acc).astype(o_ref.dtype)


def _pick_batch_block(N, C, H, W, itemsize, target_bytes=2 * 1024 * 1024):
    """Batch elements per grid step: ~2 MiB input blocks, >=2 blocks when N>1."""
    per_elem = max(1, C * H * W * itemsize)
    nb = max(1, min(N, target_bytes // per_elem))
    if N > 1:                       # keep >=2 grid blocks (v7x has 2 TensorCores)
        nb = min(nb, max(1, N // 2))
    while N % nb:                   # largest divisor of N that is <= nb
        nb -= 1
    return nb


def spatial_attention(x, weight):
    """x: (N, C, H, W); weight: (1, 2, KSIZE, KSIZE) -> (N, 1, H, W)."""
    N, C, H, W = x.shape
    HW = H * W
    nb = _pick_batch_block(N, C, H, W, x.dtype.itemsize)
    ext_len = HW + 2 * (PAD * W + PAD)          # flat map + zero margins

    w_flat = weight.reshape(-1).astype(jnp.float32)     # (2*49,) scalars -> SMEM
    x_flat = x.reshape(N, C, HW)                        # free view of contiguous NCHW

    kernel = functools.partial(_spatial_attention_kernel, W=W)
    out = pl.pallas_call(
        kernel,
        out_shape=jax.ShapeDtypeStruct((N, 1, HW), x.dtype),
        grid=(N // nb,),
        in_specs=[
            pl.BlockSpec(memory_space=pltpu.MemorySpace.SMEM),     # conv weights
            pl.BlockSpec((nb, C, HW), lambda n: (n, 0, 0)),        # lane-dense input
        ],
        out_specs=pl.BlockSpec((nb, 1, HW), lambda n: (n, 0, 0)),  # lane-dense output
        scratch_shapes=[pltpu.VMEM((nb, 2, ext_len), jnp.float32)],
        compiler_params=pltpu.CompilerParams(
            dimension_semantics=("parallel",),
            vmem_limit_bytes=32 * 1024 * 1024,
        ),
    )(w_flat, x_flat)
    return out.reshape(N, 1, H, W)


def _reference(x, weight):
    avg = jnp.mean(x, axis=1, keepdims=True)
    mx = jnp.max(x, axis=1, keepdims=True)
    cat = jnp.concatenate([avg, mx], axis=1)
    y = lax.conv_general_dilated(
        cat, weight, window_strides=(1, 1),
        padding=((PAD, PAD), (PAD, PAD)),
        dimension_numbers=("NCHW", "OIHW", "NCHW"))
    return jax.nn.sigmoid(y)


if __name__ == "__main__":
    key = jax.random.PRNGKey(0)
    kx, kw = jax.random.split(key)

    N, C, H, W = 2, 4, 16, 16
    x = jax.random.normal(kx, (N, C, H, W), dtype=jnp.float32)
    # nn.init.normal_(conv1.weight, std=0.01) -> deterministic synthetic init
    weight = 0.01 * jax.random.normal(kw, (1, 2, KSIZE, KSIZE), dtype=jnp.float32)

    out = jax.block_until_ready(spatial_attention(x, weight))
    ref = jax.block_until_ready(_reference(x, weight))

    assert out.shape == (N, 1, H, W)
    assert jnp.allclose(out, ref, atol=1e-5, rtol=1e-5), "mismatch vs. reference"

    print("KERNEL_OK")
</pallas_src>

<mosaic_0001>
module attributes {stable_mosaic.version = 11 : i64} {
  func.func @_spatial_attention_kernel(%arg0: i32, %arg1: memref<98xf32, #tpu.memory_space<smem>>, %arg2: memref<1x4x256xf32, #tpu.memory_space<vmem>>, %arg3: memref<1x1x256xf32, #tpu.memory_space<vmem>>, %arg4: memref<1x2x358xf32, #tpu.memory_space<vmem>>) attributes {dimension_semantics = [#tpu.dimension_semantics<parallel>], iteration_bounds = array<i64: 2>, scalar_prefetch = 0 : i64, scratch_operands = 1 : i64, tpu.core_type = #tpu.core_type<tc>, window_params = [{transform_indices = @transform_0, window_bounds = array<i64: 98>}, {transform_indices = @transform_1, window_bounds = array<i64: 1, 4, 256>}, {transform_indices = @transform_2, window_bounds = array<i64: 1, 1, 256>}]} {
    %cst = arith.constant 0.000000e+00 : f32
    %0 = vector.broadcast %cst : f32 to vector<1x256xf32>
    %cst_0 = arith.constant 0xFF800000 : f32
    %1 = vector.broadcast %cst_0 : f32 to vector<1x256xf32>
    %c0 = arith.constant 0 : index
    %c0_1 = arith.constant 0 : index
    %c0_2 = arith.constant 0 : index
    %2 = vector.load %arg2[%c0, %c0_1, %c0_2] : memref<1x4x256xf32, #tpu.memory_space<vmem>>, vector<1x4x256xf32>
    %cst_3 = arith.constant dense<0.000000e+00> : vector<1x256xf32>
    %3 = vector.multi_reduction <add>, %2, %cst_3 [1] : vector<1x4x256xf32> to vector<1x256xf32>
    %4 = arith.addf %0, %3 : vector<1x256xf32>
    %cst_4 = arith.constant dense<0xFF800000> : vector<1x256xf32>
    %5 = vector.multi_reduction <maximumf>, %2, %cst_4 [1] : vector<1x4x256xf32> to vector<1x256xf32>
    %6 = arith.maximumf %1, %5 : vector<1x256xf32>
    %cst_5 = arith.constant 2.500000e-01 : f32
    %7 = vector.broadcast %cst_5 : f32 to vector<1x256xf32>
    %8 = arith.mulf %4, %7 : vector<1x256xf32>
    %cst_6 = arith.constant 0.000000e+00 : f32
    %9 = vector.broadcast %cst_6 : f32 to vector<1x2x358xf32>
    %c0_7 = arith.constant 0 : index
    %c0_8 = arith.constant 0 : index
    %c0_9 = arith.constant 0 : index
    %10 = vector.load %arg4[%c0_7, %c0_8, %c0_9] : memref<1x2x358xf32, #tpu.memory_space<vmem>>, vector<1x2x358xf32>
    tpu.vector_store %arg4[%c0_7, %c0_8, %c0_9], %9 {strides = array<i32>} : memref<1x2x358xf32, #tpu.memory_space<vmem>>, vector<1x2x358xf32>,
    %c0_10 = arith.constant 0 : index
    %c0_11 = arith.constant 0 : index
    %c51 = arith.constant 51 : index
    %11 = vector.load %arg4[%c0_10, %c0_11, %c51] : memref<1x2x358xf32, #tpu.memory_space<vmem>>, vector<1x1x256xf32>
    %12 = vector.shape_cast %11 : vector<1x1x256xf32> to vector<1x256xf32>
    %13 = vector.shape_cast %8 : vector<1x256xf32> to vector<1x1x256xf32>
    tpu.vector_store %arg4[%c0_10, %c0_11, %c51], %13 {strides = array<i32>} : memref<1x2x358xf32, #tpu.memory_space<vmem>>, vector<1x1x256xf32>,
    %c0_12 = arith.constant 0 : index
    %c1 = arith.constant 1 : index
    %c51_13 = arith.constant 51 : index
    %14 = vector.load %arg4[%c0_12, %c1, %c51_13] : memref<1x2x358xf32, #tpu.memory_space<vmem>>, vector<1x1x256xf32>
    %15 = vector.shape_cast %14 : vector<1x1x256xf32> to vector<1x256xf32>
    %16 = vector.shape_cast %6 : vector<1x256xf32> to vector<1x1x256xf32>
    tpu.vector_store %arg4[%c0_12, %c1, %c51_13], %16 {strides = array<i32>} : memref<1x2x358xf32, #tpu.memory_space<vmem>>, vector<1x1x256xf32>,
    %c0_14 = arith.constant 0 : index
    %17 = memref.load %arg1[%c0_14] : memref<98xf32, #tpu.memory_space<smem>>
    %c1_15 = arith.constant 1 : index
    %18 = memref.load %arg1[%c1_15] : memref<98xf32, #tpu.memory_space<smem>>
    %c2 = arith.constant 2 : index
    %19 = memref.load %arg1[%c2] : memref<98xf32, #tpu.memory_space<smem>>
    %c3 = arith.constant 3 : index
    %20 = memref.load %arg1[%c3] : memref<98xf32, #tpu.memory_space<smem>>
    %c4 = arith.constant 4 : index
    %21 = memref.load %arg1[%c4] : memref<98xf32, #tpu.memory_space<smem>>
    %c5 = arith.constant 5 : index
    %22 = memref.load %arg1[%c5] : memref<98xf32, #tpu.memory_space<smem>>
    %c6 = arith.constant 6 : index
    %23 = memref.load %arg1[%c6] : memref<98xf32, #tpu.memory_space<smem>>
    %c7 = arith.constant 7 : index
    %24 = memref.load %arg1[%c7] : memref<98xf32, #tpu.memory_space<smem>>
    %c8 = arith.constant 8 : index
    %25 = memref.load %arg1[%c8] : memref<98xf32, #tpu.memory_space<smem>>
    %c9 = arith.constant 9 : index
    %26 = memref.load %arg1[%c9] : memref<98xf32, #tpu.memory_space<smem>>
    %c10 = arith.constant 10 : index
    %27 = memref.load %arg1[%c10] : memref<98xf32, #tpu.memory_space<smem>>
    %c11 = arith.constant 11 : index
    %28 = memref.load %arg1[%c11] : memref<98xf32, #tpu.memory_space<smem>>
    %c12 = arith.constant 12 : index
    %29 = memref.load %arg1[%c12] : memref<98xf32, #tpu.memory_space<smem>>
    %c13 = arith.constant 13 : index
    %30 = memref.load %arg1[%c13] : memref<98xf32, #tpu.memory_space<smem>>
    %c14 = arith.constant 14 : index
    %31 = memref.load %arg1[%c14] : memref<98xf32, #tpu.memory_space<smem>>
    %c15 = arith.constant 15 : index
    %32 = memref.load %arg1[%c15] : memref<98xf32, #tpu.memory_space<smem>>
    %c16 = arith.constant 16 : index
    %33 = memref.load %arg1[%c16] : memref<98xf32, #tpu.memory_space<smem>>
    %c17 = arith.constant 17 : index
    %34 = memref.load %arg1[%c17] : memref<98xf32, #tpu.memory_space<smem>>
    %c18 = arith.constant 18 : index
    %35 = memref.load %arg1[%c18] : memref<98xf32, #tpu.memory_space<smem>>
    %c19 = arith.constant 19 : index
    %36 = memref.load %arg1[%c19] : memref<98xf32, #tpu.memory_space<smem>>
    %c20 = arith.constant 20 : index
    %37 = memref.load %arg1[%c20] : memref<98xf32, #tpu.memory_space<smem>>
    %c21 = arith.constant 21 : index
    %38 = memref.load %arg1[%c21] : memref<98xf32, #tpu.memory_space<smem>>
    %c22 = arith.constant 22 : index
    %39 = memref.load %arg1[%c22] : memref<98xf32, #tpu.memory_space<smem>>
    %c23 = arith.constant 23 : index
    %40 = memref.load %arg1[%c23] : memref<98xf32, #tpu.memory_space<smem>>
    %c24 = arith.constant 24 : index
    %41 = memref.load %arg1[%c24] : memref<98xf32, #tpu.memory_space<smem>>
    %c25 = arith.constant 25 : index
    %42 = memref.load %arg1[%c25] : memref<98xf32, #tpu.memory_space<smem>>
    %c26 = arith.constant 26 : index
    %43 = memref.load %arg1[%c26] : memref<98xf32, #tpu.memory_space<smem>>
    %c27 = arith.constant 27 : index
    %44 = memref.load %arg1[%c27] : memref<98xf32, #tpu.memory_space<smem>>
    %c28 = arith.constant 28 : index
    %45 = memref.load %arg1[%c28] : memref<98xf32, #tpu.memory_space<smem>>
    %c29 = arith.constant 29 : index
    %46 = memref.load %arg1[%c29] : memref<98xf32, #tpu.memory_space<smem>>
    %c30 = arith.constant 30 : index
    %47 = memref.load %arg1[%c30] : memref<98xf32, #tpu.memory_space<smem>>
    %c31 = arith.constant 31 : index
    %48 = memref.load %arg1[%c31] : memref<98xf32, #tpu.memory_space<smem>>
    %c32 = arith.constant 32 : index
    %49 = memref.load %arg1[%c32] : memref<98xf32, #tpu.memory_space<smem>>
    %c33 = arith.constant 33 : index
    %50 = memref.load %arg1[%c33] : memref<98xf32, #tpu.memory_space<smem>>
    %c34 = arith.constant 34 : index
    %51 = memref.load %arg1[%c34] : memref<98xf32, #tpu.memory_space<smem>>
    %c35 = arith.constant 35 : index
    %52 = memref.load %arg1[%c35] : memref<98xf32, #tpu.memory_space<smem>>
    %c36 = arith.constant 36 : index
    %53 = memref.load %arg1[%c36] : memref<98xf32, #tpu.memory_space<smem>>
    %c37 = arith.constant 37 : index
    %54 = memref.load %arg1[%c37] : memref<98xf32, #tpu.memory_space<smem>>
    %c38 = arith.constant 38 : index
    %55 = memref.load %arg1[%c38] : memref<98xf32, #tpu.memory_space<smem>>
    %c39 = arith.constant 39 : index
    %56 = memref.load %arg1[%c39] : memref<98xf32, #tpu.memory_space<smem>>
    %c40 = arith.constant 40 : index
    %57 = memref.load %arg1[%c40] : memref<98xf32, #tpu.memory_space<smem>>
    %c41 = arith.constant 41 : index
    %58 = memref.load %arg1[%c41] : memref<98xf32, #tpu.memory_space<smem>>
    %c42 = arith.constant 42 : index
    %59 = memref.load %arg1[%c42] : memref<98xf32, #tpu.memory_space<smem>>
    %c43 = arith.constant 43 : index
    %60 = memref.load %arg1[%c43] : memref<98xf32, #tpu.memory_space<smem>>
    %c44 = arith.constant 44 : index
    %61 = memref.load %arg1[%c44] : memref<98xf32, #tpu.memory_space<smem>>
    %c45 = arith.constant 45 : index
    %62 = memref.load %arg1[%c45] : memref<98xf32, #tpu.memory_space<smem>>
    %c46 = arith.constant 46 : index
    %63 = memref.load %arg1[%c46] : memref<98xf32, #tpu.memory_space<smem>>
    %c47 = arith.constant 47 : index
    %64 = memref.load %arg1[%c47] : memref<98xf32, #tpu.memory_space<smem>>
    %c48 = arith.constant 48 : index
    %65 = memref.load %arg1[%c48] : memref<98xf32, #tpu.memory_space<smem>>
    %c49 = arith.constant 49 : index
    %66 = memref.load %arg1[%c49] : memref<98xf32, #tpu.memory_space<smem>>
    %c50 = arith.constant 50 : index
    %67 = memref.load %arg1[%c50] : memref<98xf32, #tpu.memory_space<smem>>
    %c51_16 = arith.constant 51 : index
    %68 = memref.load %arg1[%c51_16] : memref<98xf32, #tpu.memory_space<smem>>
    %c52 = arith.constant 52 : index
    %69 = memref.load %arg1[%c52] : memref<98xf32, #tpu.memory_space<smem>>
    %c53 = arith.constant 53 : index
    %70 = memref.load %arg1[%c53] : memref<98xf32, #tpu.memory_space<smem>>
    %c54 = arith.constant 54 : index
    %71 = memref.load %arg1[%c54] : memref<98xf32, #tpu.memory_space<smem>>
    %c55 = arith.constant 55 : index
    %72 = memref.load %arg1[%c55] : memref<98xf32, #tpu.memory_space<smem>>
    %c56 = arith.constant 56 : index
    %73 = memref.load %arg1[%c56] : memref<98xf32, #tpu.memory_space<smem>>
    %c57 = arith.constant 57 : index
    %74 = memref.load %arg1[%c57] : memref<98xf32, #tpu.memory_space<smem>>
    %c58 = arith.constant 58 : index
    %75 = memref.load %arg1[%c58] : memref<98xf32, #tpu.memory_space<smem>>
    %c59 = arith.constant 59 : index
    %76 = memref.load %arg1[%c59] : memref<98xf32, #tpu.memory_space<smem>>
    %c60 = arith.constant 60 : index
    %77 = memref.load %arg1[%c60] : memref<98xf32, #tpu.memory_space<smem>>
    %c61 = arith.constant 61 : index
    %78 = memref.load %arg1[%c61] : memref<98xf32, #tpu.memory_space<smem>>
    %c62 = arith.constant 62 : index
    %79 = memref.load %arg1[%c62] : memref<98xf32, #tpu.memory_space<smem>>
    %c63 = arith.constant 63 : index
    %80 = memref.load %arg1[%c63] : memref<98xf32, #tpu.memory_space<smem>>
    %c64 = arith.constant 64 : index
    %81 = memref.load %arg1[%c64] : memref<98xf32, #tpu.memory_space<smem>>
    %c65 = arith.constant 65 : index
    %82 = memref.load %arg1[%c65] : memref<98xf32, #tpu.memory_space<smem>>
    %c66 = arith.constant 66 : index
    %83 = memref.load %arg1[%c66] : memref<98xf32, #tpu.memory_space<smem>>
    %c67 = arith.constant 67 : index
    %84 = memref.load %arg1[%c67] : memref<98xf32, #tpu.memory_space<smem>>
    %c68 = arith.constant 68 : index
    %85 = memref.load %arg1[%c68] : memref<98xf32, #tpu.memory_space<smem>>
    %c69 = arith.constant 69 : index
    %86 = memref.load %arg1[%c69] : memref<98xf32, #tpu.memory_space<smem>>
    %c70 = arith.constant 70 : index
    %87 = memref.load %arg1[%c70] : memref<98xf32, #tpu.memory_space<smem>>
    %c71 = arith.constant 71 : index
    %88 = memref.load %arg1[%c71] : memref<98xf32, #tpu.memory_space<smem>>
    %c72 = arith.constant 72 : index
    %89 = memref.load %arg1[%c72] : memref<98xf32, #tpu.memory_space<smem>>
    %c73 = arith.constant 73 : index
    %90 = memref.load %arg1[%c73] : memref<98xf32, #tpu.memory_space<smem>>
    %c74 = arith.constant 74 : index
    %91 = memref.load %arg1[%c74] : memref<98xf32, #tpu.memory_space<smem>>
    %c75 = arith.constant 75 : index
    %92 = memref.load %arg1[%c75] : memref<98xf32, #tpu.memory_space<smem>>
    %c76 = arith.constant 76 : index
    %93 = memref.load %arg1[%c76] : memref<98xf32, #tpu.memory_space<smem>>
    %c77 = arith.constant 77 : index
    %94 = memref.load %arg1[%c77] : memref<98xf32, #tpu.memory_space<smem>>
    %c78 = arith.constant 78 : index
    %95 = memref.load %arg1[%c78] : memref<98xf32, #tpu.memory_space<smem>>
    %c79 = arith.constant 79 : index
    %96 = memref.load %arg1[%c79] : memref<98xf32, #tpu.memory_space<smem>>
    %c80 = arith.constant 80 : index
    %97 = memref.load %arg1[%c80] : memref<98xf32, #tpu.memory_space<smem>>
    %c81 = arith.constant 81 : index
    %98 = memref.load %arg1[%c81] : memref<98xf32, #tpu.memory_space<smem>>
    %c82 = arith.constant 82 : index
    %99 = memref.load %arg1[%c82] : memref<98xf32, #tpu.memory_space<smem>>
    %c83 = arith.constant 83 : index
    %100 = memref.load %arg1[%c83] : memref<98xf32, #tpu.memory_space<smem>>
    %c84 = arith.constant 84 : index
    %101 = memref.load %arg1[%c84] : memref<98xf32, #tpu.memory_space<smem>>
    %c85 = arith.constant 85 : index
    %102 = memref.load %arg1[%c85] : memref<98xf32, #tpu.memory_space<smem>>
    %c86 = arith.constant 86 : index
    %103 = memref.load %arg1[%c86] : memref<98xf32, #tpu.memory_space<smem>>
    %c87 = arith.constant 87 : index
    %104 = memref.load %arg1[%c87] : memref<98xf32, #tpu.memory_space<smem>>
    %c88 = arith.constant 88 : index
    %105 = memref.load %arg1[%c88] : memref<98xf32, #tpu.memory_space<smem>>
    %c89 = arith.constant 89 : index
    %106 = memref.load %arg1[%c89] : memref<98xf32, #tpu.memory_space<smem>>
    %c90 = arith.constant 90 : index
    %107 = memref.load %arg1[%c90] : memref<98xf32, #tpu.memory_space<smem>>
    %c91 = arith.constant 91 : index
    %108 = memref.load %arg1[%c91] : memref<98xf32, #tpu.memory_space<smem>>
    %c92 = arith.constant 92 : index
    %109 = memref.load %arg1[%c92] : memref<98xf32, #tpu.memory_space<smem>>
    %c93 = arith.constant 93 : index
    %110 = memref.load %arg1[%c93] : memref<98xf32, #tpu.memory_space<smem>>
    %c94 = arith.constant 94 : index
    %111 = memref.load %arg1[%c94] : memref<98xf32, #tpu.memory_space<smem>>
    %c95 = arith.constant 95 : index
    %112 = memref.load %arg1[%c95] : memref<98xf32, #tpu.memory_space<smem>>
    %c96 = arith.constant 96 : index
    %113 = memref.load %arg1[%c96] : memref<98xf32, #tpu.memory_space<smem>>
    %c97 = arith.constant 97 : index
    %114 = memref.load %arg1[%c97] : memref<98xf32, #tpu.memory_space<smem>>
    %115 = tpu.iota {dimensions = array<i32: 1>} : vector<1x256xi32>
    %c16_i32 = arith.constant 16 : i32
    %c0_i32 = arith.constant 0 : i32
    %116 = arith.cmpi eq, %c16_i32, %c0_i32 : i32
    %c1_i32 = arith.constant 1 : i32
    %117 = arith.select %116, %c1_i32, %c16_i32 : i32
    %118 = vector.broadcast %117 : i32 to vector<1x256xi32>
    %119 = arith.remsi %115, %118 : vector<1x256xi32>
    %c0_i32_17 = arith.constant 0 : i32
    %120 = vector.broadcast %c0_i32_17 : i32 to vector<1x256xi32>
    %121 = arith.cmpi ne, %119, %120 : vector<1x256xi32>
    %c0_i32_18 = arith.constant 0 : i32
    %122 = vector.broadcast %c0_i32_18 : i32 to vector<1x256xi32>
    %123 = arith.cmpi slt, %119, %122 : vector<1x256xi32>
    %c0_i32_19 = arith.constant 0 : i32
    %124 = arith.cmpi slt, %117, %c0_i32_19 : i32
    %125 = vector.broadcast %124 : i1 to vector<1x256xi1>
    %126 = vector.broadcast %125 : vector<1x256xi1> to vector<1x256xi1>
    %127 = arith.xori %123, %126 : vector<1x256xi1>
    %128 = arith.andi %127, %121 : vector<1x256xi1>
    %129 = vector.broadcast %117 : i32 to vector<1x256xi32>
    %130 = arith.addi %119, %129 : vector<1x256xi32>
    %131 = arith.select %128, %130, %119 : vector<1x256xi1>, vector<1x256xi32>
    %c-3_i32 = arith.constant -3 : i32
    %132 = vector.broadcast %c-3_i32 : i32 to vector<1x256xi32>
    %133 = arith.addi %131, %132 : vector<1x256xi32>
    %c0_i32_20 = arith.constant 0 : i32
    %134 = vector.broadcast %c0_i32_20 : i32 to vector<1x256xi32>
    %135 = arith.cmpi sge, %133, %134 : vector<1x256xi32>
    %c-3_i32_21 = arith.constant -3 : i32
    %136 = vector.broadcast %c-3_i32_21 : i32 to vector<1x256xi32>
    %137 = arith.addi %131, %136 : vector<1x256xi32>
    %c16_i32_22 = arith.constant 16 : i32
    %138 = vector.broadcast %c16_i32_22 : i32 to vector<1x256xi32>
    %139 = arith.cmpi slt, %137, %138 : vector<1x256xi32>
    %140 = arith.andi %135, %139 : vector<1x256xi1>
    %c-2_i32 = arith.constant -2 : i32
    %141 = vector.broadcast %c-2_i32 : i32 to vector<1x256xi32>
    %142 = arith.addi %131, %141 : vector<1x256xi32>
    %c0_i32_23 = arith.constant 0 : i32
    %143 = vector.broadcast %c0_i32_23 : i32 to vector<1x256xi32>
    %144 = arith.cmpi sge, %142, %143 : vector<1x256xi32>
    %c-2_i32_24 = arith.constant -2 : i32
    %145 = vector.broadcast %c-2_i32_24 : i32 to vector<1x256xi32>
    %146 = arith.addi %131, %145 : vector<1x256xi32>
    %c16_i32_25 = arith.constant 16 : i32
    %147 = vector.broadcast %c16_i32_25 : i32 to vector<1x256xi32>
    %148 = arith.cmpi slt, %146, %147 : vector<1x256xi32>
    %149 = arith.andi %144, %148 : vector<1x256xi1>
    %c-1_i32 = arith.constant -1 : i32
    %150 = vector.broadcast %c-1_i32 : i32 to vector<1x256xi32>
    %151 = arith.addi %131, %150 : vector<1x256xi32>
    %c0_i32_26 = arith.constant 0 : i32
    %152 = vector.broadcast %c0_i32_26 : i32 to vector<1x256xi32>
    %153 = arith.cmpi sge, %151, %152 : vector<1x256xi32>
    %c-1_i32_27 = arith.constant -1 : i32
    %154 = vector.broadcast %c-1_i32_27 : i32 to vector<1x256xi32>
    %155 = arith.addi %131, %154 : vector<1x256xi32>
    %c16_i32_28 = arith.constant 16 : i32
    %156 = vector.broadcast %c16_i32_28 : i32 to vector<1x256xi32>
    %157 = arith.cmpi slt, %155, %156 : vector<1x256xi32>
    %158 = arith.andi %153, %157 : vector<1x256xi1>
    %c1_i32_29 = arith.constant 1 : i32
    %159 = vector.broadcast %c1_i32_29 : i32 to vector<1x256xi32>
    %160 = arith.addi %131, %159 : vector<1x256xi32>
    %c0_i32_30 = arith.constant 0 : i32
    %161 = vector.broadcast %c0_i32_30 : i32 to vector<1x256xi32>
    %162 = arith.cmpi sge, %160, %161 : vector<1x256xi32>
    %c1_i32_31 = arith.constant 1 : i32
    %163 = vector.broadcast %c1_i32_31 : i32 to vector<1x256xi32>
    %164 = arith.addi %131, %163 : vector<1x256xi32>
    %c16_i32_32 = arith.constant 16 : i32
    %165 = vector.broadcast %c16_i32_32 : i32 to vector<1x256xi32>
    %166 = arith.cmpi slt, %164, %165 : vector<1x256xi32>
    %167 = arith.andi %162, %166 : vector<1x256xi1>
    %c2_i32 = arith.constant 2 : i32
    %168 = vector.broadcast %c2_i32 : i32 to vector<1x256xi32>
    %169 = arith.addi %131, %168 : vector<1x256xi32>
    %c0_i32_33 = arith.constant 0 : i32
    %170 = vector.broadcast %c0_i32_33 : i32 to vector<1x256xi32>
    %171 = arith.cmpi sge, %169, %170 : vector<1x256xi32>
    %c2_i32_34 = arith.constant 2 : i32
    %172 = vector.broadcast %c2_i32_34 : i32 to vector<1x256xi32>
    %173 = arith.addi %131, %172 : vector<1x256xi32>
    %c16_i32_35 = arith.constant 16 : i32
    %174 = vector.broadcast %c16_i32_35 : i32 to vector<1x256xi32>
    %175 = arith.cmpi slt, %173, %174 : vector<1x256xi32>
    %176 = arith.andi %171, %175 : vector<1x256xi1>
    %c3_i32 = arith.constant 3 : i32
    %177 = vector.broadcast %c3_i32 : i32 to vector<1x256xi32>
    %178 = arith.addi %131, %177 : vector<1x256xi32>
    %c0_i32_36 = arith.constant 0 : i32
    %179 = vector.broadcast %c0_i32_36 : i32 to vector<1x256xi32>
    %180 = arith.cmpi sge, %178, %179 : vector<1x256xi32>
    %c3_i32_37 = arith.constant 3 : i32
    %181 = vector.broadcast %c3_i32_37 : i32 to vector<1x256xi32>
    %182 = arith.addi %131, %181 : vector<1x256xi32>
    %c16_i32_38 = arith.constant 16 : i32
    %183 = vector.broadcast %c16_i32_38 : i32 to vector<1x256xi32>
    %184 = arith.cmpi slt, %182, %183 : vector<1x256xi32>
    %185 = arith.andi %180, %184 : vector<1x256xi1>
    %cst_39 = arith.constant 0.000000e+00 : f32
    %186 = vector.broadcast %cst_39 : f32 to vector<1x256xf32>
    %c0_40 = arith.constant 0 : index
    %c0_41 = arith.constant 0 : index
    %c0_42 = arith.constant 0 : index
    %187 = vector.load %arg4[%c0_40, %c0_41, %c0_42] : memref<1x2x358xf32, #tpu.memory_space<vmem>>, vector<1x1x262xf32>
    %188 = vector.shape_cast %187 : vector<1x1x262xf32> to vector<1x262xf32>
    %c0_43 = arith.constant 0 : index
    %c1_44 = arith.constant 1 : index
    %c0_45 = arith.constant 0 : index
    %189 = vector.load %arg4[%c0_43, %c1_44, %c0_45] : memref<1x2x358xf32, #tpu.memory_space<vmem>>, vector<1x1x262xf32>
    %190 = vector.shape_cast %189 : vector<1x1x262xf32> to vector<1x262xf32>
    %191 = vector.extract_strided_slice %188 {offsets = [0, 0], sizes = [1, 256], strides = [1, 1]} : vector<1x262xf32> to vector<1x256xf32>
    %192 = vector.broadcast %17 : f32 to vector<1x256xf32>
    %193 = arith.mulf %192, %191 : vector<1x256xf32>
    %194 = vector.extract_strided_slice %190 {offsets = [0, 0], sizes = [1, 256], strides = [1, 1]} : vector<1x262xf32> to vector<1x256xf32>
    %195 = vector.broadcast %66 : f32 to vector<1x256xf32>
    %196 = arith.mulf %195, %194 : vector<1x256xf32>
    %197 = arith.addf %193, %196 : vector<1x256xf32>
    %cst_46 = arith.constant 0.000000e+00 : f32
    %198 = vector.broadcast %cst_46 : f32 to vector<1x256xf32>
    %199 = arith.select %140, %197, %198 : vector<1x256xi1>, vector<1x256xf32>
    %200 = arith.addf %186, %199 : vector<1x256xf32>
    %201 = vector.extract_strided_slice %188 {offsets = [0, 1], sizes = [1, 256], strides = [1, 1]} : vector<1x262xf32> to vector<1x256xf32>
    %202 = vector.broadcast %18 : f32 to vector<1x256xf32>
    %203 = arith.mulf %202, %201 : vector<1x256xf32>
    %204 = vector.extract_strided_slice %190 {offsets = [0, 1], sizes = [1, 256], strides = [1, 1]} : vector<1x262xf32> to vector<1x256xf32>
    %205 = vector.broadcast %67 : f32 to vector<1x256xf32>
    %206 = arith.mulf %205, %204 : vector<1x256xf32>
    %207 = arith.addf %203, %206 : vector<1x256xf32>
    %cst_47 = arith.constant 0.000000e+00 : f32
    %208 = vector.broadcast %cst_47 : f32 to vector<1x256xf32>
    %209 = arith.select %149, %207, %208 : vector<1x256xi1>, vector<1x256xf32>
    %210 = arith.addf %200, %209 : vector<1x256xf32>
    %211 = vector.extract_strided_slice %188 {offsets = [0, 2], sizes = [1, 256], strides = [1, 1]} : vector<1x262xf32> to vector<1x256xf32>
    %212 = vector.broadcast %19 : f32 to vector<1x256xf32>
    %213 = arith.mulf %212, %211 : vector<1x256xf32>
    %214 = vector.extract_strided_slice %190 {offsets = [0, 2], sizes = [1, 256], strides = [1, 1]} : vector<1x262xf32> to vector<1x256xf32>
    %215 = vector.broadcast %68 : f32 to vector<1x256xf32>
    %216 = arith.mulf %215, %214 : vector<1x256xf32>
    %217 = arith.addf %213, %216 : vector<1x256xf32>
    %cst_48 = arith.constant 0.000000e+00 : f32
    %218 = vector.broadcast %cst_48 : f32 to vector<1x256xf32>
    %219 = arith.select %158, %217, %218 : vector<1x256xi1>, vector<1x256xf32>
    %220 = arith.addf %210, %219 : vector<1x256xf32>
    %221 = vector.extract_strided_slice %188 {offsets = [0, 3], sizes = [1, 256], strides = [1, 1]} : vector<1x262xf32> to vector<1x256xf32>
    %222 = vector.broadcast %20 : f32 to vector<1x256xf32>
    %223 = arith.mulf %222, %221 : vector<1x256xf32>
    %224 = vector.extract_strided_slice %190 {offsets = [0, 3], sizes = [1, 256], strides = [1, 1]} : vector<1x262xf32> to vector<1x256xf32>
    %225 = vector.broadcast %69 : f32 to vector<1x256xf32>
    %226 = arith.mulf %225, %224 : vector<1x256xf32>
    %227 = arith.addf %223, %226 : vector<1x256xf32>
    %228 = arith.addf %220, %227 : vector<1x256xf32>
    %229 = vector.extract_strided_slice %188 {offsets = [0, 4], sizes = [1, 256], strides = [1, 1]} : vector<1x262xf32> to vector<1x256xf32>
    %230 = vector.broadcast %21 : f32 to vector<1x256xf32>
    %231 = arith.mulf %230, %229 : vector<1x256xf32>
    %232 = vector.extract_strided_slice %190 {offsets = [0, 4], sizes = [1, 256], strides = [1, 1]} : vector<1x262xf32> to vector<1x256xf32>
    %233 = vector.broadcast %70 : f32 to vector<1x256xf32>
    %234 = arith.mulf %233, %232 : vector<1x256xf32>
    %235 = arith.addf %231, %234 : vector<1x256xf32>
    %cst_49 = arith.constant 0.000000e+00 : f32
    %236 = vector.broadcast %cst_49 : f32 to vector<1x256xf32>
    %237 = arith.select %167, %235, %236 : vector<1x256xi1>, vector<1x256xf32>
    %238 = arith.addf %228, %237 : vector<1x256xf32>
    %239 = vector.extract_strided_slice %188 {offsets = [0, 5], sizes = [1, 256], strides = [1, 1]} : vector<1x262xf32> to vector<1x256xf32>
    %240 = vector.broadcast %22 : f32 to vector<1x256xf32>
    %241 = arith.mulf %240, %239 : vector<1x256xf32>
    %242 = vector.extract_strided_slice %190 {offsets = [0, 5], sizes = [1, 256], strides = [1, 1]} : vector<1x262xf32> to vector<1x256xf32>
    %243 = vector.broadcast %71 : f32 to vector<1x256xf32>
    %244 = arith.mulf %243, %242 : vector<1x256xf32>
    %245 = arith.addf %241, %244 : vector<1x256xf32>
    %cst_50 = arith.constant 0.000000e+00 : f32
    %246 = vector.broadcast %cst_50 : f32 to vector<1x256xf32>
    %247 = arith.select %176, %245, %246 : vector<1x256xi1>, vector<1x256xf32>
    %248 = arith.addf %238, %247 : vector<1x256xf32>
    %249 = vector.extract_strided_slice %188 {offsets = [0, 6], sizes = [1, 256], strides = [1, 1]} : vector<1x262xf32> to vector<1x256xf32>
    %250 = vector.broadcast %23 : f32 to vector<1x256xf32>
    %251 = arith.mulf %250, %249 : vector<1x256xf32>
    %252 = vector.extract_strided_slice %190 {offsets = [0, 6], sizes = [1, 256], strides = [1, 1]} : vector<1x262xf32> to vector<1x256xf32>
    %253 = vector.broadcast %72 : f32 to vector<1x256xf32>
    %254 = arith.mulf %253, %252 : vector<1x256xf32>
    %255 = arith.addf %251, %254 : vector<1x256xf32>
    %cst_51 = arith.constant 0.000000e+00 : f32
    %256 = vector.broadcast %cst_51 : f32 to vector<1x256xf32>
    %257 = arith.select %185, %255, %256 : vector<1x256xi1>, vector<1x256xf32>
    %258 = arith.addf %248, %257 : vector<1x256xf32>
    %c0_52 = arith.constant 0 : index
    %c0_53 = arith.constant 0 : index
    %c16_54 = arith.constant 16 : index
    %259 = vector.load %arg4[%c0_52, %c0_53, %c16_54] : memref<1x2x358xf32, #tpu.memory_space<vmem>>, vector<1x1x262xf32>
    %260 = vector.shape_cast %259 : vector<1x1x262xf32> to vector<1x262xf32>
    %c0_55 = arith.constant 0 : index
    %c1_56 = arith.constant 1 : index
    %c16_57 = arith.constant 16 : index
    %261 = vector.load %arg4[%c0_55, %c1_56, %c16_57] : memref<1x2x358xf32, #tpu.memory_space<vmem>>, vector<1x1x262xf32>
    %262 = vector.shape_cast %261 : vector<1x1x262xf32> to vector<1x262xf32>
    %263 = vector.extract_strided_slice %260 {offsets = [0, 0], sizes = [1, 256], strides = [1, 1]} : vector<1x262xf32> to vector<1x256xf32>
    %264 = vector.broadcast %24 : f32 to vector<1x256xf32>
    %265 = arith.mulf %264, %263 : vector<1x256xf32>
    %266 = vector.extract_strided_slice %262 {offsets = [0, 0], sizes = [1, 256], strides = [1, 1]} : vector<1x262xf32> to vector<1x256xf32>
    %267 = vector.broadcast %73 : f32 to vector<1x256xf32>
    %268 = arith.mulf %267, %266 : vector<1x256xf32>
    %269 = arith.addf %265, %268 : vector<1x256xf32>
    %cst_58 = arith.constant 0.000000e+00 : f32
    %270 = vector.broadcast %cst_58 : f32 to vector<1x256xf32>
    %271 = arith.select %140, %269, %270 : vector<1x256xi1>, vector<1x256xf32>
    %272 = arith.addf %258, %271 : vector<1x256xf32>
    %273 = vector.extract_strided_slice %260 {offsets = [0, 1], sizes = [1, 256], strides = [1, 1]} : vector<1x262xf32> to vector<1x256xf32>
    %274 = vector.broadcast %25 : f32 to vector<1x256xf32>
    %275 = arith.mulf %274, %273 : vector<1x256xf32>
    %276 = vector.extract_strided_slice %262 {offsets = [0, 1], sizes = [1, 256], strides = [1, 1]} : vector<1x262xf32> to vector<1x256xf32>
    %277 = vector.broadcast %74 : f32 to vector<1x256xf32>
    %278 = arith.mulf %277, %276 : vector<1x256xf32>
    %279 = arith.addf %275, %278 : vector<1x256xf32>
    %cst_59 = arith.constant 0.000000e+00 : f32
    %280 = vector.broadcast %cst_59 : f32 to vector<1x256xf32>
    %281 = arith.select %149, %279, %280 : vector<1x256xi1>, vector<1x256xf32>
    %282 = arith.addf %272, %281 : vector<1x256xf32>
    %283 = vector.extract_strided_slice %260 {offsets = [0, 2], sizes = [1, 256], strides = [1, 1]} : vector<1x262xf32> to vector<1x256xf32>
    %284 = vector.broadcast %26 : f32 to vector<1x256xf32>
    %285 = arith.mulf %284, %283 : vector<1x256xf32>
    %286 = vector.extract_strided_slice %262 {offsets = [0, 2], sizes = [1, 256], strides = [1, 1]} : vector<1x262xf32> to vector<1x256xf32>
    %287 = vector.broadcast %75 : f32 to vector<1x256xf32>
    %288 = arith.mulf %287, %286 : vector<1x256xf32>
    %289 = arith.addf %285, %288 : vector<1x256xf32>
    %cst_60 = arith.constant 0.000000e+00 : f32
    %290 = vector.broadcast %cst_60 : f32 to vector<1x256xf32>
    %291 = arith.select %158, %289, %290 : vector<1x256xi1>, vector<1x256xf32>
    %292 = arith.addf %282, %291 : vector<1x256xf32>
    %293 = vector.extract_strided_slice %260 {offsets = [0, 3], sizes = [1, 256], strides = [1, 1]} : vector<1x262xf32> to vector<1x256xf32>
    %294 = vector.broadcast %27 : f32 to vector<1x256xf32>
    %295 = arith.mulf %294, %293 : vector<1x256xf32>
    %296 = vector.extract_strided_slice %262 {offsets = [0, 3], sizes = [1, 256], strides = [1, 1]} : vector<1x262xf32> to vector<1x256xf32>
    %297 = vector.broadcast %76 : f32 to vector<1x256xf32>
    %298 = arith.mulf %297, %296 : vector<1x256xf32>
    %299 = arith.addf %295, %298 : vector<1x256xf32>
    %300 = arith.addf %292, %299 : vector<1x256xf32>
    %301 = vector.extract_strided_slice %260 {offsets = [0, 4], sizes = [1, 256], strides = [1, 1]} : vector<1x262xf32> to vector<1x256xf32>
    %302 = vector.broadcast %28 : f32 to vector<1x256xf32>
    %303 = arith.mulf %302, %301 : vector<1x256xf32>
    %304 = vector.extract_strided_slice %262 {offsets = [0, 4], sizes = [1, 256], strides = [1, 1]} : vector<1x262xf32> to vector<1x256xf32>
    %305 = vector.broadcast %77 : f32 to vector<1x256xf32>
    %306 = arith.mulf %305, %304 : vector<1x256xf32>
    %307 = arith.addf %303, %306 : vector<1x256xf32>
    %cst_61 = arith.constant 0.000000e+00 : f32
    %308 = vector.broadcast %cst_61 : f32 to vector<1x256xf32>
    %309 = arith.select %167, %307, %308 : vector<1x256xi1>, vector<1x256xf32>
    %310 = arith.addf %300, %309 : vector<1x256xf32>
    %311 = vector.extract_strided_slice %260 {offsets = [0, 5], sizes = [1, 256], strides = [1, 1]} : vector<1x262xf32> to vector<1x256xf32>
    %312 = vector.broadcast %29 : f32 to vector<1x256xf32>
    %313 = arith.mulf %312, %311 : vector<1x256xf32>
    %314 = vector.extract_strided_slice %262 {offsets = [0, 5], sizes = [1, 256], strides = [1, 1]} : vector<1x262xf32> to vector<1x256xf32>
    %315 = vector.broadcast %78 : f32 to vector<1x256xf32>
    %316 = arith.mulf %315, %314 : vector<1x256xf32>
    %317 = arith.addf %313, %316 : vector<1x256xf32>
    %cst_62 = arith.constant 0.000000e+00 : f32
    %318 = vector.broadcast %cst_62 : f32 to vector<1x256xf32>
    %319 = arith.select %176, %317, %318 : vector<1x256xi1>, vector<1x256xf32>
    %320 = arith.addf %310, %319 : vector<1x256xf32>
    %321 = vector.extract_strided_slice %260 {offsets = [0, 6], sizes = [1, 256], strides = [1, 1]} : vector<1x262xf32> to vector<1x256xf32>
    %322 = vector.broadcast %30 : f32 to vector<1x256xf32>
    %323 = arith.mulf %322, %321 : vector<1x256xf32>
    %324 = vector.extract_strided_slice %262 {offsets = [0, 6], sizes = [1, 256], strides = [1, 1]} : vector<1x262xf32> to vector<1x256xf32>
    %325 = vector.broadcast %79 : f32 to vector<1x256xf32>
    %326 = arith.mulf %325, %324 : vector<1x256xf32>
    %327 = arith.addf %323, %326 : vector<1x256xf32>
    %cst_63 = arith.constant 0.000000e+00 : f32
    %328 = vector.broadcast %cst_63 : f32 to vector<1x256xf32>
    %329 = arith.select %185, %327, %328 : vector<1x256xi1>, vector<1x256xf32>
    %330 = arith.addf %320, %329 : vector<1x256xf32>
    %c0_64 = arith.constant 0 : index
    %c0_65 = arith.constant 0 : index
    %c32_66 = arith.constant 32 : index
    %331 = vector.load %arg4[%c0_64, %c0_65, %c32_66] : memref<1x2x358xf32, #tpu.memory_space<vmem>>, vector<1x1x262xf32>
    %332 = vector.shape_cast %331 : vector<1x1x262xf32> to vector<1x262xf32>
    %c0_67 = arith.constant 0 : index
    %c1_68 = arith.constant 1 : index
    %c32_69 = arith.constant 32 : index
    %333 = vector.load %arg4[%c0_67, %c1_68, %c32_69] : memref<1x2x358xf32, #tpu.memory_space<vmem>>, vector<1x1x262xf32>
    %334 = vector.shape_cast %333 : vector<1x1x262xf32> to vector<1x262xf32>
    %335 = vector.extract_strided_slice %332 {offsets = [0, 0], sizes = [1, 256], strides = [1, 1]} : vector<1x262xf32> to vector<1x256xf32>
    %336 = vector.broadcast %31 : f32 to vector<1x256xf32>
    %337 = arith.mulf %336, %335 : vector<1x256xf32>
    %338 = vector.extract_strided_slice %334 {offsets = [0, 0], sizes = [1, 256], strides = [1, 1]} : vector<1x262xf32> to vector<1x256xf32>
    %339 = vector.broadcast %80 : f32 to vector<1x256xf32>
    %340 = arith.mulf %339, %338 : vector<1x256xf32>
    %341 = arith.addf %337, %340 : vector<1x256xf32>
    %cst_70 = arith.constant 0.000000e+00 : f32
    %342 = vector.broadcast %cst_70 : f32 to vector<1x256xf32>
    %343 = arith.select %140, %341, %342 : vector<1x256xi1>, vector<1x256xf32>
    %344 = arith.addf %330, %343 : vector<1x256xf32>
    %345 = vector.extract_strided_slice %332 {offsets = [0, 1], sizes = [1, 256], strides = [1, 1]} : vector<1x262xf32> to vector<1x256xf32>
    %346 = vector.broadcast %32 : f32 to vector<1x256xf32>
    %347 = arith.mulf %346, %345 : vector<1x256xf32>
    %348 = vector.extract_strided_slice %334 {offsets = [0, 1], sizes = [1, 256], strides = [1, 1]} : vector<1x262xf32> to vector<1x256xf32>
    %349 = vector.broadcast %81 : f32 to vector<1x256xf32>
    %350 = arith.mulf %349, %348 : vector<1x256xf32>
    %351 = arith.addf %347, %350 : vector<1x256xf32>
    %cst_71 = arith.constant 0.000000e+00 : f32
    %352 = vector.broadcast %cst_71 : f32 to vector<1x256xf32>
    %353 = arith.select %149, %351, %352 : vector<1x256xi1>, vector<1x256xf32>
    %354 = arith.addf %344, %353 : vector<1x256xf32>
    %355 = vector.extract_strided_slice %332 {offsets = [0, 2], sizes = [1, 256], strides = [1, 1]} : vector<1x262xf32> to vector<1x256xf32>
    %356 = vector.broadcast %33 : f32 to vector<1x256xf32>
    %357 = arith.mulf %356, %355 : vector<1x256xf32>
    %358 = vector.extract_strided_slice %334 {offsets = [0, 2], sizes = [1, 256], strides = [1, 1]} : vector<1x262xf32> to vector<1x256xf32>
    %359 = vector.broadcast %82 : f32 to vector<1x256xf32>
    %360 = arith.mulf %359, %358 : vector<1x256xf32>
    %361 = arith.addf %357, %360 : vector<1x256xf32>
    %cst_72 = arith.constant 0.000000e+00 : f32
    %362 = vector.broadcast %cst_72 : f32 to vector<1x256xf32>
    %363 = arith.select %158, %361, %362 : vector<1x256xi1>, vector<1x256xf32>
    %364 = arith.addf %354, %363 : vector<1x256xf32>
    %365 = vector.extract_strided_slice %332 {offsets = [0, 3], sizes = [1, 256], strides = [1, 1]} : vector<1x262xf32> to vector<1x256xf32>
    %366 = vector.broadcast %34 : f32 to vector<1x256xf32>
    %367 = arith.mulf %366, %365 : vector<1x256xf32>
    %368 = vector.extract_strided_slice %334 {offsets = [0, 3], sizes = [1, 256], strides = [1, 1]} : vector<1x262xf32> to vector<1x256xf32>
    %369 = vector.broadcast %83 : f32 to vector<1x256xf32>
    %370 = arith.mulf %369, %368 : vector<1x256xf32>
    %371 = arith.addf %367, %370 : vector<1x256xf32>
    %372 = arith.addf %364, %371 : vector<1x256xf32>
    %373 = vector.extract_strided_slice %332 {offsets = [0, 4], sizes = [1, 256], strides = [1, 1]} : vector<1x262xf32> to vector<1x256xf32>
    %374 = vector.broadcast %35 : f32 to vector<1x256xf32>
    %375 = arith.mulf %374, %373 : vector<1x256xf32>
    %376 = vector.extract_strided_slice %334 {offsets = [0, 4], sizes = [1, 256], strides = [1, 1]} : vector<1x262xf32> to vector<1x256xf32>
    %377 = vector.broadcast %84 : f32 to vector<1x256xf32>
    %378 = arith.mulf %377, %376 : vector<1x256xf32>
    %379 = arith.addf %375, %378 : vector<1x256xf32>
    %cst_73 = arith.constant 0.000000e+00 : f32
    %380 = vector.broadcast %cst_73 : f32 to vector<1x256xf32>
    %381 = arith.select %167, %379, %380 : vector<1x256xi1>, vector<1x256xf32>
    %382 = arith.addf %372, %381 : vector<1x256xf32>
    %383 = vector.extract_strided_slice %332 {offsets = [0, 5], sizes = [1, 256], strides = [1, 1]} : vector<1x262xf32> to vector<1x256xf32>
    %384 = vector.broadcast %36 : f32 to vector<1x256xf32>
    %385 = arith.mulf %384, %383 : vector<1x256xf32>
    %386 = vector.extract_strided_slice %334 {offsets = [0, 5], sizes = [1, 256], strides = [1, 1]} : vector<1x262xf32> to vector<1x256xf32>
    %387 = vector.broadcast %85 : f32 to vector<1x256xf32>
    %388 = arith.mulf %387, %386 : vector<1x256xf32>
    %389 = arith.addf %385, %388 : vector<1x256xf32>
    %cst_74 = arith.constant 0.000000e+00 : f32
    %390 = vector.broadcast %cst_74 : f32 to vector<1x256xf32>
    %391 = arith.select %176, %389, %390 : vector<1x256xi1>, vector<1x256xf32>
    %392 = arith.addf %382, %391 : vector<1x256xf32>
    %393 = vector.extract_strided_slice %332 {offsets = [0, 6], sizes = [1, 256], strides = [1, 1]} : vector<1x262xf32> to vector<1x256xf32>
    %394 = vector.broadcast %37 : f32 to vector<1x256xf32>
    %395 = arith.mulf %394, %393 : vector<1x256xf32>
    %396 = vector.extract_strided_slice %334 {offsets = [0, 6], sizes = [1, 256], strides = [1, 1]} : vector<1x262xf32> to vector<1x256xf32>
    %397 = vector.broadcast %86 : f32 to vector<1x256xf32>
    %398 = arith.mulf %397, %396 : vector<1x256xf32>
    %399 = arith.addf %395, %398 : vector<1x256xf32>
    %cst_75 = arith.constant 0.000000e+00 : f32
    %400 = vector.broadcast %cst_75 : f32 to vector<1x256xf32>
    %401 = arith.select %185, %399, %400 : vector<1x256xi1>, vector<1x256xf32>
    %402 = arith.addf %392, %401 : vector<1x256xf32>
    %c0_76 = arith.constant 0 : index
    %c0_77 = arith.constant 0 : index
    %c48_78 = arith.constant 48 : index
    %403 = vector.load %arg4[%c0_76, %c0_77, %c48_78] : memref<1x2x358xf32, #tpu.memory_space<vmem>>, vector<1x1x262xf32>
    %404 = vector.shape_cast %403 : vector<1x1x262xf32> to vector<1x262xf32>
    %c0_79 = arith.constant 0 : index
    %c1_80 = arith.constant 1 : index
    %c48_81 = arith.constant 48 : index
    %405 = vector.load %arg4[%c0_79, %c1_80, %c48_81] : memref<1x2x358xf32, #tpu.memory_space<vmem>>, vector<1x1x262xf32>
    %406 = vector.shape_cast %405 : vector<1x1x262xf32> to vector<1x262xf32>
    %407 = vector.extract_strided_slice %404 {offsets = [0, 0], sizes = [1, 256], strides = [1, 1]} : vector<1x262xf32> to vector<1x256xf32>
    %408 = vector.broadcast %38 : f32 to vector<1x256xf32>
    %409 = arith.mulf %408, %407 : vector<1x256xf32>
    %410 = vector.extract_strided_slice %406 {offsets = [0, 0], sizes = [1, 256], strides = [1, 1]} : vector<1x262xf32> to vector<1x256xf32>
    %411 = vector.broadcast %87 : f32 to vector<1x256xf32>
    %412 = arith.mulf %411, %410 : vector<1x256xf32>
    %413 = arith.addf %409, %412 : vector<1x256xf32>
    %cst_82 = arith.constant 0.000000e+00 : f32
    %414 = vector.broadcast %cst_82 : f32 to vector<1x256xf32>
    %415 = arith.select %140, %413, %414 : vector<1x256xi1>, vector<1x256xf32>
    %416 = arith.addf %402, %415 : vector<1x256xf32>
    %417 = vector.extract_strided_slice %404 {offsets = [0, 1], sizes = [1, 256], strides = [1, 1]} : vector<1x262xf32> to vector<1x256xf32>
    %418 = vector.broadcast %39 : f32 to vector<1x256xf32>
    %419 = arith.mulf %418, %417 : vector<1x256xf32>
    %420 = vector.extract_strided_slice %406 {offsets = [0, 1], sizes = [1, 256], strides = [1, 1]} : vector<1x262xf32> to vector<1x256xf32>
    %421 = vector.broadcast %88 : f32 to vector<1x256xf32>
    %422 = arith.mulf %421, %420 : vector<1x256xf32>
    %423 = arith.addf %419, %422 : vector<1x256xf32>
    %cst_83 = arith.constant 0.000000e+00 : f32
    %424 = vector.broadcast %cst_83 : f32 to vector<1x256xf32>
    %425 = arith.select %149, %423, %424 : vector<1x256xi1>, vector<1x256xf32>
    %426 = arith.addf %416, %425 : vector<1x256xf32>
    %427 = vector.extract_strided_slice %404 {offsets = [0, 2], sizes = [1, 256], strides = [1, 1]} : vector<1x262xf32> to vector<1x256xf32>
    %428 = vector.broadcast %40 : f32 to vector<1x256xf32>
    %429 = arith.mulf %428, %427 : vector<1x256xf32>
    %430 = vector.extract_strided_slice %406 {offsets = [0, 2], sizes = [1, 256], strides = [1, 1]} : vector<1x262xf32> to vector<1x256xf32>
    %431 = vector.broadcast %89 : f32 to vector<1x256xf32>
    %432 = arith.mulf %431, %430 : vector<1x256xf32>
    %433 = arith.addf %429, %432 : vector<1x256xf32>
    %cst_84 = arith.constant 0.000000e+00 : f32
    %434 = vector.broadcast %cst_84 : f32 to vector<1x256xf32>
    %435 = arith.select %158, %433, %434 : vector<1x256xi1>, vector<1x256xf32>
    %436 = arith.addf %426, %435 : vector<1x256xf32>
    %437 = vector.extract_strided_slice %404 {offsets = [0, 3], sizes = [1, 256], strides = [1, 1]} : vector<1x262xf32> to vector<1x256xf32>
    %438 = vector.broadcast %41 : f32 to vector<1x256xf32>
    %439 = arith.mulf %438, %437 : vector<1x256xf32>
    %440 = vector.extract_strided_slice %406 {offsets = [0, 3], sizes = [1, 256], strides = [1, 1]} : vector<1x262xf32> to vector<1x256xf32>
    %441 = vector.broadcast %90 : f32 to vector<1x256xf32>
    %442 = arith.mulf %441, %440 : vector<1x256xf32>
    %443 = arith.addf %439, %442 : vector<1x256xf32>
    %444 = arith.addf %436, %443 : vector<1x256xf32>
    %445 = vector.extract_strided_slice %404 {offsets = [0, 4], sizes = [1, 256], strides = [1, 1]} : vector<1x262xf32> to vector<1x256xf32>
    %446 = vector.broadcast %42 : f32 to vector<1x256xf32>
    %447 = arith.mulf %446, %445 : vector<1x256xf32>
    %448 = vector.extract_strided_slice %406 {offsets = [0, 4], sizes = [1, 256], strides = [1, 1]} : vector<1x262xf32> to vector<1x256xf32>
    %449 = vector.broadcast %91 : f32 to vector<1x256xf32>
    %450 = arith.mulf %449, %448 : vector<1x256xf32>
    %451 = arith.addf %447, %450 : vector<1x256xf32>
    %cst_85 = arith.constant 0.000000e+00 : f32
    %452 = vector.broadcast %cst_85 : f32 to vector<1x256xf32>
    %453 = arith.select %167, %451, %452 : vector<1x256xi1>, vector<1x256xf32>
    %454 = arith.addf %444, %453 : vector<1x256xf32>
    %455 = vector.extract_strided_slice %404 {offsets = [0, 5], sizes = [1, 256], strides = [1, 1]} : vector<1x262xf32> to vector<1x256xf32>
    %456 = vector.broadcast %43 : f32 to vector<1x256xf32>
    %457 = arith.mulf %456, %455 : vector<1x256xf32>
    %458 = vector.extract_strided_slice %406 {offsets = [0, 5], sizes = [1, 256], strides = [1, 1]} : vector<1x262xf32> to vector<1x256xf32>
    %459 = vector.broadcast %92 : f32 to vector<1x256xf32>
    %460 = arith.mulf %459, %458 : vector<1x256xf32>
    %461 = arith.addf %457, %460 : vector<1x256xf32>
    %cst_86 = arith.constant 0.000000e+00 : f32
    %462 = vector.broadcast %cst_86 : f32 to vector<1x256xf32>
    %463 = arith.select %176, %461, %462 : vector<1x256xi1>, vector<1x256xf32>
    %464 = arith.addf %454, %463 : vector<1x256xf32>
    %465 = vector.extract_strided_slice %404 {offsets = [0, 6], sizes = [1, 256], strides = [1, 1]} : vector<1x262xf32> to vector<1x256xf32>
    %466 = vector.broadcast %44 : f32 to vector<1x256xf32>
    %467 = arith.mulf %466, %465 : vector<1x256xf32>
    %468 = vector.extract_strided_slice %406 {offsets = [0, 6], sizes = [1, 256], strides = [1, 1]} : vector<1x262xf32> to vector<1x256xf32>
    %469 = vector.broadcast %93 : f32 to vector<1x256xf32>
    %470 = arith.mulf %469, %468 : vector<1x256xf32>
    %471 = arith.addf %467, %470 : vector<1x256xf32>
    %cst_87 = arith.constant 0.000000e+00 : f32
    %472 = vector.broadcast %cst_87 : f32 to vector<1x256xf32>
    %473 = arith.select %185, %471, %472 : vector<1x256xi1>, vector<1x256xf32>
    %474 = arith.addf %464, %473 : vector<1x256xf32>
    %c0_88 = arith.constant 0 : index
    %c0_89 = arith.constant 0 : index
    %c64_90 = arith.constant 64 : index
    %475 = vector.load %arg4[%c0_88, %c0_89, %c64_90] : memref<1x2x358xf32, #tpu.memory_space<vmem>>, vector<1x1x262xf32>
    %476 = vector.shape_cast %475 : vector<1x1x262xf32> to vector<1x262xf32>
    %c0_91 = arith.constant 0 : index
    %c1_92 = arith.constant 1 : index
    %c64_93 = arith.constant 64 : index
    %477 = vector.load %arg4[%c0_91, %c1_92, %c64_93] : memref<1x2x358xf32, #tpu.memory_space<vmem>>, vector<1x1x262xf32>
    %478 = vector.shape_cast %477 : vector<1x1x262xf32> to vector<1x262xf32>
    %479 = vector.extract_strided_slice %476 {offsets = [0, 0], sizes = [1, 256], strides = [1, 1]} : vector<1x262xf32> to vector<1x256xf32>
    %480 = vector.broadcast %45 : f32 to vector<1x256xf32>
    %481 = arith.mulf %480, %479 : vector<1x256xf32>
    %482 = vector.extract_strided_slice %478 {offsets = [0, 0], sizes = [1, 256], strides = [1, 1]} : vector<1x262xf32> to vector<1x256xf32>
    %483 = vector.broadcast %94 : f32 to vector<1x256xf32>
    %484 = arith.mulf %483, %482 : vector<1x256xf32>
    %485 = arith.addf %481, %484 : vector<1x256xf32>
    %cst_94 = arith.constant 0.000000e+00 : f32
    %486 = vector.broadcast %cst_94 : f32 to vector<1x256xf32>
    %487 = arith.select %140, %485, %486 : vector<1x256xi1>, vector<1x256xf32>
    %488 = arith.addf %474, %487 : vector<1x256xf32>
    %489 = vector.extract_strided_slice %476 {offsets = [0, 1], sizes = [1, 256], strides = [1, 1]} : vector<1x262xf32> to vector<1x256xf32>
    %490 = vector.broadcast %46 : f32 to vector<1x256xf32>
    %491 = arith.mulf %490, %489 : vector<1x256xf32>
    %492 = vector.extract_strided_slice %478 {offsets = [0, 1], sizes = [1, 256], strides = [1, 1]} : vector<1x262xf32> to vector<1x256xf32>
    %493 = vector.broadcast %95 : f32 to vector<1x256xf32>
    %494 = arith.mulf %493, %492 : vector<1x256xf32>
    %495 = arith.addf %491, %494 : vector<1x256xf32>
    %cst_95 = arith.constant 0.000000e+00 : f32
    %496 = vector.broadcast %cst_95 : f32 to vector<1x256xf32>
    %497 = arith.select %149, %495, %496 : vector<1x256xi1>, vector<1x256xf32>
    %498 = arith.addf %488, %497 : vector<1x256xf32>
    %499 = vector.extract_strided_slice %476 {offsets = [0, 2], sizes = [1, 256], strides = [1, 1]} : vector<1x262xf32> to vector<1x256xf32>
    %500 = vector.broadcast %47 : f32 to vector<1x256xf32>
    %501 = arith.mulf %500, %499 : vector<1x256xf32>
    %502 = vector.extract_strided_slice %478 {offsets = [0, 2], sizes = [1, 256], strides = [1, 1]} : vector<1x262xf32> to vector<1x256xf32>
    %503 = vector.broadcast %96 : f32 to vector<1x256xf32>
    %504 = arith.mulf %503, %502 : vector<1x256xf32>
    %505 = arith.addf %501, %504 : vector<1x256xf32>
    %cst_96 = arith.constant 0.000000e+00 : f32
    %506 = vector.broadcast %cst_96 : f32 to vector<1x256xf32>
    %507 = arith.select %158, %505, %506 : vector<1x256xi1>, vector<1x256xf32>
    %508 = arith.addf %498, %507 : vector<1x256xf32>
    %509 = vector.extract_strided_slice %476 {offsets = [0, 3], sizes = [1, 256], strides = [1, 1]} : vector<1x262xf32> to vector<1x256xf32>
    %510 = vector.broadcast %48 : f32 to vector<1x256xf32>
    %511 = arith.mulf %510, %509 : vector<1x256xf32>
    %512 = vector.extract_strided_slice %478 {offsets = [0, 3], sizes = [1, 256], strides = [1, 1]} : vector<1x262xf32> to vector<1x256xf32>
    %513 = vector.broadcast %97 : f32 to vector<1x256xf32>
    %514 = arith.mulf %513, %512 : vector<1x256xf32>
    %515 = arith.addf %511, %514 : vector<1x256xf32>
    %516 = arith.addf %508, %515 : vector<1x256xf32>
    %517 = vector.extract_strided_slice %476 {offsets = [0, 4], sizes = [1, 256], strides = [1, 1]} : vector<1x262xf32> to vector<1x256xf32>
    %518 = vector.broadcast %49 : f32 to vector<1x256xf32>
    %519 = arith.mulf %518, %517 : vector<1x256xf32>
    %520 = vector.extract_strided_slice %478 {offsets = [0, 4], sizes = [1, 256], strides = [1, 1]} : vector<1x262xf32> to vector<1x256xf32>
    %521 = vector.broadcast %98 : f32 to vector<1x256xf32>
    %522 = arith.mulf %521, %520 : vector<1x256xf32>
    %523 = arith.addf %519, %522 : vector<1x256xf32>
    %cst_97 = arith.constant 0.000000e+00 : f32
    %524 = vector.broadcast %cst_97 : f32 to vector<1x256xf32>
    %525 = arith.select %167, %523, %524 : vector<1x256xi1>, vector<1x256xf32>
    %526 = arith.addf %516, %525 : vector<1x256xf32>
    %527 = vector.extract_strided_slice %476 {offsets = [0, 5], sizes = [1, 256], strides = [1, 1]} : vector<1x262xf32> to vector<1x256xf32>
    %528 = vector.broadcast %50 : f32 to vector<1x256xf32>
    %529 = arith.mulf %528, %527 : vector<1x256xf32>
    %530 = vector.extract_strided_slice %478 {offsets = [0, 5], sizes = [1, 256], strides = [1, 1]} : vector<1x262xf32> to vector<1x256xf32>
    %531 = vector.broadcast %99 : f32 to vector<1x256xf32>
    %532 = arith.mulf %531, %530 : vector<1x256xf32>
    %533 = arith.addf %529, %532 : vector<1x256xf32>
    %cst_98 = arith.constant 0.000000e+00 : f32
    %534 = vector.broadcast %cst_98 : f32 to vector<1x256xf32>
    %535 = arith.select %176, %533, %534 : vector<1x256xi1>, vector<1x256xf32>
    %536 = arith.addf %526, %535 : vector<1x256xf32>
    %537 = vector.extract_strided_slice %476 {offsets = [0, 6], sizes = [1, 256], strides = [1, 1]} : vector<1x262xf32> to vector<1x256xf32>
    %538 = vector.broadcast %51 : f32 to vector<1x256xf32>
    %539 = arith.mulf %538, %537 : vector<1x256xf32>
    %540 = vector.extract_strided_slice %478 {offsets = [0, 6], sizes = [1, 256], strides = [1, 1]} : vector<1x262xf32> to vector<1x256xf32>
    %541 = vector.broadcast %100 : f32 to vector<1x256xf32>
    %542 = arith.mulf %541, %540 : vector<1x256xf32>
    %543 = arith.addf %539, %542 : vector<1x256xf32>
    %cst_99 = arith.constant 0.000000e+00 : f32
    %544 = vector.broadcast %cst_99 : f32 to vector<1x256xf32>
    %545 = arith.select %185, %543, %544 : vector<1x256xi1>, vector<1x256xf32>
    %546 = arith.addf %536, %545 : vector<1x256xf32>
    %c0_100 = arith.constant 0 : index
    %c0_101 = arith.constant 0 : index
    %c80_102 = arith.constant 80 : index
    %547 = vector.load %arg4[%c0_100, %c0_101, %c80_102] : memref<1x2x358xf32, #tpu.memory_space<vmem>>, vector<1x1x262xf32>
    %548 = vector.shape_cast %547 : vector<1x1x262xf32> to vector<1x262xf32>
    %c0_103 = arith.constant 0 : index
    %c1_104 = arith.constant 1 : index
    %c80_105 = arith.constant 80 : index
    %549 = vector.load %arg4[%c0_103, %c1_104, %c80_105] : memref<1x2x358xf32, #tpu.memory_space<vmem>>, vector<1x1x262xf32>
    %550 = vector.shape_cast %549 : vector<1x1x262xf32> to vector<1x262xf32>
    %551 = vector.extract_strided_slice %548 {offsets = [0, 0], sizes = [1, 256], strides = [1, 1]} : vector<1x262xf32> to vector<1x256xf32>
    %552 = vector.broadcast %52 : f32 to vector<1x256xf32>
    %553 = arith.mulf %552, %551 : vector<1x256xf32>
    %554 = vector.extract_strided_slice %550 {offsets = [0, 0], sizes = [1, 256], strides = [1, 1]} : vector<1x262xf32> to vector<1x256xf32>
    %555 = vector.broadcast %101 : f32 to vector<1x256xf32>
    %556 = arith.mulf %555, %554 : vector<1x256xf32>
    %557 = arith.addf %553, %556 : vector<1x256xf32>
    %cst_106 = arith.constant 0.000000e+00 : f32
    %558 = vector.broadcast %cst_106 : f32 to vector<1x256xf32>
    %559 = arith.select %140, %557, %558 : vector<1x256xi1>, vector<1x256xf32>
    %560 = arith.addf %546, %559 : vector<1x256xf32>
    %561 = vector.extract_strided_slice %548 {offsets = [0, 1], sizes = [1, 256], strides = [1, 1]} : vector<1x262xf32> to vector<1x256xf32>
    %562 = vector.broadcast %53 : f32 to vector<1x256xf32>
    %563 = arith.mulf %562, %561 : vector<1x256xf32>
    %564 = vector.extract_strided_slice %550 {offsets = [0, 1], sizes = [1, 256], strides = [1, 1]} : vector<1x262xf32> to vector<1x256xf32>
    %565 = vector.broadcast %102 : f32 to vector<1x256xf32>
    %566 = arith.mulf %565, %564 : vector<1x256xf32>
    %567 = arith.addf %563, %566 : vector<1x256xf32>
    %cst_107 = arith.constant 0.000000e+00 : f32
    %568 = vector.broadcast %cst_107 : f32 to vector<1x256xf32>
    %569 = arith.select %149, %567, %568 : vector<1x256xi1>, vector<1x256xf32>
    %570 = arith.addf %560, %569 : vector<1x256xf32>
    %571 = vector.extract_strided_slice %548 {offsets = [0, 2], sizes = [1, 256], strides = [1, 1]} : vector<1x262xf32> to vector<1x256xf32>
    %572 = vector.broadcast %54 : f32 to vector<1x256xf32>
    %573 = arith.mulf %572, %571 : vector<1x256xf32>
    %574 = vector.extract_strided_slice %550 {offsets = [0, 2], sizes = [1, 256], strides = [1, 1]} : vector<1x262xf32> to vector<1x256xf32>
    %575 = vector.broadcast %103 : f32 to vector<1x256xf32>
    %576 = arith.mulf %575, %574 : vector<1x256xf32>
    %577 = arith.addf %573, %576 : vector<1x256xf32>
    %cst_108 = arith.constant 0.000000e+00 : f32
    %578 = vector.broadcast %cst_108 : f32 to vector<1x256xf32>
    %579 = arith.select %158, %577, %578 : vector<1x256xi1>, vector<1x256xf32>
    %580 = arith.addf %570, %579 : vector<1x256xf32>
    %581 = vector.extract_strided_slice %548 {offsets = [0, 3], sizes = [1, 256], strides = [1, 1]} : vector<1x262xf32> to vector<1x256xf32>
    %582 = vector.broadcast %55 : f32 to vector<1x256xf32>
    %583 = arith.mulf %582, %581 : vector<1x256xf32>
    %584 = vector.extract_strided_slice %550 {offsets = [0, 3], sizes = [1, 256], strides = [1, 1]} : vector<1x262xf32> to vector<1x256xf32>
    %585 = vector.broadcast %104 : f32 to vector<1x256xf32>
    %586 = arith.mulf %585, %584 : vector<1x256xf32>
    %587 = arith.addf %583, %586 : vector<1x256xf32>
    %588 = arith.addf %580, %587 : vector<1x256xf32>
    %589 = vector.extract_strided_slice %548 {offsets = [0, 4], sizes = [1, 256], strides = [1, 1]} : vector<1x262xf32> to vector<1x256xf32>
    %590 = vector.broadcast %56 : f32 to vector<1x256xf32>
    %591 = arith.mulf %590, %589 : vector<1x256xf32>
    %592 = vector.extract_strided_slice %550 {offsets = [0, 4], sizes = [1, 256], strides = [1, 1]} : vector<1x262xf32> to vector<1x256xf32>
    %593 = vector.broadcast %105 : f32 to vector<1x256xf32>
    %594 = arith.mulf %593, %592 : vector<1x256xf32>
    %595 = arith.addf %591, %594 : vector<1x256xf32>
    %cst_109 = arith.constant 0.000000e+00 : f32
    %596 = vector.broadcast %cst_109 : f32 to vector<1x256xf32>
    %597 = arith.select %167, %595, %596 : vector<1x256xi1>, vector<1x256xf32>
    %598 = arith.addf %588, %597 : vector<1x256xf32>
    %599 = vector.extract_strided_slice %548 {offsets = [0, 5], sizes = [1, 256], strides = [1, 1]} : vector<1x262xf32> to vector<1x256xf32>
    %600 = vector.broadcast %57 : f32 to vector<1x256xf32>
    %601 = arith.mulf %600, %599 : vector<1x256xf32>
    %602 = vector.extract_strided_slice %550 {offsets = [0, 5], sizes = [1, 256], strides = [1, 1]} : vector<1x262xf32> to vector<1x256xf32>
    %603 = vector.broadcast %106 : f32 to vector<1x256xf32>
    %604 = arith.mulf %603, %602 : vector<1x256xf32>
    %605 = arith.addf %601, %604 : vector<1x256xf32>
    %cst_110 = arith.constant 0.000000e+00 : f32
    %606 = vector.broadcast %cst_110 : f32 to vector<1x256xf32>
    %607 = arith.select %176, %605, %606 : vector<1x256xi1>, vector<1x256xf32>
    %608 = arith.addf %598, %607 : vector<1x256xf32>
    %609 = vector.extract_strided_slice %548 {offsets = [0, 6], sizes = [1, 256], strides = [1, 1]} : vector<1x262xf32> to vector<1x256xf32>
    %610 = vector.broadcast %58 : f32 to vector<1x256xf32>
    %611 = arith.mulf %610, %609 : vector<1x256xf32>
    %612 = vector.extract_strided_slice %550 {offsets = [0, 6], sizes = [1, 256], strides = [1, 1]} : vector<1x262xf32> to vector<1x256xf32>
    %613 = vector.broadcast %107 : f32 to vector<1x256xf32>
    %614 = arith.mulf %613, %612 : vector<1x256xf32>
    %615 = arith.addf %611, %614 : vector<1x256xf32>
    %cst_111 = arith.constant 0.000000e+00 : f32
    %616 = vector.broadcast %cst_111 : f32 to vector<1x256xf32>
    %617 = arith.select %185, %615, %616 : vector<1x256xi1>, vector<1x256xf32>
    %618 = arith.addf %608, %617 : vector<1x256xf32>
    %c0_112 = arith.constant 0 : index
    %c0_113 = arith.constant 0 : index
    %c96_114 = arith.constant 96 : index
    %619 = vector.load %arg4[%c0_112, %c0_113, %c96_114] : memref<1x2x358xf32, #tpu.memory_space<vmem>>, vector<1x1x262xf32>
    %620 = vector.shape_cast %619 : vector<1x1x262xf32> to vector<1x262xf32>
    %c0_115 = arith.constant 0 : index
    %c1_116 = arith.constant 1 : index
    %c96_117 = arith.constant 96 : index
    %621 = vector.load %arg4[%c0_115, %c1_116, %c96_117] : memref<1x2x358xf32, #tpu.memory_space<vmem>>, vector<1x1x262xf32>
    %622 = vector.shape_cast %621 : vector<1x1x262xf32> to vector<1x262xf32>
    %623 = vector.extract_strided_slice %620 {offsets = [0, 0], sizes = [1, 256], strides = [1, 1]} : vector<1x262xf32> to vector<1x256xf32>
    %624 = vector.broadcast %59 : f32 to vector<1x256xf32>
    %625 = arith.mulf %624, %623 : vector<1x256xf32>
    %626 = vector.extract_strided_slice %622 {offsets = [0, 0], sizes = [1, 256], strides = [1, 1]} : vector<1x262xf32> to vector<1x256xf32>
    %627 = vector.broadcast %108 : f32 to vector<1x256xf32>
    %628 = arith.mulf %627, %626 : vector<1x256xf32>
    %629 = arith.addf %625, %628 : vector<1x256xf32>
    %cst_118 = arith.constant 0.000000e+00 : f32
    %630 = vector.broadcast %cst_118 : f32 to vector<1x256xf32>
    %631 = arith.select %140, %629, %630 : vector<1x256xi1>, vector<1x256xf32>
    %632 = arith.addf %618, %631 : vector<1x256xf32>
    %633 = vector.extract_strided_slice %620 {offsets = [0, 1], sizes = [1, 256], strides = [1, 1]} : vector<1x262xf32> to vector<1x256xf32>
    %634 = vector.broadcast %60 : f32 to vector<1x256xf32>
    %635 = arith.mulf %634, %633 : vector<1x256xf32>
    %636 = vector.extract_strided_slice %622 {offsets = [0, 1], sizes = [1, 256], strides = [1, 1]} : vector<1x262xf32> to vector<1x256xf32>
    %637 = vector.broadcast %109 : f32 to vector<1x256xf32>
    %638 = arith.mulf %637, %636 : vector<1x256xf32>
    %639 = arith.addf %635, %638 : vector<1x256xf32>
    %cst_119 = arith.constant 0.000000e+00 : f32
    %640 = vector.broadcast %cst_119 : f32 to vector<1x256xf32>
    %641 = arith.select %149, %639, %640 : vector<1x256xi1>, vector<1x256xf32>
    %642 = arith.addf %632, %641 : vector<1x256xf32>
    %643 = vector.extract_strided_slice %620 {offsets = [0, 2], sizes = [1, 256], strides = [1, 1]} : vector<1x262xf32> to vector<1x256xf32>
    %644 = vector.broadcast %61 : f32 to vector<1x256xf32>
    %645 = arith.mulf %644, %643 : vector<1x256xf32>
    %646 = vector.extract_strided_slice %622 {offsets = [0, 2], sizes = [1, 256], strides = [1, 1]} : vector<1x262xf32> to vector<1x256xf32>
    %647 = vector.broadcast %110 : f32 to vector<1x256xf32>
    %648 = arith.mulf %647, %646 : vector<1x256xf32>
    %649 = arith.addf %645, %648 : vector<1x256xf32>
    %cst_120 = arith.constant 0.000000e+00 : f32
    %650 = vector.broadcast %cst_120 : f32 to vector<1x256xf32>
    %651 = arith.select %158, %649, %650 : vector<1x256xi1>, vector<1x256xf32>
    %652 = arith.addf %642, %651 : vector<1x256xf32>
    %653 = vector.extract_strided_slice %620 {offsets = [0, 3], sizes = [1, 256], strides = [1, 1]} : vector<1x262xf32> to vector<1x256xf32>
    %654 = vector.broadcast %62 : f32 to vector<1x256xf32>
    %655 = arith.mulf %654, %653 : vector<1x256xf32>
    %656 = vector.extract_strided_slice %622 {offsets = [0, 3], sizes = [1, 256], strides = [1, 1]} : vector<1x262xf32> to vector<1x256xf32>
    %657 = vector.broadcast %111 : f32 to vector<1x256xf32>
    %658 = arith.mulf %657, %656 : vector<1x256xf32>
    %659 = arith.addf %655, %658 : vector<1x256xf32>
    %660 = arith.addf %652, %659 : vector<1x256xf32>
    %661 = vector.extract_strided_slice %620 {offsets = [0, 4], sizes = [1, 256], strides = [1, 1]} : vector<1x262xf32> to vector<1x256xf32>
    %662 = vector.broadcast %63 : f32 to vector<1x256xf32>
    %663 = arith.mulf %662, %661 : vector<1x256xf32>
    %664 = vector.extract_strided_slice %622 {offsets = [0, 4], sizes = [1, 256], strides = [1, 1]} : vector<1x262xf32> to vector<1x256xf32>
    %665 = vector.broadcast %112 : f32 to vector<1x256xf32>
    %666 = arith.mulf %665, %664 : vector<1x256xf32>
    %667 = arith.addf %663, %666 : vector<1x256xf32>
    %cst_121 = arith.constant 0.000000e+00 : f32
    %668 = vector.broadcast %cst_121 : f32 to vector<1x256xf32>
    %669 = arith.select %167, %667, %668 : vector<1x256xi1>, vector<1x256xf32>
    %670 = arith.addf %660, %669 : vector<1x256xf32>
    %671 = vector.extract_strided_slice %620 {offsets = [0, 5], sizes = [1, 256], strides = [1, 1]} : vector<1x262xf32> to vector<1x256xf32>
    %672 = vector.broadcast %64 : f32 to vector<1x256xf32>
    %673 = arith.mulf %672, %671 : vector<1x256xf32>
    %674 = vector.extract_strided_slice %622 {offsets = [0, 5], sizes = [1, 256], strides = [1, 1]} : vector<1x262xf32> to vector<1x256xf32>
    %675 = vector.broadcast %113 : f32 to vector<1x256xf32>
    %676 = arith.mulf %675, %674 : vector<1x256xf32>
    %677 = arith.addf %673, %676 : vector<1x256xf32>
    %cst_122 = arith.constant 0.000000e+00 : f32
    %678 = vector.broadcast %cst_122 : f32 to vector<1x256xf32>
    %679 = arith.select %176, %677, %678 : vector<1x256xi1>, vector<1x256xf32>
    %680 = arith.addf %670, %679 : vector<1x256xf32>
    %681 = vector.extract_strided_slice %620 {offsets = [0, 6], sizes = [1, 256], strides = [1, 1]} : vector<1x262xf32> to vector<1x256xf32>
    %682 = vector.broadcast %65 : f32 to vector<1x256xf32>
    %683 = arith.mulf %682, %681 : vector<1x256xf32>
    %684 = vector.extract_strided_slice %622 {offsets = [0, 6], sizes = [1, 256], strides = [1, 1]} : vector<1x262xf32> to vector<1x256xf32>
    %685 = vector.broadcast %114 : f32 to vector<1x256xf32>
    %686 = arith.mulf %685, %684 : vector<1x256xf32>
    %687 = arith.addf %683, %686 : vector<1x256xf32>
    %cst_123 = arith.constant 0.000000e+00 : f32
    %688 = vector.broadcast %cst_123 : f32 to vector<1x256xf32>
    %689 = arith.select %185, %687, %688 : vector<1x256xi1>, vector<1x256xf32>
    %690 = arith.addf %680, %689 : vector<1x256xf32>
    %691 = arith.negf %690 : vector<1x256xf32>
    %692 = math.exp %691 : vector<1x256xf32>
    %cst_124 = arith.constant 1.000000e+00 : f32
    %693 = vector.broadcast %cst_124 : f32 to vector<1x256xf32>
    %694 = arith.addf %693, %692 : vector<1x256xf32>
    %695 = arith.divf %693, %694 : vector<1x256xf32>
    %c0_125 = arith.constant 0 : index
    %c0_126 = arith.constant 0 : index
    %c0_127 = arith.constant 0 : index
    %696 = vector.load %arg3[%c0_125, %c0_126, %c0_127] : memref<1x1x256xf32, #tpu.memory_space<vmem>>, vector<1x1x256xf32>
    %697 = vector.shape_cast %696 : vector<1x1x256xf32> to vector<1x256xf32>
    %698 = vector.shape_cast %695 : vector<1x256xf32> to vector<1x1x256xf32>
    tpu.vector_store %arg3[%c0_125, %c0_126, %c0_127], %698 {strides = array<i32>} : memref<1x1x256xf32, #tpu.memory_space<vmem>>, vector<1x1x256xf32>,
    return
  }
  func.func @transform_0(%arg0: i32) -> i32 {
    %c0_i32 = arith.constant 0 : i32
    %c0_i32_0 = arith.constant 0 : i32
    return %c0_i32 : i32
  }
  func.func @transform_1(%arg0: i32) -> (i32, i32, i32) {
    %c0_i32 = arith.constant 0 : i32
    %c0_i32_0 = arith.constant 0 : i32
    %c0_i32_1 = arith.constant 0 : i32
    return %arg0, %c0_i32, %c0_i32_0 : i32, i32, i32
  }
  func.func @transform_2(%arg0: i32) -> (i32, i32, i32) {
    %c0_i32 = arith.constant 0 : i32
    %c0_i32_0 = arith.constant 0 : i32
    %c0_i32_1 = arith.constant 0 : i32
    return %arg0, %c0_i32, %c0_i32_0 : i32, i32, i32
  }
}

</mosaic_0001>

<bundles_post_ra>
// kernel: tpu_custom_call.1
= control target key start
LH: loop header
LB: loop body
LE: loop exit
PB: predicated region body
PF: predicated region fallthrough
CT: control target
= control target key end

     0   :  { %7 = vsyncpa [#allocation6], 0  ;;  %s3817_s0 = inlined_call_operand.hbm [shape: f32[98], index: 0, kind: input, shape index: {}]   ;;  %s3818_s1 = inlined_call_operand.hbm [shape: f32[2,4,256], index: 1, kind: input, shape index: {}]   ;;  %s3819_s2 = inlined_call_operand.hbm [shape: f32[2,1,256], index: 2, kind: output, shape index: {}]  }
   0x1   :  { %8 = vsyncpa [#allocation4], 0 }
   0x2   :  { %10 = vsyncpa [#allocation4 + $0x1], 0 }
   0x3   :  { %11 = vsyncpa [#allocation5], 0 }
   0x4   :  { %13 = vsyncpa [#allocation5 + $0x1], 0  ;;  %s2583_s9 = smov 0   ;;  %s2585_s10 = smov 0  }
   0x5   :  { %s2587_s11 = smov 0   ;;  %s2589_s12 = smov 0  }
   0x6 LB: > { %s2604_s13 = sadd.s32 4294967295, %s2512_s12   ;;  %s2163_s14 = sadd.s32 4294967294, %s2512_s12   ;;  %s2512_s12 = sphi %s2589_s12, %s3883_s12   ;;  %s2508_s11 = sphi %s2587_s11, %s3882_s11   ;;  %s2504_s10 = sphi %s2585_s10, %s3881_s10   ;;  %s2500_s9 = sphi %s2583_s9, %s3880_s9  }
   0x7   : > { %p60_p0 = scmp.ne.s32.totalorder %s2504_s10, %s2500_s9  ;;  %p3820_p1 = scmp.eq.s32.totalorder %s2604_s13, 0 }
   0x8   : > { %p90_p3 = scmp.eq.s32.totalorder %s2163_s14, 1  ;;  %p2164_p5 = scmp.ge.s32.totalorder %s2512_s12, 1 }
   0x9   : > { %p2613_p4 = por %p3820_p1, %p60_p0  ;;  %p97_p7 = scmp.lt.s32.totalorder %s2512_s12, 3 }
   0xa   : > { %p2618_p6 = por %p90_p3, %p60_p0  ;;  %s2629_s18 = sadd.s32 1, %s2512_s12  }
   0xb   : > { %s3830_s15 = scalar_select %p2613_p4, 1, 0 }
   0xc   : > { %s3831_s16 = scalar_select %p2618_p6, 1, 0 }
   0xd   : > { %p2623_p8 = pnand %p2164_p5, %p97_p7  ;;  %s44_s19 = ssub.s32 %s2512_s12, %s2629_s18 }
   0xe   : > { %s47_s20 = sadd.s32 1, %s2508_s11  ;;  %p2642_p12 = scmp.eq.s32.totalorder %s44_s19, 0 }
   0xf   : > { %p2288_p10 = pneg %p2623_p8  ;;  %p54_p13 = scmp.ne.s32.totalorder %s2508_s11, %s2504_s10 }
  0x10   : > { %p55_p0 = scmp.eq.s32.totalorder %s2512_s12, 0  ;;  %p2301_p3 = scmp.lt.s32.totalorder %s2512_s12, 2 }
  0x11   : > { %p2638_p11 = pnand %p2288_p10, %p3820_p1  ;;  %s2399_s25 = scalar_lea.hbm %s3817_s0, 16 }
  0x12   : > { %p2400_p5 = scmp.ne.s32.totalorder %s3817_s0, %s2399_s25  ;;  %p2406_p1 = scmp.lt.u32.totalorder %s2399_s25, %s3817_s0 }
  0x13   : > { %p2401_p7 = pneg %p2638_p11 }
  0x15   : > { %p2402_p10 = pnand %p2401_p7, %p2400_p5 }
  0x17   : > { %p2403_p9 = pneg %p2402_p10 }
  0x19   : > { %p2408_p2 = pnand %p2406_p1, %p2403_p9 }
  0x1b   : > { %2411 = shalt.err (!%p2408_p2)
}
  0x1c   : > { %s2514_s30 = smov [#allocation3]   ;;  %p56_p1 = por %p55_p0, %p54_p13 }
  0x1d   : > { %2291 = dma.hbm_to_smem (!%p2638_p11), %s3817_s0, 16, %s2514_s30, [#allocation6]  }
  0x1e   : > { %s2669_s5 = scalar_select %p2642_p12, %s2508_s11, %s47_s20  }
  0x1f   : > { %p3835_p2 = scmp.eq.s32.totalorder %s2604_s13, 1  ;;  %s119_s7 = sand.u32 1, %s2508_s11  }
  0x20   : > { %s2278_s8 = sshll.u32 %s2512_s12, 7  ;;  %s2167_s14 = sshll.u32 %s119_s7, 3 }
  0x21   : > { %p2681_p9 = por %p3835_p2, %p54_p13  ;;  %s2690_s23 = scalar_lea.hbm %s3818_s1, %s2278_s8 }
  0x22   : > { %s123_s20 = scalar_lea.vmem [#allocation7], %s2167_s14  ;;  %p2694_p11 = pnand %p2301_p3, %p56_p1 }
  0x23   : > { %s3836_s6 = scalar_select %p2681_p9, 1, 0 }
  0x24   : > { %s131_s22 = sshll.u32 %s123_s20, 4  ;;  %s120_s25 = scalar_lea.sflag [#allocation4], %s119_s7  ;;  %s2698_s22 = int_to_ptr.vmem [resolvable:$true] %s131_s22 }
  0x25   : > { %s2412_s26 = scalar_lea.hbm %s2690_s23, 128  ;;  %p2414_p13 = pneg %p2694_p11 }
  0x26   : > { %p2413_p12 = scmp.ne.s32.totalorder %s2690_s23, %s2412_s26  ;;  %s2417_s29 = scalar_lea.hbm %s3818_s1, 256 }
  0x27   : > { %p2418_p3 = scmp.lt.u32.totalorder %s2690_s23, %s3818_s1  ;;  %p2419_p7 = scmp.lt.u32.totalorder %s2417_s29, %s2412_s26 }
  0x28   : > { %p2415_p0 = pnand %p2414_p13, %p2413_p12  ;;  %p2421_p1 = scmp.lt.u32.totalorder %s2412_s26, %s2690_s23 }
  0x29   : > { %p2420_p10 = por %p2419_p7, %p2418_p3 }
  0x2a   : > { %p2416_p5 = pneg %p2415_p0 }
  0x2b   : > { %p2422_p2 = por %p2421_p1, %p2420_p10 }
  0x2d   : > { %p2423_p6 = pnand %p2422_p2, %p2416_p5 }
  0x2f   : > { %2426 = shalt.err (!%p2423_p6)
}
  0x30   : > { %s2427_s4 = scalar_lea.vmem %s2698_s22, 128  ;;  %s2515_s7 = smov [#allocation7]  }
  0x31   : > { %p2428_p12 = scmp.ne.s32.totalorder %s2698_s22, %s2427_s4  ;;  %s2432_s8 = sshll.u32 %s2515_s7, 4  ;;  %s2433_s8 = int_to_ptr.vmem [resolvable:$false] %s2432_s8 }
  0x32   : > { %s2434_s14 = scalar_lea.vmem %s2433_s8, 256  ;;  %p2435_p4 = scmp.lt.s32.totalorder %s2698_s22, %s2433_s8 }
  0x33   : > { %p2430_p0 = pnand %p2428_p12, %p2414_p13  ;;  %p2436_p3 = scmp.lt.s32.totalorder %s2434_s14, %s2427_s4 }
  0x35   : > { %p2431_p9 = pneg %p2430_p0  ;;  %p2437_p7 = por %p2436_p3, %p2435_p4 }
  0x37   : > { %p2438_p10 = pnand %p2437_p7, %p2431_p9 }
  0x39   : > { %2441 = shalt.err (!%p2438_p10)
}
  0x3a   : > { %2295 = dma.hbm_to_vmem [thread:$0]  (!%p2694_p11), %s2690_s23, 128, %s2698_s22, %s120_s25  }
  0x3b   : > { %140 = sbr.rel (%p2623_p8) target bundleno = 686 (0x2ae), region = 28 }
  0x42   : > { %p3838_p6 = scmp.eq.s32.totalorder %s2604_s13, 0 }
  0x44   : > { %2487 = dma.done.wait (%p3838_p6), [#allocation6], 16   ;;  %p3839_p13 = pmov %p3838_p6 }
  0x45   : > { %s2732_s19 = sand.u32 1, %s2504_s10   ;;  %p3840_p4 = scmp.ne.s32.totalorder %s3830_s15, 0 }
  0x46   : > { %2489 = vsyncadd (%p3839_p13), [#allocation6], 4294967280  ;;  %s2172_s21 = sshll.u32 %s2732_s19, 3  ;;  %s147_s20 = scalar_lea.sflag [#allocation4], %s2732_s19 }
  0x47   : > { %s150_s24 = scalar_lea.vmem [#allocation7], %s2172_s21 }
  0x48   : > { %2491 = dma.done.wait (%p3840_p4), %s147_s20, 128  }
  0x49   : > { %2493 = vsyncadd (%p3840_p4), %s147_s20, 4294967168 }
  0x4a   : > { %155 = sfence }
  0x4b   : > { %v172_v0 = vld [vmem:[%s150_s24] sm:$0xff]  ;;  %vm176_vm0 = vcmask 1043456   ;;  %vm209_vm1 = vcmask 1041408   ;;  %vm210_vm2 = vcmask 1043458   ;;  %vm212_vm4 = vcmask 832516   ;;  %s2518_s15 = smov 51  }
  0x4c   : > { %v174_v1 = vcombine.high %v172_v0, %v172_v0  ;;  %v193_v2 = vsel %vm176_vm0, %v172_v0, -inf  ;;  %v177_v3 = vsel %vm176_vm0, %v172_v0, 0.0  ;;  %vm211_vm3 = vmor %vm210_vm2, %vm209_vm1  ;;  %v3823_v10 = vlaneseq  ;;  %s2223_s17 = sld [smem:[#allocation3 + $0x32]]  ;;  %s2174_s23 = sld [smem:[#allocation3 + $0x1]] }
  0x4d   : > { %v194_v4 = vrot.slane %v193_v2, 4  ;;  %v178_v5 = vrot.slane %v177_v3, 4  ;;  %vm213_vm5 = vmor %vm212_vm4, %vm211_vm3  ;;  %v2516_v15 = vmov 1966171168   ;;  %v2517_v19 = vmov 0.0   ;;  %s2175_s22 = sld [smem:[#allocation3 + $0x2]] }
  0x4e   : > { %v200_v6 = vsel %vm176_vm0, %v174_v1, -inf  ;;  %v184_v7 = vsel %vm176_vm0, %v174_v1, 0.0  ;;  %v219_v16 = vunpack.c.l.s4 %v2516_v15  ;;  %214 = vst.msk [vmem:[#allocation2] sm:$0x3f] %vm213_vm5, %v2517_v19  ;;  %v222_v27 = vshrl.u32 %v3823_v10, 7  ;;  %s2224_s25 = sld [smem:[#allocation3 + $0x33]] }
  0x4f   : > { %v195_v8 = vmax.f32 %v193_v2, %v194_v4  ;;  %v201_v9 = vrot.slane %v200_v6, 4  ;;  %v179_v11 = vadd.f32 %v178_v5, %v177_v3  ;;  %v185_v12 = vrot.slane %v184_v7, 4  ;;  %s2176_s26 = sld [smem:[#allocation3 + $0x3]]  ;;  %s2225_s27 = sld [smem:[#allocation3 + $0x34]] }
  0x50   : > { %v220_v26 = vunpack.c.0.s8 %v219_v16  ;;  %vm2748_vm6 = vcmp.ge.s32.totalorder %v3823_v10, 51  ;;  %vm240_vm7 = vcmp.lt.s32.totalorder %v3823_v10, 307  ;;  %vm235_vm8 = vcmask 416768   ;;  %s2177_s28 = sld [smem:[#allocation3 + $0x4]]  ;;  %s2226_s29 = sld [smem:[#allocation3 + $0x35]] }
  0x51   : > { %v196_v13 = vrot.slane %v195_v8, 2  ;;  %v202_v14 = vmax.f32 %v200_v6, %v201_v9  ;;  %v180_v17 = vrot.slane %v179_v11, 2  ;;  %v186_v18 = vadd.f32 %v185_v12, %v184_v7  ;;  %vm241_vm9 = vmand %vm2748_vm6, %vm240_vm7  ;;  %s2178_s30 = sld [smem:[#allocation3 + $0x5]]  ;;  %s2519_s3 = smov 127  }
  0x52   : > { %v2741_v35 = vsub.s32 %v220_v26, %v222_v27  ;;  %v462_v53 = vstv %s2174_s23  ;;  %v464_v54 = vstv %s2223_s17  ;;  %v2757_v56 = vsub.s32 0, %v222_v27  ;;  %s2227_s4 = sld [smem:[#allocation3 + $0x36]]  ;;  %s2520_s7 = smov 126  }
  0x53   : > { %v197_v20 = vmax.f32 %v195_v8, %v196_v13  ;;  %v203_v21 = vrot.slane %v202_v14, 2  ;;  %v181_v22 = vadd.f32 %v180_v17, %v179_v11  ;;  %v187_v23 = vrot.slane %v186_v18, 2  ;;  %s2179_s8 = sld [smem:[#allocation3 + $0x6]]  ;;  %s2521_s14 = smov 125  }
  0x54   : > { %3841 = vst [vmem:[#allocation12_spill] sm:$0xff] %v2741_v35  ;;  %v495_v55 = vstv %s2175_s22  ;;  %v497_v58 = vstv %s2224_s25  ;;  %v2761_v59 = vsub.s32 2, %v222_v27  ;;  %v2767_v2 = vsub.s32 1, %v222_v27  ;;  %s2228_s21 = sld [smem:[#allocation3 + $0x37]]  ;;  %s2229_s24 = sld [smem:[#allocation3 + $0x38]] }
  0x55   : > { %v198_v24 = vrot.slane %v197_v20, 1  ;;  %v204_v25 = vmax.f32 %v202_v14, %v203_v21  ;;  %v182_v28 = vrot.slane %v181_v22, 1  ;;  %v188_v29 = vadd.f32 %v187_v23, %v186_v18  ;;  %s2180_s20 = sld [smem:[#allocation3 + $0x7]]  ;;  %s2181_s17 = sld [smem:[#allocation3 + $0x8]] }
  0x56   : > { %v528_v63 = vstv %s2176_s26  ;;  %v530_v3 = vstv %s2225_s27  ;;  %v559_v13 = vstv %s2177_s28  ;;  %v561_v14 = vstv %s2226_s29  ;;  %s2523_s23 = smov 123   ;;  %s2230_s22 = sld [smem:[#allocation3 + $0x39]] }
  0x57   : > { %v199_v30 = vmax.f32 %v197_v20, %v198_v24  ;;  %v205_v31 = vrot.slane %v204_v25, 1  ;;  %v183_v32 = vadd.f32 %v182_v28, %v181_v22  ;;  %v189_v33 = vrot.slane %v188_v29, 1  ;;  %s2182_s25 = sld [smem:[#allocation3 + $0x9]]  ;;  %s2231_s26 = sld [smem:[#allocation3 + $0x3a]] }
  0x58   : > { %v592_v18 = vstv %s2178_s30  ;;  %v594_v20 = vstv %s2227_s4  ;;  %s2524_s27 = smov 122   ;;  %s2183_s28 = sld [smem:[#allocation3 + $0xa]]  ;;  %vm486_vm14 = vcmask 1039360   ;;  %vm519_vm0 = vcmask 1031168  }
  0x59   : > { %v206_v34 = vmax.f32 %v204_v25, %v205_v31  ;;  %v190_v36 = vadd.f32 %v189_v33, %v188_v29  ;;  %v207_v37 = vmul.f32 0.25, %v183_v32  ;;  %v625_v29 = vstv %s2179_s8  ;;  %s2525_s29 = smov 112   ;;  %s2232_s30 = sld [smem:[#allocation3 + $0x3b]] }
  0x5a   : > { %s2233_s4 = sld [smem:[#allocation3 + $0x3c]]  ;;  %vm552_vm2 = vcmask 1022976   ;;  %vm583_vm3 = vcmask 1014784   ;;  %vm616_vm6 = vcmask 1006592   ;;  %vm649_vm7 = vcmask 998400   ;;  %p3877_p9 = scmp.ne.s32.totalorder %s3836_s6, 0 }
  0x5b   : > { %v245_v38 = vcombine.low %v199_v30, %v206_v34  ;;  %v208_v39 = vmul.f32 0.25, %v190_v36  ;;  %v627_v30 = vstv %s2228_s21  ;;  %v658_v34 = vstv %s2180_s20  ;;  %s2185_s8 = sld [smem:[#allocation3 + $0xc]]  ;;  %s2234_s21 = sld [smem:[#allocation3 + $0x3d]] }
  0x5c   : > { %s2186_s20 = sld [smem:[#allocation3 + $0xd]] }
  0x5d   : > { %v252_v40 = vrot.slane %v245_v38, %v2741_v35  ;;  %v217_v41 = vcombine.low %v207_v37, %v208_v39  ;;  %v660_v37 = vstv %s2229_s24  ;;  %s2235_s24 = sld [smem:[#allocation3 + $0x3e]] }
  0x5f   : > { %v259_v42 = vrot.slane %v252_v40, %v2741_v35  ;;  %v224_v43 = vrot.slane %v217_v41, %v2741_v35 }
  0x61   : > { %260 = vrot.lane.b32.xlu0 %v259_v42, %s2518_s15  ;;  %v231_v44 = vrot.slane %v224_v43, %v2741_v35 }
  0x65   : > { %232 = vrot.lane.b32.xlu0 %v231_v44, %s2518_s15  ;;  %s2522_s15 = smov 124  }
  0xd3   : > { %v261_v46 = vpop.permute.xlu0 %260 }
  0xd4   : > { %v262_v47 = vrot.slane %v261_v46, 7 }
  0xd6   : > { %v263_v48 = vsel %vm235_vm8, %v262_v47, %v261_v46  ;;  %v691_v46 = vstv %s2181_s17  ;;  %v693_v47 = vstv %s2230_s22  ;;  %s2187_s17 = sld [smem:[#allocation3 + $0xe]]  ;;  %s2236_s22 = sld [smem:[#allocation3 + $0x3f]] }
  0xd7   : > { %266 = vst.msk [vmem:[#allocation2 + $0x1] ss:$2 sm:$0x7] %vm241_vm9, %v263_v48  ;;  %v233_v49 = vpop.permute.xlu0 %232 }
  0xd8   : > { %v234_v50 = vrot.slane %v233_v49, 7 }
  0xda   : > { %v236_v51 = vsel %vm235_vm8, %v234_v50, %v233_v49 }
  0xdb   : > { %242 = vst.msk [vmem:[#allocation2] ss:$2 sm:$0x7] %vm241_vm9, %v236_v51  ;;  %v724_v51 = vstv %s2182_s25  ;;  %s2188_s25 = sld [smem:[#allocation3 + $0xf]] }
  0xde   : > { %v2755_v52 = vld [vmem:[#allocation2 + $0x1] ss:$2 sm:$0x7] }
  0xdf   : > { %v465_v61 = vmul.f32 %v464_v54, %v2755_v52  ;;  %v498_v1 = vmul.f32 %v497_v58, %v2755_v52  ;;  %v531_v8 = vmul.f32 %v530_v3, %v2755_v52  ;;  %v562_v19 = vmul.f32 %v561_v14, %v2755_v52 }
  0xe0   : > { %v595_v25 = vmul.f32 %v594_v20, %v2755_v52  ;;  %v628_v36 = vmul.f32 %v627_v30, %v2755_v52  ;;  %v661_v42 = vmul.f32 %v660_v37, %v2755_v52  ;;  %v726_v54 = vstv %s2231_s26  ;;  %s2237_s26 = sld [smem:[#allocation3 + $0x40]] }
  0xe1   : > { %v757_v3 = vstv %s2183_s28  ;;  %v821_v20 = vstv %s2185_s8  ;;  %v887_v37 = vstv %s2187_s17  ;;  %s2189_s28 = sld [smem:[#allocation3 + $0x10]]  ;;  %s2191_s8 = sld [smem:[#allocation3 + $0x12]] }
  0xe2   : > { %v2759_v57 = vld [vmem:[#allocation2] ss:$2 sm:$0x7]  ;;  %s2193_s17 = sld [smem:[#allocation3 + $0x14]] }
  0xe3   : > { %v463_v60 = vmul.f32 %v462_v53, %v2759_v57  ;;  %v496_v62 = vmul.f32 %v495_v55, %v2759_v57  ;;  %v529_v7 = vmul.f32 %v528_v63, %v2759_v57  ;;  %v560_v17 = vmul.f32 %v559_v13, %v2759_v57 }
  0xe4   : > { %v593_v24 = vmul.f32 %v592_v18, %v2759_v57  ;;  %v626_v33 = vmul.f32 %v625_v29, %v2759_v57  ;;  %v659_v41 = vmul.f32 %v658_v34, %v2759_v57  ;;  %v692_v50 = vmul.f32 %v691_v46, %v2759_v57 }
  0xe5   : > { %v466_v0 = vadd.f32 %v465_v61, %v463_v60  ;;  %v499_v6 = vadd.f32 %v498_v1, %v496_v62  ;;  %v532_v12 = vadd.f32 %v531_v8, %v529_v7  ;;  %v563_v23 = vadd.f32 %v562_v19, %v560_v17 }
  0xe6   : > { %v596_v28 = vadd.f32 %v595_v25, %v593_v24  ;;  %v629_v40 = vadd.f32 %v628_v36, %v626_v33  ;;  %v662_v45 = vadd.f32 %v661_v42, %v659_v41  ;;  %v694_v53 = vmul.f32 %v693_v47, %v2755_v52 }
  0xe7   : > { %v479_v4 = vrot.slane %v466_v0, %v2761_v59  ;;  %v471_v5 = vrot.slane %v466_v0, %v2757_v56  ;;  %v508_v9 = vrot.slane %v499_v6, %v2767_v2  ;;  %v475_v11 = vrot.slane %v466_v0, %v2767_v2 }
  0xe8   : > { %v537_v15 = vrot.slane %v532_v12, %v2757_v56  ;;  %v504_v16 = vrot.slane %v499_v6, %v2757_v56  ;;  %v545_v21 = vrot.slane %v532_v12, %v2761_v59  ;;  %v512_v22 = vrot.slane %v499_v6, %v2761_v59 }
  0xe9   : > { %484 = vrot.lane.b32.xlu0 %v479_v4, %s2519_s3  ;;  %480 = vrot.lane.b32.xlu1 %v471_v5, %s2519_s3  ;;  %v572_v26 = vrot.slane %v563_v23, %v2767_v2  ;;  %v541_v27 = vrot.slane %v532_v12, %v2767_v2  ;;  %v601_v31 = vrot.slane %v596_v28, %v2757_v56  ;;  %v759_v4 = vstv %s2232_s30  ;;  %s2238_s30 = sld [smem:[#allocation3 + $0x41]] }
  0xea   : > { %v568_v32 = vrot.slane %v563_v23, %v2757_v56  ;;  %v609_v38 = vrot.slane %v596_v28, %v2761_v59  ;;  %v576_v39 = vrot.slane %v563_v23, %v2761_v59  ;;  %v638_v43 = vrot.slane %v629_v40, %v2767_v2 }
  0xeb   : > { %v605_v44 = vrot.slane %v596_v28, %v2767_v2  ;;  %v667_v48 = vrot.slane %v662_v45, %v2757_v56  ;;  %v634_v49 = vrot.slane %v629_v40, %v2757_v56  ;;  %v675_v55 = vrot.slane %v662_v45, %v2761_v59 }
  0xec   : > { %v642_v58 = vrot.slane %v629_v40, %v2761_v59  ;;  %v695_v60 = vadd.f32 %v694_v53, %v692_v50  ;;  %v725_v61 = vmul.f32 %v724_v51, %v2759_v57  ;;  %v727_v62 = vmul.f32 %v726_v54, %v2755_v52 }
  0xed   : > { %515 = vrot.lane.b32.xlu0 %v508_v9, %s2520_s7  ;;  %482 = vrot.lane.b32.xlu1 %v475_v11, %s2519_s3  ;;  %s2184_s3 = sld [smem:[#allocation3 + $0xb]]  ;;  %v671_v0 = vrot.slane %v662_v45, %v2767_v2  ;;  %v758_v7 = vmul.f32 %v757_v3, %v2759_v57  ;;  %v760_v9 = vmul.f32 %v759_v4, %v2755_v52  ;;  %v790_v11 = vstv %s2233_s4  ;;  %s2239_s4 = sld [smem:[#allocation3 + $0x42]] }
  0xee   : > { %v704_v63 = vrot.slane %v695_v60, %v2767_v2  ;;  %v728_v1 = vadd.f32 %v727_v62, %v725_v61  ;;  %v700_v6 = vrot.slane %v695_v60, %v2757_v56  ;;  %v708_v13 = vrot.slane %v695_v60, %v2761_v59 }
  0xef   : > { %v761_v14 = vadd.f32 %v760_v9, %v758_v7  ;;  %v822_v24 = vmul.f32 %v821_v20, %v2759_v57  ;;  %v854_v25 = vstv %s2186_s20  ;;  %v888_v41 = vmul.f32 %v887_v37, %v2759_v57  ;;  %s2192_s20 = sld [smem:[#allocation3 + $0x13]] }
  0xf0   : > { %v733_v5 = vrot.slane %v728_v1, %v2757_v56  ;;  %v741_v12 = vrot.slane %v728_v1, %v2761_v59  ;;  %v737_v18 = vrot.slane %v728_v1, %v2767_v2  ;;  %v920_v42 = vstv %s2188_s25  ;;  %s2194_s25 = sld [smem:[#allocation3 + $0x15]] }
  0xf1   : > { %546 = vrot.lane.b32.xlu0 %v537_v15, %s2521_s14  ;;  %513 = vrot.lane.b32.xlu1 %v504_v16, %s2520_s7  ;;  %v791_v16 = vmul.f32 %v790_v11, %v2755_v52  ;;  %v770_v17 = vrot.slane %v761_v14, %v2767_v2  ;;  %v766_v23 = vrot.slane %v761_v14, %v2757_v56  ;;  %v953_v54 = vstv %s2189_s28  ;;  %s2195_s28 = sld [smem:[#allocation3 + $0x16]] }
  0xf2   : > { %v774_v29 = vrot.slane %v761_v14, %v2761_v59  ;;  %v954_v61 = vmul.f32 %v953_v54, %v2759_v57  ;;  %v1017_v11 = vstv %s2191_s8  ;;  %s2877_s8 = sld [smem:[#allocation3 + $0x18]] }
  0xf3   : > { %v788_v8 = vstv %s2184_s3  ;;  %s2190_s3 = sld [smem:[#allocation3 + $0x11]] }
  0xf4   : > { %v789_v15 = vmul.f32 %v788_v8, %v2759_v57 }
  0xf5   : > { %550 = vrot.lane.b32.xlu0 %v545_v21, %s2521_s14  ;;  %517 = vrot.lane.b32.xlu1 %v512_v22, %s2520_s7  ;;  %s2526_s7 = smov 111   ;;  %v823_v21 = vstv %s2234_s21  ;;  %s2240_s21 = sld [smem:[#allocation3 + $0x43]] }
  0xf6   : > { %v792_v19 = vadd.f32 %v791_v16, %v789_v15  ;;  %v1018_v15 = vmul.f32 %v1017_v11, %v2759_v57  ;;  %v1050_v16 = vstv %s2192_s20  ;;  %s2890_s20 = sld [smem:[#allocation3 + $0x19]] }
  0xf8   : > { %v797_v22 = vrot.slane %v792_v19, %v2757_v56  ;;  %v805_v28 = vrot.slane %v792_v19, %v2761_v59  ;;  %v801_v34 = vrot.slane %v792_v19, %v2767_v2 }
  0xf9   : > { %579 = vrot.lane.b32.xlu0 %v572_v26, %s2522_s15  ;;  %548 = vrot.lane.b32.xlu1 %v541_v27, %s2521_s14  ;;  %s2527_s14 = smov 110   ;;  %v824_v26 = vmul.f32 %v823_v21, %v2755_v52  ;;  %v856_v27 = vstv %s2235_s24  ;;  %v986_v62 = vstv %s2190_s3  ;;  %s2241_s24 = sld [smem:[#allocation3 + $0x44]] }
  0xfa   : > { %s2862_s3 = sld [smem:[#allocation3 + $0x17]] }
  0xfb   : > { %v825_v30 = vadd.f32 %v824_v26, %v822_v24 }
  0xfd   : > { %610 = vrot.lane.b32.xlu0 %v601_v31, %s2523_s23  ;;  %577 = vrot.lane.b32.xlu1 %v568_v32, %s2522_s15  ;;  %v855_v31 = vmul.f32 %v854_v25, %v2759_v57  ;;  %v857_v32 = vmul.f32 %v856_v27, %v2755_v52  ;;  %v834_v33 = vrot.slane %v825_v30, %v2767_v2  ;;  %v1083_v27 = vstv %s2193_s17  ;;  %s2911_s17 = sld [smem:[#allocation3 + $0x1a]] }
  0xfe   : > { %v830_v40 = vrot.slane %v825_v30, %v2757_v56  ;;  %v838_v46 = vrot.slane %v825_v30, %v2761_v59 }
  0xff   : > { %v858_v36 = vadd.f32 %v857_v32, %v855_v31  ;;  %v1084_v31 = vmul.f32 %v1083_v27, %v2759_v57  ;;  %v1116_v32 = vstv %s2194_s25  ;;  %s2924_s25 = sld [smem:[#allocation3 + $0x1b]] }
 0x101   : > { %614 = vrot.lane.b32.xlu0 %v609_v38, %s2523_s23  ;;  %581 = vrot.lane.b32.xlu1 %v576_v39, %s2522_s15  ;;  %s2528_s15 = smov 109   ;;  %v889_v38 = vstv %s2236_s22  ;;  %v863_v39 = vrot.slane %v858_v36, %v2757_v56  ;;  %v871_v45 = vrot.slane %v858_v36, %v2761_v59  ;;  %v867_v51 = vrot.slane %v858_v36, %v2767_v2  ;;  %s2242_s22 = sld [smem:[#allocation3 + $0x45]] }
 0x105   : > { %645 = vrot.lane.b32.xlu0 %v638_v43, %s2524_s27  ;;  %612 = vrot.lane.b32.xlu1 %v605_v44, %s2523_s23  ;;  %s2529_s23 = smov 108   ;;  %v890_v43 = vmul.f32 %v889_v38, %v2755_v52  ;;  %v922_v44 = vstv %s2237_s26  ;;  %s2243_s26 = sld [smem:[#allocation3 + $0x46]] }
 0x107   : > { %v891_v47 = vadd.f32 %v890_v43, %v888_v41 }
 0x109   : > { %676 = vrot.lane.b32.xlu0 %v667_v48, %s2525_s29  ;;  %643 = vrot.lane.b32.xlu1 %v634_v49, %s2524_s27  ;;  %v921_v48 = vmul.f32 %v920_v42, %v2759_v57  ;;  %v923_v49 = vmul.f32 %v922_v44, %v2755_v52  ;;  %v900_v50 = vrot.slane %v891_v47, %v2767_v2  ;;  %v1149_v44 = vstv %s2195_s28  ;;  %s2945_s28 = sld [smem:[#allocation3 + $0x1c]] }
 0x10a   : > { %v896_v60 = vrot.slane %v891_v47, %v2757_v56  ;;  %v904_v3 = vrot.slane %v891_v47, %v2761_v59 }
 0x10b   : > { %v924_v53 = vadd.f32 %v923_v49, %v921_v48 }
 0x10d   : > { %680 = vrot.lane.b32.xlu0 %v675_v55, %s2525_s29  ;;  %647 = vrot.lane.b32.xlu1 %v642_v58, %s2524_s27  ;;  %s2530_s27 = smov 107   ;;  %v955_v55 = vstv %s2238_s30  ;;  %v929_v58 = vrot.slane %v924_v53, %v2757_v56  ;;  %v937_v1 = vrot.slane %v924_v53, %v2761_v59  ;;  %v933_v8 = vrot.slane %v924_v53, %v2767_v2  ;;  %s2244_s30 = sld [smem:[#allocation3 + $0x47]] }
 0x111   : > { %711 = vrot.lane.b32.xlu0 %v704_v63, %s2526_s7  ;;  %678 = vrot.lane.b32.xlu1 %v671_v0, %s2525_s29  ;;  %s2531_s29 = smov 106   ;;  %v956_v63 = vmul.f32 %v955_v55, %v2755_v52  ;;  %v988_v0 = vstv %s2239_s4  ;;  %s2865_s4 = sld [smem:[#allocation3 + $0x48]] }
 0x113   : > { %v957_v4 = vadd.f32 %v956_v63, %v954_v61 }
 0x115   : > { %742 = vrot.lane.b32.xlu0 %v733_v5, %s2527_s14  ;;  %709 = vrot.lane.b32.xlu1 %v700_v6, %s2526_s7  ;;  %v987_v5 = vmul.f32 %v986_v62, %v2759_v57  ;;  %v989_v6 = vmul.f32 %v988_v0, %v2755_v52  ;;  %v966_v7 = vrot.slane %v957_v4, %v2767_v2 }
 0x116   : > { %v962_v14 = vrot.slane %v957_v4, %v2757_v56  ;;  %v970_v20 = vrot.slane %v957_v4, %v2761_v59 }
 0x117   : > { %v990_v9 = vadd.f32 %v989_v6, %v987_v5  ;;  %v1184_v54 = vstv %s2865_s4  ;;  %s2961_s4 = sld [smem:[#allocation3 + $0x4e]] }
 0x118   : > { %v1185_v0 = vmul.f32 %v1184_v54, %v2755_v52 }
 0x119   : > { %746 = vrot.lane.b32.xlu0 %v741_v12, %s2527_s14  ;;  %713 = vrot.lane.b32.xlu1 %v708_v13, %s2526_s7  ;;  %s2532_s7 = smov 96   ;;  %v1019_v12 = vstv %s2240_s21  ;;  %v995_v13 = vrot.slane %v990_v9, %v2757_v56  ;;  %v1003_v19 = vrot.slane %v990_v9, %v2761_v59  ;;  %v999_v25 = vrot.slane %v990_v9, %v2767_v2  ;;  %s2881_s21 = sld [smem:[#allocation3 + $0x49]] }
 0x11d   : > { %777 = vrot.lane.b32.xlu0 %v770_v17, %s2528_s15  ;;  %744 = vrot.lane.b32.xlu1 %v737_v18, %s2527_s14  ;;  %s2533_s14 = smov 95   ;;  %v1020_v17 = vmul.f32 %v1019_v12, %v2755_v52  ;;  %v1052_v18 = vstv %s2241_s24  ;;  %s2893_s24 = sld [smem:[#allocation3 + $0x4a]] }
 0x11f   : > { %v1021_v21 = vadd.f32 %v1020_v17, %v1018_v15  ;;  %v1246_v15 = vstv %s2890_s20  ;;  %s2545_s20 = smov 74  }
 0x121   : > { %806 = vrot.lane.b32.xlu0 %v797_v22, %s2529_s23  ;;  %775 = vrot.lane.b32.xlu1 %v766_v23, %s2528_s15  ;;  %v1051_v22 = vmul.f32 %v1050_v16, %v2759_v57  ;;  %v1053_v23 = vmul.f32 %v1052_v18, %v2755_v52  ;;  %v1030_v24 = vrot.slane %v1021_v21, %v2767_v2 }
 0x122   : > { %v1026_v30 = vrot.slane %v1021_v21, %v2757_v56  ;;  %v1034_v37 = vrot.slane %v1021_v21, %v2761_v59 }
 0x123   : > { %v1054_v26 = vadd.f32 %v1053_v23, %v1051_v22  ;;  %v1248_v17 = vstv %s2893_s24  ;;  %v1247_v23 = vmul.f32 %v1246_v15, %v2759_v57  ;;  %s2990_s24 = sld [smem:[#allocation3 + $0x4f]]  ;;  %v1380_v15 = vstv %s2961_s4  ;;  %s2546_s4 = smov 64  }
 0x125   : > { %810 = vrot.lane.b32.xlu0 %v805_v28, %s2529_s23  ;;  %779 = vrot.lane.b32.xlu1 %v774_v29, %s2528_s15  ;;  %s2534_s15 = smov 94   ;;  %v1085_v28 = vstv %s2242_s22  ;;  %v1059_v29 = vrot.slane %v1054_v26, %v2757_v56  ;;  %v1067_v36 = vrot.slane %v1054_v26, %v2761_v59  ;;  %v1063_v42 = vrot.slane %v1054_v26, %v2767_v2  ;;  %s2915_s22 = sld [smem:[#allocation3 + $0x4b]] }
 0x129   : > { %841 = vrot.lane.b32.xlu0 %v834_v33, %s2530_s27  ;;  %808 = vrot.lane.b32.xlu1 %v801_v34, %s2529_s23  ;;  %s2535_s23 = smov 93   ;;  %v1086_v33 = vmul.f32 %v1085_v28, %v2755_v52  ;;  %v1118_v34 = vstv %s2243_s26  ;;  %s2927_s26 = sld [smem:[#allocation3 + $0x4c]] }
 0x12b   : > { %v1087_v38 = vadd.f32 %v1086_v33, %v1084_v31  ;;  %v1281_v31 = vstv %s2915_s22  ;;  %s3010_s22 = sld [smem:[#allocation3 + $0x53]] }
 0x12d   : > { %872 = vrot.lane.b32.xlu0 %v863_v39, %s2531_s29  ;;  %839 = vrot.lane.b32.xlu1 %v830_v40, %s2530_s27  ;;  %v1117_v39 = vmul.f32 %v1116_v32, %v2759_v57  ;;  %v1119_v40 = vmul.f32 %v1118_v34, %v2755_v52  ;;  %v1096_v41 = vrot.slane %v1087_v38, %v2767_v2 }
 0x12e   : > { %v1092_v49 = vrot.slane %v1087_v38, %v2757_v56  ;;  %v1100_v61 = vrot.slane %v1087_v38, %v2761_v59  ;;  %v1312_v38 = vstv %s2924_s25  ;;  %s3012_s25 = sld [smem:[#allocation3 + $0x1f]] }
 0x12f   : > { %v1120_v43 = vadd.f32 %v1119_v40, %v1117_v39  ;;  %v1282_v39 = vmul.f32 %v1281_v31, %v2755_v52  ;;  %v1314_v40 = vstv %s2927_s26  ;;  %s3014_s26 = sld [smem:[#allocation3 + $0x20]] }
 0x131   : > { %876 = vrot.lane.b32.xlu0 %v871_v45, %s2531_s29  ;;  %843 = vrot.lane.b32.xlu1 %v838_v46, %s2530_s27  ;;  %s2536_s27 = smov 92   ;;  %v1151_v45 = vstv %s2244_s30  ;;  %v1125_v48 = vrot.slane %v1120_v43, %v2757_v56  ;;  %v1129_v5 = vrot.slane %v1120_v43, %v2767_v2  ;;  %s2949_s30 = sld [smem:[#allocation3 + $0x4d]] }
 0x132   : > { %v1152_v53 = vmul.f32 %v1151_v45, %v2755_v52 }
 0x135   : > { %907 = vrot.lane.b32.xlu0 %v900_v50, %s2532_s7  ;;  %874 = vrot.lane.b32.xlu1 %v867_v51, %s2531_s29  ;;  %s2537_s29 = smov 91   ;;  %v1150_v50 = vmul.f32 %v1149_v44, %v2759_v57  ;;  %v1182_v51 = vstv %s2862_s3  ;;  %s2958_s3 = sld [smem:[#allocation3 + $0x1d]] }
 0x136   : > { %v1183_v63 = vmul.f32 %v1182_v51, %v2759_v57 }
 0x137   : > { %v1153_v62 = vadd.f32 %v1152_v53, %v1150_v50 }
 0x138   : > { %v1186_v6 = vadd.f32 %v1185_v0, %v1183_v63  ;;  %v1347_v63 = vstv %s2949_s30  ;;  %s3041_s30 = sld [smem:[#allocation3 + $0x55]] }
 0x139   : > { %938 = vrot.lane.b32.xlu0 %v929_v58, %s2533_s14  ;;  %905 = vrot.lane.b32.xlu1 %v896_v60, %s2532_s7  ;;  %v1133_v60 = vrot.slane %v1120_v43, %v2761_v59  ;;  %v1162_v4 = vrot.slane %v1153_v62, %v2767_v2  ;;  %v1166_v21 = vrot.slane %v1153_v62, %v2761_v59 }
 0x13a   : > { %v1191_v12 = vrot.slane %v1186_v6, %v2757_v56  ;;  %v1195_v28 = vrot.slane %v1186_v6, %v2767_v2 }
 0x13d   : > { %942 = vrot.lane.b32.xlu0 %v937_v1, %s2533_s14  ;;  %909 = vrot.lane.b32.xlu1 %v904_v3, %s2532_s7  ;;  %s2538_s7 = smov 90  }
 0x141   : > { %973 = vrot.lane.b32.xlu0 %v966_v7, %s2534_s15  ;;  %940 = vrot.lane.b32.xlu1 %v933_v8, %s2533_s14  ;;  %s2539_s14 = smov 80   ;;  %v1215_v7 = vstv %s2877_s8  ;;  %v1217_v8 = vstv %s2881_s21  ;;  %s2972_s8 = sld [smem:[#allocation3]] }
 0x142   : > { %v1218_v16 = vmul.f32 %v1217_v8, %v2755_v52  ;;  %v1378_v8 = vstv %s2958_s3  ;;  %s2985_s21 = sld [smem:[#allocation3 + $0x31]]  ;;  %s3043_s3 = sld [smem:[#allocation3 + $0x56]] }
 0x145   : > { %1004 = vrot.lane.b32.xlu0 %v995_v13, %s2535_s23  ;;  %971 = vrot.lane.b32.xlu1 %v962_v14, %s2534_s15  ;;  %v1158_v13 = vrot.slane %v1153_v62, %v2757_v56  ;;  %v1216_v14 = vmul.f32 %v1215_v7, %v2759_v57  ;;  %v366_v62 = vand.u32 127, %v3823_v10 }
 0x147   : > { %v1219_v22 = vadd.f32 %v1218_v16, %v1216_v14  ;;  %v2992_v14 = vand.u32 15, %v366_v62 }
 0x149   : > { %1008 = vrot.lane.b32.xlu0 %v1003_v19, %s2535_s23  ;;  %975 = vrot.lane.b32.xlu1 %v970_v20, %s2534_s15  ;;  %s2540_s15 = smov 79   ;;  %v1199_v20 = vrot.slane %v1186_v6, %v2761_v59  ;;  %v1228_v27 = vrot.slane %v1219_v22, %v2767_v2  ;;  %v1232_v44 = vrot.slane %v1219_v22, %v2761_v59  ;;  %v3117_v10 = vadd.s32 1, %v2992_v14 }
 0x14b   : > { %vm420_vm4 = vcmp.lt.s32.totalorder %v3117_v10, 16 }
 0x14d   : > { %1037 = vrot.lane.b32.xlu0 %v1030_v24, %s2536_s27  ;;  %1006 = vrot.lane.b32.xlu1 %v999_v25, %s2535_s23  ;;  %s2541_s23 = smov 78   ;;  %v1249_v24 = vmul.f32 %v1248_v17, %v2755_v52 }
 0x151   : > { %1068 = vrot.lane.b32.xlu0 %v1059_v29, %s2537_s29  ;;  %1035 = vrot.lane.b32.xlu1 %v1026_v30, %s2536_s27  ;;  %v1250_v29 = vadd.f32 %v1249_v24, %v1247_v23  ;;  %v1279_v30 = vstv %s2911_s17  ;;  %s2997_s17 = sld [smem:[#allocation3 + $0x51]]  ;;  %v1379_v23 = vmul.f32 %v1378_v8, %v2759_v57 }
 0x153   : > { %v1255_v34 = vrot.slane %v1250_v29, %v2757_v56  ;;  %v1263_v43 = vrot.slane %v1250_v29, %v2761_v59  ;;  %v1259_v54 = vrot.slane %v1250_v29, %v2767_v2  ;;  %v3029_v29 = vadd.s32 4294967293, %v2992_v14 }
 0x155   : > { %1072 = vrot.lane.b32.xlu0 %v1067_v36, %s2537_s29  ;;  %1039 = vrot.lane.b32.xlu1 %v1034_v37, %s2536_s27  ;;  %s2542_s27 = smov 77   ;;  %v1224_v36 = vrot.slane %v1219_v22, %v2757_v56  ;;  %v1280_v37 = vmul.f32 %v1279_v30, %v2759_v57  ;;  %vm394_vm10 = vcmp.ge.s32.totalorder %v3029_v29, 0 }
 0x157   : > { %v1283_v45 = vadd.f32 %v1282_v39, %v1280_v37 }
 0x159   : > { %1103 = vrot.lane.b32.xlu0 %v1096_v41, %s2538_s7  ;;  %1070 = vrot.lane.b32.xlu1 %v1063_v42, %s2537_s29  ;;  %s2543_s29 = smov 76   ;;  %v1292_v53 = vrot.slane %v1283_v45, %v2767_v2  ;;  %v1288_v6 = vrot.slane %v1283_v45, %v2757_v56 }
 0x15b   : > { %v2869_v46 = vpop.permute.xlu0 %484  ;;  %v2871_v47 = vpop.permute.xlu1 %480 }
 0x15d   : > { %1134 = vrot.lane.b32.xlu0 %v1125_v48, %s2539_s14  ;;  %1101 = vrot.lane.b32.xlu1 %v1092_v49, %s2538_s7  ;;  %v1313_v48 = vmul.f32 %v1312_v38, %v2759_v57  ;;  %v1315_v49 = vmul.f32 %v1314_v40, %v2755_v52  ;;  %v444_v40 = vstv %s2985_s21  ;;  %s2547_s21 = smov 63  }
 0x15f   : > { %v2883_v55 = vpop.permute.xlu0 %515  ;;  %v2885_v58 = vpop.permute.xlu1 %482 }
 0x160   : > { %v487_v8 = vsel %vm486_vm14, %v2871_v47, %v2885_v58 }
 0x161   : > { %1138 = vrot.lane.b32.xlu0 %v1133_v60, %s2539_s14  ;;  %1105 = vrot.lane.b32.xlu1 %v1100_v61, %s2538_s7  ;;  %v1316_v60 = vadd.f32 %v1315_v49, %v1313_v48  ;;  %v1345_v61 = vstv %s2945_s28  ;;  %s2544_s7 = smov 75   ;;  %s3023_s28 = sld [smem:[#allocation3 + $0x22]] }
 0x162   : > { %v1346_v7 = vmul.f32 %v1345_v61, %v2759_v57  ;;  %v445_v61 = vmul.f32 %v444_v40, %v2755_v52 }
 0x163   : > { %v2895_v1 = vpop.permute.xlu0 %546  ;;  %v2897_v3 = vpop.permute.xlu1 %513 }
 0x165   : > { %1169 = vrot.lane.b32.xlu0 %v1162_v4, %s2540_s15  ;;  %1136 = vrot.lane.b32.xlu1 %v1129_v5, %s2539_s14  ;;  %v1321_v5 = vrot.slane %v1316_v60, %v2757_v56  ;;  %s2983_s14 = sld [smem:[#allocation3 + $0x1e]] }
 0x167   : > { %v2903_v9 = vpop.permute.xlu0 %550  ;;  %v2905_v11 = vpop.permute.xlu1 %517 }
 0x169   : > { %1200 = vrot.lane.b32.xlu0 %v1191_v12, %s2541_s23  ;;  %1167 = vrot.lane.b32.xlu1 %v1158_v13, %s2540_s15  ;;  %v367_v12 = vadd.s32 128, %v366_v62  ;;  %v1348_v13 = vmul.f32 %v1347_v63, %v2755_v52  ;;  %v1444_v62 = vstv %s3012_s25  ;;  %v1477_v63 = vstv %s2997_s17  ;;  %s2551_s17 = smov 59   ;;  %s2553_s25 = smov 48  }
 0x16b   : > { %v2917_v18 = vpop.permute.xlu0 %579  ;;  %v2919_v19 = vpop.permute.xlu1 %548  ;;  %v3005_v22 = vadd.f32 %v1348_v13, %v1346_v7  ;;  %v3016_v24 = vand.u32 15, %v367_v12  ;;  %v1411_v38 = vstv %s2983_s14  ;;  %s3057_s14 = sld [smem:[#allocation3 + $0x25]]  ;;  %v1475_v7 = vstv %s3014_s26  ;;  %s3387_s26 = sld [smem:[#allocation3 + $0x57]] }
 0x16d   : > { %1204 = vrot.lane.b32.xlu0 %v1199_v20, %s2541_s23  ;;  %1171 = vrot.lane.b32.xlu1 %v1166_v21, %s2540_s15  ;;  %s2995_s15 = sld [smem:[#allocation3 + $0x50]]  ;;  %v1329_v20 = vrot.slane %v1316_v60, %v2761_v59  ;;  %v1296_v21 = vrot.slane %v1283_v45, %v2761_v59  ;;  %v3046_v39 = vadd.s32 4294967293, %v3016_v24  ;;  %v3098_v40 = vadd.s32 4294967294, %v3016_v24 }
 0x16f   : > { %v2929_v25 = vpop.permute.xlu0 %610  ;;  %v2931_v26 = vpop.permute.xlu1 %577  ;;  %vm3825_vm11 = vcmp.ge.s32.totalorder %v3046_v39, 0  ;;  %vm3824_vm13 = vcmp.ge.s32.totalorder %v3098_v40, 0 }
 0x171   : > { %1235 = vrot.lane.b32.xlu0 %v1228_v27, %s2542_s27  ;;  %1202 = vrot.lane.b32.xlu1 %v1195_v28, %s2541_s23  ;;  %s3008_s23 = sld [smem:[#allocation3 + $0x52]]  ;;  %v1381_v27 = vmul.f32 %v1380_v15, %v2755_v52  ;;  %v442_v28 = vstv %s2972_s8  ;;  %s3053_s8 = sld [smem:[#allocation3 + $0x24]]  ;;  %v3171_v15 = vadd.s32 3, %v3016_v24 }
 0x173   : > { %v2937_v32 = vpop.permute.xlu0 %614  ;;  %v2939_v33 = vpop.permute.xlu1 %581  ;;  %v3038_v37 = vadd.f32 %v1381_v27, %v1379_v23 }
 0x175   : > { %1264 = vrot.lane.b32.xlu0 %v1255_v34, %s2543_s29  ;;  %1233 = vrot.lane.b32.xlu1 %v1224_v36, %s2542_s27  ;;  %v1358_v34 = vrot.slane %v3005_v22, %v2767_v2  ;;  %v1325_v36 = vrot.slane %v1316_v60, %v2767_v2  ;;  %v1387_v49 = vrot.slane %v3038_v37, %v2757_v56  ;;  %v1446_v60 = vstv %s2995_s15  ;;  %s2550_s15 = smov 60  }
 0x176   : > { %v1395_v27 = vrot.slane %v3038_v37, %v2761_v59 }
 0x177   : > { %v2951_v41 = vpop.permute.xlu0 %645  ;;  %v2953_v42 = vpop.permute.xlu1 %612 }
 0x179   : > { %1268 = vrot.lane.b32.xlu0 %v1263_v43, %s2543_s29  ;;  %1237 = vrot.lane.b32.xlu1 %v1232_v44, %s2542_s27  ;;  %s3021_s27 = sld [smem:[#allocation3 + $0x21]]  ;;  %v443_v43 = vmul.f32 %v442_v28, %v2759_v57  ;;  %v1413_v44 = vstv %s2990_s24  ;;  %v1362_v28 = vrot.slane %v3005_v22, %v2761_v59  ;;  %s2549_s24 = smov 61  }
 0x17b   : > { %v2963_v50 = vpop.permute.xlu0 %676  ;;  %v2965_v51 = vpop.permute.xlu1 %643  ;;  %v446_v12 = vadd.f32 %v445_v61, %v443_v43 }
 0x17d   : > { %1299 = vrot.lane.b32.xlu0 %v1292_v53, %s2544_s7  ;;  %1266 = vrot.lane.b32.xlu1 %v1259_v54, %s2543_s29  ;;  %s3026_s29 = sld [smem:[#allocation3 + $0x54]]  ;;  %v1354_v53 = vrot.slane %v3005_v22, %v2757_v56  ;;  %v1412_v54 = vmul.f32 %v1411_v38, %v2759_v57  ;;  %v3095_v38 = vadd.s32 4294967294, %v2992_v14  ;;  %v455_v61 = vrot.slane %v446_v12, %v2767_v2 }
 0x17e   : > { %v3165_v22 = vadd.s32 3, %v2992_v14 }
 0x17f   : > { %v2975_v0 = vpop.permute.xlu0 %680  ;;  %v2977_v4 = vpop.permute.xlu1 %647  ;;  %v1508_v13 = vstv %s3021_s27  ;;  %vm402_vm12 = vcmp.ge.s32.totalorder %v3095_v38, 0  ;;  %s3399_s27 = sld [smem:[#allocation3 + $0x27]] }
 0x181   : > { %1330 = vrot.lane.b32.xlu0 %v1321_v5, %s2545_s20  ;;  %1297 = vrot.lane.b32.xlu1 %v1288_v6, %s2544_s7  ;;  %v1414_v6 = vmul.f32 %v1413_v44, %v2755_v52 }
 0x183   : > { %v2999_v16 = vpop.permute.xlu0 %711  ;;  %v3001_v17 = vpop.permute.xlu1 %678 }
 0x185   : > { %1334 = vrot.lane.b32.xlu0 %v1329_v20, %s2545_s20  ;;  %1301 = vrot.lane.b32.xlu1 %v1296_v21, %s2544_s7  ;;  %s3051_s7 = sld [smem:[#allocation3 + $0x23]]  ;;  %v488_v20 = vsel %vm486_vm14, %v2885_v58, %v2869_v46  ;;  %v3175_v46 = vld [vmem:[#allocation2 + $0x1] ss:$2 sm:$0x7]  ;;  %vm436_vm14 = vcmp.lt.s32.totalorder %v3165_v22, 16 }
 0x187   : > { %v3031_v30 = vpop.permute.xlu0 %742  ;;  %v3033_v31 = vpop.permute.xlu1 %709 }
 0x189   : > { %1365 = vrot.lane.b32.xlu0 %v1358_v34, %s2546_s4  ;;  %1332 = vrot.lane.b32.xlu1 %v1325_v36, %s2545_s20  ;;  %v3091_v34 = vadd.f32 %v1414_v6, %v1412_v54  ;;  %v1445_v36 = vmul.f32 %v1444_v62, %v2759_v57  ;;  %v1447_v57 = vmul.f32 %v1446_v60, %v2755_v52  ;;  %s2548_s20 = smov 62  }
 0x18a   : > { %v451_v54 = vrot.slane %v446_v12, %v2757_v56  ;;  %v1391_v52 = vrot.slane %v3038_v37, %v2767_v2  ;;  %v3132_v12 = vadd.s32 1, %v3016_v24 }
 0x18b   : > { %v3060_v45 = vpop.permute.xlu0 %746  ;;  %v3062_v48 = vpop.permute.xlu1 %713  ;;  %v3127_v60 = vadd.f32 %v1447_v57, %v1445_v36  ;;  %v3143_v36 = vadd.s32 2, %v2992_v14  ;;  %v3147_v57 = vadd.s32 2, %v3016_v24  ;;  %v1428_v47 = vrot.slane %v3091_v34, %v2761_v59 }
 0x18c   : > { %v458_v37 = vsel %vm394_vm10, %v451_v54, 0.0  ;;  %vm421_vm5 = vcmp.lt.s32.totalorder %v3132_v12, 16 }
 0x18d   : > { %1396 = vrot.lane.b32.xlu0 %v1387_v49, %s2547_s21  ;;  %1363 = vrot.lane.b32.xlu1 %v1354_v53, %s2546_s4  ;;  %v3103_v49 = vadd.s32 4294967295, %v2992_v14  ;;  %v3106_v53 = vadd.s32 4294967295, %v3016_v24  ;;  %v1453_v54 = vrot.slane %v3127_v60, %v2757_v56  ;;  %v1478_v14 = vmul.f32 %v3175_v46, %v1477_v63 }
 0x18e   : > { %vm428_vm8 = vcmp.lt.s32.totalorder %v3143_v36, 16  ;;  %v492_v24 = vsel %vm3824_vm13, %v488_v20, 0.0  ;;  %vm429_vm9 = vcmp.lt.s32.totalorder %v3147_v57, 16  ;;  %v3846_v20 = vstv %s3008_s23  ;;  %s2552_s23 = smov 58  }
 0x18f   : > { %v3083_v21 = vpop.permute.xlu0 %777  ;;  %v3085_v23 = vpop.permute.xlu1 %744  ;;  %vm410_vm15 = vcmp.ge.s32.totalorder %v3103_v49, 0  ;;  %vm3829_vm1 = vcmp.ge.s32.totalorder %v3106_v53, 0  ;;  %vm682_vm13 = vcmask 916480  }
 0x191   : > { %1400 = vrot.lane.b32.xlu0 %v1395_v27, %s2547_s21  ;;  %1367 = vrot.lane.b32.xlu1 %v1362_v28, %s2546_s4  ;;  %v1424_v27 = vrot.slane %v3091_v34, %v2767_v2  ;;  %v459_v28 = vsel %vm3825_vm11, %v455_v61, 0.0  ;;  %v1420_v61 = vrot.slane %v3091_v34, %v2757_v56  ;;  %vm715_vm11 = vcmask 908288   ;;  %s3446_s4 = sld [smem:[#allocation3 + $0x59]] }
 0x192   : > { %v494_v34 = vadd.f32 %v492_v24, %v459_v28  ;;  %v553_v24 = vsel %vm552_vm2, %v2895_v1, %v2919_v19 }
 0x193   : > { %v3119_v44 = vpop.permute.xlu0 %806  ;;  %v3121_v43 = vpop.permute.xlu1 %775 }
 0x194   : > { %3844 = vst [vmem:[#allocation13_spill] sm:$0xff] %v3121_v43 }
 0x195   : > { %1431 = vrot.lane.b32.xlu0 %v1424_v27, %s2548_s20  ;;  %1398 = vrot.lane.b32.xlu1 %v1391_v52, %s2547_s21  ;;  %v3157_v52 = vld [vmem:[#allocation2] ss:$2 sm:$0x7]  ;;  %s3471_s21 = sld [smem:[#allocation3 + $0x2a]] }
 0x196   : > { %v1476_v62 = vmul.f32 %v3157_v52, %v1475_v7  ;;  %v521_v7 = vsel %vm519_vm0, %v2883_v55, %v2905_v11  ;;  %v1509_v58 = vmul.f32 %v3157_v52, %v1508_v13  ;;  %v1461_v11 = vrot.slane %v3127_v60, %v2761_v59 }
 0x197   : > { %v3149_v6 = vpop.permute.xlu0 %810  ;;  %v3151_v27 = vpop.permute.xlu1 %779  ;;  %v491_v13 = vsel %vm402_vm12, %v487_v8, 0.0 }
 0x198   : > { %v3200_v5 = vadd.f32 %v1478_v14, %v1476_v62  ;;  %v3847_v14 = vstv %s3023_s28  ;;  %v493_v35 = vadd.f32 %v491_v13, %v458_v37  ;;  %v585_v37 = vsel %vm583_vm3, %v2917_v18, %v2939_v33  ;;  %s3411_s28 = sld [smem:[#allocation3 + $0x58]] }
 0x199   : > { %1462 = vrot.lane.b32.xlu0 %v1453_v54, %s2549_s24  ;;  %1429 = vrot.lane.b32.xlu1 %v1420_v61, %s2548_s20  ;;  %v520_v54 = vsel %vm519_vm0, %v2897_v3, %v2883_v55  ;;  %v1511_v55 = vmul.f32 %v3175_v46, %v3846_v20  ;;  %v525_v3 = vsel %vm3829_vm1, %v521_v7, 0.0  ;;  %vm437_vm0 = vcmp.lt.s32.totalorder %v3171_v15, 16  ;;  %v3875_v15 = vld [vmem:[#allocation12_spill] sm:$0xff] }
 0x19a   : > { %v524_v8 = vsel %vm410_vm15, %v520_v54, 0.0  ;;  %v1542_v20 = vmul.f32 %v3157_v52, %v3847_v14  ;;  %v584_v7 = vsel %vm583_vm3, %v2931_v26, %v2917_v18  ;;  %v1488_v28 = vrot.slane %v3200_v5, %v2767_v2 }
 0x19b   : > { %v3194_v63 = vpop.permute.xlu0 %841  ;;  %v3196_v61 = vpop.permute.xlu1 %808  ;;  %v3216_v62 = vadd.f32 %v1511_v55, %v1509_v58  ;;  %v527_v58 = vadd.f32 %v525_v3, %v494_v34  ;;  %v1484_v26 = vrot.slane %v3200_v5, %v2757_v56  ;;  %v526_v54 = vadd.f32 %v524_v8, %v493_v35 }
 0x19c   : > { %3845 = vst [vmem:[#allocation14_spill] sm:$0xff] %v3194_v63  ;;  %vm748_vm1 = vcmask 900096   ;;  %v588_v1 = vsel %vm420_vm4, %v584_v7, 0.0  ;;  %v618_v35 = vsel %vm616_vm6, %v2953_v42, %v2937_v32  ;;  %v1492_v18 = vrot.slane %v3200_v5, %v2761_v59 }
 0x19d   : > { %1466 = vrot.lane.b32.xlu0 %v1461_v11, %s2549_s24  ;;  %1433 = vrot.lane.b32.xlu1 %v1428_v47, %s2548_s20  ;;  %v1457_v47 = vrot.slane %v3127_v60, %v2767_v2  ;;  %v554_v11 = vsel %vm552_vm2, %v2919_v19, %v2903_v9  ;;  %v617_v60 = vsel %vm616_vm6, %v2929_v25, %v2953_v42  ;;  %v589_v25 = vsel %vm421_vm5, %v585_v37, 0.0  ;;  %s2557_s20 = smov 44  }
 0x19e   : > { %v1517_v9 = vrot.slane %v3216_v62, %v2757_v56  ;;  %v557_v19 = vadd.f32 %v553_v24, %v526_v54  ;;  %v650_v33 = vsel %vm649_vm7, %v2965_v51, %v2951_v41  ;;  %v1525_v32 = vrot.slane %v3216_v62, %v2761_v59 }
 0x19f   : > { %v3224_v63 = vpop.permute.xlu0 %872  ;;  %v3226_v43 = vpop.permute.xlu1 %839  ;;  %v558_v42 = vadd.f32 %v554_v11, %v527_v58  ;;  %v621_v5 = vsel %vm428_vm8, %v617_v60, 0.0  ;;  %v651_v3 = vsel %vm649_vm7, %v2951_v41, %v2977_v4  ;;  %v3848_v34 = vstv %s3010_s22  ;;  %s3370_s22 = sld [smem:[#allocation3 + $0x26]] }
 0x1a0   : > { %v1544_v8 = vmul.f32 %v3175_v46, %v3848_v34  ;;  %v590_v51 = vadd.f32 %v588_v1, %v557_v19  ;;  %v622_v14 = vsel %vm429_vm9, %v618_v35, 0.0  ;;  %v683_v7 = vsel %vm682_vm13, %v2963_v50, %v3001_v17 }
 0x1a1   : > { %1495 = vrot.lane.b32.xlu0 %v1488_v28, %s2550_s15  ;;  %1464 = vrot.lane.b32.xlu1 %v1457_v47, %s2549_s24  ;;  %vm781_vm2 = vcmask 891904   ;;  %v1521_v41 = vrot.slane %v3216_v62, %v2767_v2  ;;  %v591_v4 = vadd.f32 %v589_v25, %v558_v42  ;;  %v654_v28 = vsel %vm436_vm14, %v650_v33, 0.0  ;;  %s3479_s24 = sld [smem:[#allocation3 + $0x5b]] }
 0x1a2   : > { %v684_v47 = vsel %vm682_vm13, %v3001_v17, %v2975_v0  ;;  %v3849_v58 = vstv %s3051_s7  ;;  %v623_v24 = vadd.f32 %v621_v5, %v590_v51  ;;  %v655_v37 = vsel %vm437_vm0, %v651_v3, 0.0  ;;  %s3450_s7 = sld [smem:[#allocation3 + $0x29]] }
 0x1a3   : > { %v3262_v13 = vpop.permute.xlu0 %876  ;;  %v3264_v55 = vpop.permute.xlu1 %843  ;;  %v1575_v50 = vmul.f32 %v3157_v52, %v3849_v58  ;;  %v3302_v11 = vadd.f32 %v1544_v8, %v1542_v20  ;;  %v624_v60 = vadd.f32 %v622_v14, %v591_v4  ;;  %v687_v0 = vsel %vm394_vm10, %v683_v7, 0.0 }
 0x1a4   : > { %v717_v17 = vsel %vm715_vm11, %v2999_v16, %v3062_v48  ;;  %v3850_v1 = vstv %s3026_s29  ;;  %vm3851_vm13 = vcmp.ge.s32.totalorder %v3046_v39, 0  ;;  %v749_v20 = vsel %vm748_vm1, %v3031_v30, %v3085_v23  ;;  %s2554_s29 = smov 47  }
 0x1a5   : > { %1526 = vrot.lane.b32.xlu0 %v1517_v9, %s2551_s17  ;;  %1493 = vrot.lane.b32.xlu1 %v1484_v26, %s2550_s15  ;;  %v716_v26 = vsel %vm715_vm11, %v3033_v31, %v2999_v16  ;;  %v1577_v35 = vmul.f32 %v3175_v46, %v3850_v1  ;;  %v656_v9 = vadd.f32 %v654_v28, %v623_v24  ;;  %v688_v31 = vsel %vm3851_vm13, %v684_v47, 0.0  ;;  %v3858_v1 = vld [vmem:[#allocation13_spill] sm:$0xff] }
 0x1a6   : > { %vm812_vm3 = vcmask 883712   ;;  %v657_v16 = vadd.f32 %v655_v37, %v624_v60  ;;  %v720_v48 = vsel %vm402_vm12, %v716_v26, 0.0  ;;  %v750_v19 = vsel %vm748_vm1, %v3085_v23, %v3060_v45 }
 0x1a7   : > { %v3298_v62 = vpop.permute.xlu0 %907  ;;  %v3300_v54 = vpop.permute.xlu1 %874  ;;  %v3324_v25 = vadd.f32 %v1577_v35, %v1575_v50  ;;  %v689_v33 = vadd.f32 %v687_v0, %v656_v9  ;;  %vm3852_vm11 = vcmp.ge.s32.totalorder %v3098_v40, 0  ;;  %v3853_v5 = vstv %s3053_s8  ;;  %v3859_v9 = vld [vmem:[#allocation14_spill] sm:$0xff]  ;;  %s3455_s8 = sld [smem:[#allocation3 + $0x5a]] }
 0x1a8   : > { %v721_v30 = vsel %vm3852_vm11, %v717_v17, 0.0  ;;  %v1608_v3 = vmul.f32 %v3157_v52, %v3853_v5  ;;  %v690_v34 = vadd.f32 %v688_v31, %v657_v16  ;;  %v753_v45 = vsel %vm410_vm15, %v749_v20, 0.0 }
 0x1a9   : > { %1530 = vrot.lane.b32.xlu0 %v1525_v32, %s2551_s17  ;;  %1497 = vrot.lane.b32.xlu1 %v1492_v18, %s2550_s15  ;;  %v1554_v18 = vrot.slane %v3302_v11, %v2767_v2  ;;  %v3854_v23 = vstv %s3041_s30  ;;  %v3855_v51 = vstv %s3057_s14  ;;  %v722_v7 = vadd.f32 %v720_v48, %v689_v33  ;;  %s3436_s30 = sld [smem:[#allocation3 + $0x28]]  ;;  %s2556_s14 = smov 45  }
 0x1aa   : > { %v1610_v8 = vmul.f32 %v3175_v46, %v3854_v23  ;;  %v1641_v14 = vmul.f32 %v3157_v52, %v3855_v51  ;;  %vm3856_vm1 = vcmp.ge.s32.totalorder %v3106_v53, 0  ;;  %v1550_v28 = vrot.slane %v3302_v11, %v2757_v56  ;;  %s3484_s15 = sld [smem:[#allocation3 + $0x2b]] }
 0x1ab   : > { %v3328_v42 = vpop.permute.xlu0 %938  ;;  %v906_v32 = vpop.permute.xlu1 %905  ;;  %v754_v4 = vsel %vm3856_vm1, %v750_v19, 0.0  ;;  %v3857_v47 = vstv %s3043_s3  ;;  %v723_v50 = vadd.f32 %v721_v30, %v690_v34  ;;  %v814_v24 = vsel %vm812_vm3, %v3196_v61, %v3149_v6  ;;  %s2555_s3 = smov 46  }
 0x1ac   : > { %v1643_v58 = vmul.f32 %v3175_v46, %v3857_v47  ;;  %vm845_vm6 = vcmask 875520   ;;  %v1583_v37 = vrot.slane %v3324_v25, %v2757_v56  ;;  %v755_v26 = vadd.f32 %v753_v45, %v722_v7 }
 0x1ad   : > { %1561 = vrot.lane.b32.xlu0 %v1554_v18, %s2552_s23  ;;  %1528 = vrot.lane.b32.xlu1 %v1521_v41, %s2551_s17  ;;  %v783_v41 = vsel %vm781_vm2, %v3083_v21, %v3151_v27  ;;  %v813_v60 = vsel %vm812_vm3, %v3119_v44, %v3196_v61  ;;  %vm878_vm7 = vcmask 867328   ;;  %v782_v6 = vsel %vm781_vm2, %v3858_v1, %v3083_v21  ;;  %s3493_s17 = sld [smem:[#allocation3 + $0x5c]] }
 0x1ae   : > { %v756_v35 = vadd.f32 %v754_v4, %v723_v50  ;;  %v847_v31 = vsel %vm845_vm6, %v3859_v9, %v3264_v55  ;;  %v1558_v20 = vrot.slane %v3302_v11, %v2761_v59  ;;  %v818_v27 = vsel %vm421_vm5, %v814_v24, 0.0 }
 0x1af   : > { %v943_v0 = vpop.permute.xlu0 %942  ;;  %v910_v17 = vpop.permute.xlu1 %909  ;;  %v846_v44 = vsel %vm845_vm6, %v3226_v43, %v3859_v9  ;;  %v1591_v21 = vrot.slane %v3324_v25, %v2761_v59  ;;  %v3380_v61 = vadd.f32 %v1610_v8, %v1608_v3  ;;  %v817_v11 = vsel %vm420_vm4, %v813_v60, 0.0 }
 0x1b0   : > { %v787_v55 = vadd.f32 %v783_v41, %v756_v35  ;;  %v880_v16 = vsel %vm878_vm7, %v3300_v54, %v3262_v13  ;;  %vm911_vm2 = vcmask 785408   ;;  %v786_v43 = vadd.f32 %v782_v6, %v755_v26 }
 0x1b1   : > { %1592 = vrot.lane.b32.xlu0 %v1583_v37, %s2553_s25  ;;  %1559 = vrot.lane.b32.xlu1 %v1550_v28, %s2552_s23  ;;  %v851_v48 = vsel %vm429_vm9, %v847_v31, 0.0  ;;  %v879_v19 = vsel %vm878_vm7, %v3224_v63, %v3300_v54  ;;  %vm944_vm13 = vcmask 777216   ;;  %v850_v5 = vsel %vm428_vm8, %v846_v44, 0.0 }
 0x1b2   : > { %v820_v18 = vadd.f32 %v818_v27, %v787_v55  ;;  %v913_v13 = vsel %vm911_vm2, %v3298_v62, %v910_v17  ;;  %v1587_v3 = vrot.slane %v3324_v25, %v2767_v2  ;;  %v819_v34 = vadd.f32 %v817_v11, %v786_v43 }
 0x1b3   : > { %v974_v33 = vpop.permute.xlu0 %973  ;;  %v941_v30 = vpop.permute.xlu1 %940  ;;  %v884_v45 = vsel %vm437_vm0, %v880_v16, 0.0  ;;  %v912_v63 = vsel %vm911_vm2, %v906_v32, %v3298_v62  ;;  %v1620_v54 = vrot.slane %v3380_v61, %v2767_v2  ;;  %v883_v25 = vsel %vm436_vm14, %v879_v19, 0.0 }
 0x1b4   : > { %v853_v23 = vadd.f32 %v851_v48, %v820_v18  ;;  %v946_v8 = vsel %vm944_vm13, %v941_v30, %v943_v0  ;;  %vm977_vm3 = vcmask 769024   ;;  %v852_v51 = vadd.f32 %v850_v5, %v819_v34 }
 0x1b5   : > { %1596 = vrot.lane.b32.xlu0 %v1591_v21, %s2553_s25  ;;  %1563 = vrot.lane.b32.xlu1 %v1558_v20, %s2552_s23  ;;  %vm3860_vm11 = vcmp.ge.s32.totalorder %v3046_v39, 0  ;;  %v945_v32 = vsel %vm944_vm13, %v3328_v42, %v941_v30  ;;  %v1644_v28 = vadd.f32 %v1643_v58, %v1641_v14  ;;  %v916_v50 = vsel %vm394_vm10, %v912_v63, 0.0  ;;  %s2558_s23 = smov 43  }
 0x1b6   : > { %v917_v62 = vsel %vm3860_vm11, %v913_v13, 0.0  ;;  %v886_v47 = vadd.f32 %v884_v45, %v853_v23  ;;  %v1673_v24 = vstv %s3370_s22  ;;  %v885_v37 = vadd.f32 %v883_v25, %v852_v51  ;;  %s3509_s22 = sld [smem:[#allocation3 + $0x2c]] }
 0x1b7   : > { %v1005_v7 = vpop.permute.xlu0 %1004  ;;  %v972_v4 = vpop.permute.xlu1 %971  ;;  %vm3861_vm1 = vcmp.ge.s32.totalorder %v3098_v40, 0  ;;  %v949_v14 = vsel %vm402_vm12, %v945_v32, 0.0  ;;  %v1675_v58 = vstv %s3387_s26  ;;  %v1649_v1 = vrot.slane %v1644_v28, %v2757_v56  ;;  %s3517_s26 = sld [smem:[#allocation3 + $0x5d]] }
 0x1b8   : > { %v950_v26 = vsel %vm3861_vm1, %v946_v8, 0.0  ;;  %v978_v41 = vsel %vm977_vm3, %v972_v4, %v974_v33  ;;  %v919_v42 = vadd.f32 %v917_v62, %v886_v47  ;;  %v918_v60 = vadd.f32 %v916_v50, %v885_v37 }
 0x1b9   : > { %1627 = vrot.lane.b32.xlu0 %v1620_v54, %s2554_s29  ;;  %1594 = vrot.lane.b32.xlu1 %v1587_v3, %s2553_s25  ;;  %v1616_v6 = vrot.slane %v3380_v61, %v2757_v56  ;;  %v1674_v35 = vmul.f32 %v3157_v52, %v1673_v24  ;;  %v982_v31 = vsel %vm410_vm15, %v978_v41, 0.0  ;;  %v1704_v27 = vstv %s3399_s27  ;;  %s2559_s25 = smov 42   ;;  %s3522_s27 = sld [smem:[#allocation3 + $0x2d]] }
 0x1ba   : > { %v952_v9 = vadd.f32 %v950_v26, %v919_v42  ;;  %v951_v44 = vadd.f32 %v949_v14, %v918_v60  ;;  %vm3862_vm6 = vcmp.ge.s32.totalorder %v3106_v53, 0  ;;  %vm1010_vm7 = vcmask 760832  }
 0x1bb   : > { %v1009_v0 = vpop.permute.xlu0 %1008  ;;  %v976_v17 = vpop.permute.xlu1 %975  ;;  %v1676_v55 = vmul.f32 %v3175_v46, %v1675_v58  ;;  %v1624_v16 = vrot.slane %v3380_v61, %v2761_v59  ;;  %v1706_v43 = vstv %s3411_s28  ;;  %v1657_v30 = vrot.slane %v1644_v28, %v2761_v59  ;;  %s3531_s28 = sld [smem:[#allocation3 + $0x5e]] }
 0x1bc   : > { %v979_v20 = vsel %vm977_vm3, %v974_v33, %v976_v17  ;;  %v984_v48 = vadd.f32 %v982_v31, %v951_v44  ;;  %v1705_v5 = vmul.f32 %v3157_v52, %v1704_v27  ;;  %vm1041_vm2 = vcmask 752640  }
 0x1bd   : > { %v983_v21 = vsel %vm3862_vm6, %v979_v20, 0.0  ;;  %1658 = vrot.lane.b32.xlu0 %v1649_v1, %s2555_s3  ;;  %1625 = vrot.lane.b32.xlu1 %v1616_v6, %s2554_s29  ;;  %v1677_v18 = vadd.f32 %v1676_v55, %v1674_v35  ;;  %v1707_v61 = vmul.f32 %v3175_v46, %v1706_v43  ;;  %v1653_v25 = vrot.slane %v1644_v28, %v2767_v2 }
 0x1be   : > { %v985_v11 = vadd.f32 %v983_v21, %v952_v9  ;;  %v1737_v62 = vstv %s3436_s30  ;;  %v1739_v4 = vstv %s3446_s4  ;;  %v1770_v41 = vstv %s3450_s7  ;;  %s3547_s30 = sld [smem:[#allocation3 + $0x2e]]  ;;  %s3555_s4 = sld [smem:[#allocation3 + $0x5f]] }
 0x1bf   : > { %v1038_v19 = vpop.permute.xlu0 %1037  ;;  %v1007_v33 = vpop.permute.xlu1 %1006  ;;  %v1686_v23 = vrot.slane %v1677_v18, %v2767_v2  ;;  %v1708_v8 = vadd.f32 %v1707_v61, %v1705_v5  ;;  %v1682_v24 = vrot.slane %v1677_v18, %v2757_v56  ;;  %v1738_v37 = vmul.f32 %v3157_v52, %v1737_v62  ;;  %s3560_s7 = sld [smem:[#allocation3 + $0x2f]] }
 0x1c0   : > { %v1011_v13 = vsel %vm1010_vm7, %v1005_v7, %v1007_v33  ;;  %v1012_v3 = vsel %vm1010_vm7, %v1007_v33, %v1009_v0  ;;  %vm1074_vm13 = vcmask 744448   ;;  %v1740_v14 = vmul.f32 %v3175_v46, %v1739_v4 }
 0x1c1   : > { %v1015_v34 = vadd.f32 %v1011_v13, %v984_v48  ;;  %v1016_v45 = vadd.f32 %v1012_v3, %v985_v11  ;;  %1662 = vrot.lane.b32.xlu0 %v1657_v30, %s2555_s3  ;;  %1629 = vrot.lane.b32.xlu1 %v1624_v16, %s2554_s29  ;;  %v1713_v28 = vrot.slane %v1708_v8, %v2757_v56  ;;  %v1772_v60 = vstv %s3455_s8  ;;  %s2560_s29 = smov 32   ;;  %s3569_s8 = sld [smem:[#allocation3 + $0x60]] }
 0x1c2   : > { %v1721_v1 = vrot.slane %v1708_v8, %v2761_v59  ;;  %v1690_v6 = vrot.slane %v1677_v18, %v2761_v59  ;;  %v1741_v35 = vadd.f32 %v1740_v14, %v1738_v37  ;;  %v1771_v9 = vmul.f32 %v3157_v52, %v1770_v41 }
 0x1c3   : > { %v1069_v63 = vpop.permute.xlu0 %1068  ;;  %v1036_v54 = vpop.permute.xlu1 %1035  ;;  %vm1107_vm3 = vcmask 736256   ;;  %v1773_v21 = vmul.f32 %v3175_v46, %v1772_v60  ;;  %v1803_v18 = vstv %s3471_s21  ;;  %v1805_v3 = vstv %s3479_s24  ;;  %s3583_s21 = sld [smem:[#allocation3 + $0x30]]  ;;  %s3589_s24 = sld [smem:[#allocation3 + $0x61]] }
 0x1c4   : > { %v1042_v51 = vsel %vm1041_vm2, %v1036_v54, %v1038_v19  ;;  %v1750_v48 = vrot.slane %v1741_v35, %v2767_v2  ;;  %v1804_v54 = vmul.f32 %v3157_v52, %v1803_v18  ;;  %vm1140_vm11 = vcmask 654336  }
 0x1c5   : > { %v1046_v32 = vsel %vm420_vm4, %v1042_v51, 0.0  ;;  %1693 = vrot.lane.b32.xlu0 %v1686_v23, %s2556_s14  ;;  %1660 = vrot.lane.b32.xlu1 %v1653_v25, %s2555_s3  ;;  %v1774_v33 = vadd.f32 %v1773_v21, %v1771_v9  ;;  %v1836_v25 = vstv %s3484_s15  ;;  %v1806_v51 = vmul.f32 %v3175_v46, %v1805_v3  ;;  %s2561_s3 = smov 31   ;;  %s2564_s15 = smov 28  }
 0x1c6   : > { %v1048_v7 = vadd.f32 %v1046_v32, %v1015_v34  ;;  %v1838_v32 = vstv %s3493_s17  ;;  %vm3863_vm1 = vcmp.ge.s32.totalorder %v3046_v39, 0  ;;  %vm1173_vm6 = vcmask 646144   ;;  %s2565_s17 = smov 27  }
 0x1c7   : > { %v1073_v47 = vpop.permute.xlu0 %1072  ;;  %v1040_v50 = vpop.permute.xlu1 %1039  ;;  %v1779_v61 = vrot.slane %v1774_v33, %v2757_v56  ;;  %v1839_v14 = vmul.f32 %v3175_v46, %v1838_v32  ;;  %vm3864_vm7 = vcmp.ge.s32.totalorder %v3098_v40, 0 }
 0x1c8   : > { %v1043_v26 = vsel %vm1041_vm2, %v1038_v19, %v1040_v50  ;;  %v1717_v19 = vrot.slane %v1708_v8, %v2767_v2  ;;  %v1754_v50 = vrot.slane %v1741_v35, %v2761_v59  ;;  %vm1206_vm2 = vcmask 637952  }
 0x1c9   : > { %v1047_v42 = vsel %vm421_vm5, %v1043_v26, 0.0  ;;  %1722 = vrot.lane.b32.xlu0 %v1713_v28, %s2557_s20  ;;  %1691 = vrot.lane.b32.xlu1 %v1682_v24, %s2556_s14  ;;  %v1807_v28 = vadd.f32 %v1806_v51, %v1804_v54  ;;  %v1837_v24 = vmul.f32 %v3157_v52, %v1836_v25 }
 0x1ca   : > { %v1049_v58 = vadd.f32 %v1047_v42, %v1016_v45 }
 0x1cb   : > { %v1104_v0 = vpop.permute.xlu0 %1103  ;;  %v1071_v17 = vpop.permute.xlu1 %1070 }
 0x1cc   : > { %v1075_v31 = vsel %vm1074_vm13, %v1069_v63, %v1071_v17  ;;  %v1076_v20 = vsel %vm1074_vm13, %v1071_v17, %v1073_v47  ;;  %v1746_v63 = vrot.slane %v1741_v35, %v2757_v56  ;;  %v1787_v47 = vrot.slane %v1774_v33, %v2761_v59 }
 0x1cd   : > { %v1079_v27 = vsel %vm428_vm8, %v1075_v31, 0.0  ;;  %v1080_v44 = vsel %vm429_vm9, %v1076_v20, 0.0  ;;  %1726 = vrot.lane.b32.xlu0 %v1721_v1, %s2557_s20  ;;  %1695 = vrot.lane.b32.xlu1 %v1690_v6, %s2556_s14  ;;  %v1816_v1 = vrot.slane %v1807_v28, %v2767_v2  ;;  %v1783_v6 = vrot.slane %v1774_v33, %v2767_v2  ;;  %s2562_s14 = smov 30  }
 0x1ce   : > { %v1081_v55 = vadd.f32 %v1079_v27, %v1048_v7  ;;  %v1082_v11 = vadd.f32 %v1080_v44, %v1049_v58  ;;  %v1840_v35 = vadd.f32 %v1839_v14, %v1837_v24  ;;  %v1869_v31 = vstv %s3509_s22  ;;  %s2173_s22 = sshll.u32 %s2732_s19, 1 }
 0x1cf   : > { %v1135_v16 = vpop.permute.xlu0 %1134  ;;  %v1102_v43 = vpop.permute.xlu1 %1101  ;;  %v1871_v44 = vstv %s3517_s26  ;;  %vm3865_vm13 = vcmp.ge.s32.totalorder %v3106_v53, 0  ;;  %s171_s26 = scalar_lea.vmem [#allocation8], %s2173_s22 }
 0x1d0   : > { %v1108_v30 = vsel %vm1107_vm3, %v1102_v43, %v1104_v0  ;;  %v1870_v43 = vmul.f32 %v3157_v52, %v1869_v31 }
 0x1d1   : > { %v1112_v5 = vsel %vm436_vm14, %v1108_v30, 0.0  ;;  %1757 = vrot.lane.b32.xlu0 %v1750_v48, %s2558_s23  ;;  %1724 = vrot.lane.b32.xlu1 %v1717_v19, %s2557_s20  ;;  %v1902_v19 = vstv %s3522_s27  ;;  %v1872_v30 = vmul.f32 %v3175_v46, %v1871_v44  ;;  %s2563_s20 = smov 29   ;;  %s2081_s27 = sshll.u32 %s171_s26, 4  ;;  %s3775_s27 = int_to_ptr.vmem [resolvable:$true] %s2081_s27 }
 0x1d2   : > { %v1114_v13 = vadd.f32 %v1112_v5, %v1081_v55  ;;  %v1904_v5 = vstv %s3531_s28 }
 0x1d3   : > { %v1139_v34 = vpop.permute.xlu0 %1138  ;;  %v1106_v45 = vpop.permute.xlu1 %1105  ;;  %v1905_v51 = vmul.f32 %v3175_v46, %v1904_v5 }
 0x1d4   : > { %v1109_v23 = vsel %vm1107_vm3, %v1104_v0, %v1106_v45  ;;  %v1820_v45 = vrot.slane %v1807_v28, %v2761_v59  ;;  %vm1239_vm3 = vcmask 629760  }
 0x1d5   : > { %v1113_v8 = vsel %vm437_vm0, %v1109_v23, 0.0  ;;  %1788 = vrot.lane.b32.xlu0 %v1779_v61, %s2559_s25  ;;  %1755 = vrot.lane.b32.xlu1 %v1746_v63, %s2558_s23  ;;  %v1873_v61 = vadd.f32 %v1872_v30, %v1870_v43  ;;  %v1903_v63 = vmul.f32 %v3157_v52, %v1902_v19 }
 0x1d6   : > { %v1115_v62 = vadd.f32 %v1113_v8, %v1082_v11  ;;  %v1845_v11 = vrot.slane %v1840_v35, %v2757_v56 }
 0x1d7   : > { %v1170_v7 = vpop.permute.xlu0 %1169  ;;  %v1137_v4 = vpop.permute.xlu1 %1136  ;;  %v1886_v44 = vrot.slane %v1873_v61, %v2761_v59 }
 0x1d8   : > { %v1141_v37 = vsel %vm1140_vm11, %v1135_v16, %v1137_v4  ;;  %v1142_v26 = vsel %vm1140_vm11, %v1137_v4, %v1139_v34  ;;  %v1812_v16 = vrot.slane %v1807_v28, %v2757_v56  ;;  %v1853_v34 = vrot.slane %v1840_v35, %v2761_v59 }
 0x1d9   : > { %v1145_v41 = vsel %vm394_vm10, %v1141_v37, 0.0  ;;  %v1146_v42 = vsel %vm3863_vm1, %v1142_v26, 0.0  ;;  %1792 = vrot.lane.b32.xlu0 %v1787_v47, %s2559_s25  ;;  %1759 = vrot.lane.b32.xlu1 %v1754_v50, %s2558_s23  ;;  %v1882_v47 = vrot.slane %v1873_v61, %v2767_v2  ;;  %v1849_v50 = vrot.slane %v1840_v35, %v2767_v2  ;;  %s2566_s23 = smov 26  }
 0x1da   : > { %v1147_v58 = vadd.f32 %v1145_v41, %v1114_v13  ;;  %v1148_v60 = vadd.f32 %v1146_v42, %v1115_v62  ;;  %v1906_v28 = vadd.f32 %v1905_v51, %v1903_v63  ;;  %v1933_v37 = vstv %s3547_s30 }
 0x1db   : > { %v1201_v0 = vpop.permute.xlu0 %1200  ;;  %v1168_v17 = vpop.permute.xlu1 %1167  ;;  %v1935_v41 = vstv %s3555_s4  ;;  %vm1270_vm11 = vcmask 621568   ;;  %vm1303_vm1 = vcmask 613376   ;;  %s2567_s4 = smov [#allocation8]  }
 0x1dc   : > { %v1174_v9 = vsel %vm1173_vm6, %v1168_v17, %v1170_v7  ;;  %v1936_v35 = vmul.f32 %v3175_v46, %v1935_v41 }
 0x1dd   : > { %v1178_v20 = vsel %vm402_vm12, %v1174_v9, 0.0  ;;  %1823 = vrot.lane.b32.xlu0 %v1816_v1, %s2560_s29  ;;  %1790 = vrot.lane.b32.xlu1 %v1783_v6, %s2559_s25  ;;  %v1966_v1 = vstv %s3560_s7  ;;  %v1968_v9 = vstv %s3569_s8  ;;  %s2279_s25 = sshll.u32 %s2604_s13, 5  ;;  %s2067_s13 = scalar_lea.sflag [#allocation5], %s2732_s19 }
 0x1de   : > { %v1180_v27 = vadd.f32 %v1178_v20, %v1147_v58  ;;  %v1911_v58 = vrot.slane %v1906_v28, %v2757_v56  ;;  %v1969_v19 = vmul.f32 %v3175_v46, %v1968_v9  ;;  %s3773_s30 = scalar_lea.hbm %s3819_s2, %s2279_s25  ;;  %s2446_s7 = sshll.u32 %s2567_s4, 4  ;;  %s2447_s7 = int_to_ptr.vmem [resolvable:$false] %s2446_s7 }
 0x1df   : > { %v1205_v21 = vpop.permute.xlu0 %1204  ;;  %v1172_v55 = vpop.permute.xlu1 %1171  ;;  %s2448_s8 = scalar_lea.vmem %s2447_s7, 64  ;;  %p2449_p1 = scmp.lt.s32.totalorder %s3775_s27, %s2447_s7 }
 0x1e0   : > { %v1175_v48 = vsel %vm1173_vm6, %v1170_v7, %v1172_v55  ;;  %v1967_v55 = vmul.f32 %v3157_v52, %v1966_v1  ;;  %vm1336_vm6 = vcmask 605184  }
 0x1e1   : > { %v1179_v33 = vsel %vm3864_vm7, %v1175_v48, 0.0  ;;  %1854 = vrot.lane.b32.xlu0 %v1845_v11, %s2561_s3  ;;  %1821 = vrot.lane.b32.xlu1 %v1812_v16, %s2560_s29  ;;  %vm1369_vm7 = vcmask 523264  }
 0x1e2   : > { %v1181_v18 = vadd.f32 %v1179_v33, %v1148_v60  ;;  %v1878_v60 = vrot.slane %v1873_v61, %v2757_v56  ;;  %v1999_v61 = vstv %s3583_s21 }
 0x1e3   : > { %v1236_v13 = vpop.permute.xlu0 %1235  ;;  %v1203_v3 = vpop.permute.xlu1 %1202 }
 0x1e4   : > { %v1207_v54 = vsel %vm1206_vm2, %v1201_v0, %v1203_v3  ;;  %v1208_v23 = vsel %vm1206_vm2, %v1203_v3, %v1205_v21  ;;  %v1934_v0 = vmul.f32 %v3157_v52, %v1933_v37  ;;  %v1915_v3 = vrot.slane %v1906_v28, %v2767_v2 }
 0x1e5   : > { %v1211_v25 = vsel %vm410_vm15, %v1207_v54, 0.0  ;;  %v1212_v8 = vsel %vm3865_vm13, %v1208_v23, 0.0  ;;  %1858 = vrot.lane.b32.xlu0 %v1853_v34, %s2561_s3  ;;  %1825 = vrot.lane.b32.xlu1 %v1820_v45, %s2560_s29  ;;  %v1970_v34 = vadd.f32 %v1969_v19, %v1967_v55  ;;  %v2001_v23 = vstv %s3589_s24 }
 0x1e6   : > { %v1213_v62 = vadd.f32 %v1211_v25, %v1180_v27  ;;  %v1214_v32 = vadd.f32 %v1212_v8, %v1181_v18  ;;  %v1919_v27 = vrot.slane %v1906_v28, %v2761_v59  ;;  %v1937_v21 = vadd.f32 %v1936_v35, %v1934_v0 }
 0x1e7   : > { %v1265_v7 = vpop.permute.xlu0 %1264  ;;  %v1234_v4 = vpop.permute.xlu1 %1233  ;;  %v1975_v51 = vrot.slane %v1970_v34, %v2757_v56  ;;  %v1983_v37 = vrot.slane %v1970_v34, %v2761_v59  ;;  %vm3866_vm2 = vcmp.ge.s32.totalorder %v3046_v39, 0  ;;  %vm1402_vm13 = vcmask 515072  }
 0x1e8   : > { %v1240_v24 = vsel %vm1239_vm3, %v1234_v4, %v1236_v13 }
 0x1e9   : > { %v1244_v26 = vadd.f32 %v1240_v24, %v1213_v62  ;;  %1889 = vrot.lane.b32.xlu0 %v1882_v47, %s2562_s14  ;;  %1856 = vrot.lane.b32.xlu1 %v1849_v50, %s2561_s3  ;;  %v1942_v62 = vrot.slane %v1937_v21, %v2757_v56  ;;  %v2002_v47 = vmul.f32 %v3175_v46, %v2001_v23  ;;  %s2442_s3 = scalar_lea.vmem %s3775_s27, 32 }
 0x1ea   : > { %p2443_p8 = scmp.ne.s32.totalorder %s3775_s27, %s2442_s3  ;;  %p2450_p2 = scmp.lt.s32.totalorder %s2448_s8, %s2442_s3 }
 0x1eb   : > { %v1269_v42 = vpop.permute.xlu0 %1268  ;;  %v1238_v14 = vpop.permute.xlu1 %1237 }
 0x1ec   : > { %v1241_v17 = vsel %vm1239_vm3, %v1236_v13, %v1238_v14  ;;  %v1946_v13 = vrot.slane %v1937_v21, %v2767_v2  ;;  %vm3867_vm3 = vcmp.ge.s32.totalorder %v3098_v40, 0  ;;  %p2444_p11 = pnand %p2443_p8, %p3877_p9  ;;  %p2451_p12 = por %p2450_p2, %p2449_p1 }
 0x1ed   : > { %v1245_v6 = vadd.f32 %v1241_v17, %v1214_v32  ;;  %1920 = vrot.lane.b32.xlu0 %v1911_v58, %s2563_s20  ;;  %1887 = vrot.lane.b32.xlu1 %v1878_v60, %s2562_s14  ;;  %v2000_v32 = vmul.f32 %v3157_v52, %v1999_v61 }
 0x1ee   : > { %p2445_p5 = pneg %p2444_p11 }
 0x1ef   : > { %v1300_v31 = vpop.permute.xlu0 %1299  ;;  %v1267_v20 = vpop.permute.xlu1 %1266  ;;  %v2003_v41 = vadd.f32 %v2002_v47, %v2000_v32 }
 0x1f0   : > { %v1271_v11 = vsel %vm1270_vm11, %v1265_v7, %v1267_v20  ;;  %v1272_v16 = vsel %vm1270_vm11, %v1267_v20, %v1269_v42  ;;  %vm1435_vm11 = vcmask 506880   ;;  %p2452_p0 = pnand %p2451_p12, %p2445_p5 }
 0x1f1   : > { %v1275_v43 = vsel %vm420_vm4, %v1271_v11, 0.0  ;;  %v1276_v48 = vsel %vm421_vm5, %v1272_v16, 0.0  ;;  %1924 = vrot.lane.b32.xlu0 %v1919_v27, %s2563_s20  ;;  %1891 = vrot.lane.b32.xlu1 %v1886_v44, %s2562_s14  ;;  %v2012_v1 = vrot.slane %v2003_v41, %v2767_v2  ;;  %v2008_v44 = vrot.slane %v2003_v41, %v2757_v56 }
 0x1f2   : > { %v1277_v33 = vadd.f32 %v1275_v43, %v1244_v26  ;;  %v1278_v30 = vadd.f32 %v1276_v48, %v1245_v6  ;;  %v1950_v26 = vrot.slane %v1937_v21, %v2761_v59  ;;  %v1979_v6 = vrot.slane %v1970_v34, %v2767_v2 }
 0x1f3   : > { %v1331_v18 = vpop.permute.xlu0 %1330  ;;  %v1298_v5 = vpop.permute.xlu1 %1297  ;;  %v2016_v43 = vrot.slane %v2003_v41, %v2761_v59 }
 0x1f4   : > { %v1304_v45 = vsel %vm1303_vm1, %v1298_v5, %v1300_v31 }
 0x1f5   : > { %v1308_v63 = vsel %vm428_vm8, %v1304_v45, 0.0  ;;  %1953 = vrot.lane.b32.xlu0 %v1946_v13, %s2564_s15  ;;  %1922 = vrot.lane.b32.xlu1 %v1915_v3, %s2563_s20 }
 0x1f6   : > { %v1310_v54 = vadd.f32 %v1308_v63, %v1277_v33 }
 0x1f7   : > { %v1335_v25 = vpop.permute.xlu0 %1334  ;;  %v1302_v8 = vpop.permute.xlu1 %1301 }
 0x1f8   : > { %v1305_v7 = vsel %vm1303_vm1, %v1300_v31, %v1302_v8  ;;  %vm3868_vm1 = vcmp.ge.s32.totalorder %v3106_v53, 0 }
 0x1f9   : > { %v1309_v4 = vsel %vm429_vm9, %v1305_v7, 0.0  ;;  %1984 = vrot.lane.b32.xlu0 %v1975_v51, %s2565_s17  ;;  %1951 = vrot.lane.b32.xlu1 %v1942_v62, %s2564_s15 }
 0x1fa   : > { %v1311_v50 = vadd.f32 %v1309_v4, %v1278_v30 }
 0x1fb   : > { %v1366_v28 = vpop.permute.xlu0 %1365  ;;  %v1333_v24 = vpop.permute.xlu1 %1332 }
 0x1fc   : > { %v1337_v52 = vsel %vm1336_vm6, %v1331_v18, %v1333_v24  ;;  %v1338_v42 = vsel %vm1336_vm6, %v1333_v24, %v1335_v25  ;;  %vm1468_vm6 = vcmask 498688  }
 0x1fd   : > { %v1341_v14 = vsel %vm436_vm14, %v1337_v52, 0.0  ;;  %v1342_v58 = vsel %vm437_vm0, %v1338_v42, 0.0  ;;  %1988 = vrot.lane.b32.xlu0 %v1983_v37, %s2565_s17  ;;  %1955 = vrot.lane.b32.xlu1 %v1950_v26, %s2564_s15 }
 0x1fe   : > { %v1343_v46 = vadd.f32 %v1341_v14, %v1310_v54  ;;  %v1344_v60 = vadd.f32 %v1342_v58, %v1311_v50 }
 0x1ff   : > { %v1397_v0 = vpop.permute.xlu0 %1396  ;;  %v1364_v17 = vpop.permute.xlu1 %1363 }
 0x200   : > { %v1370_v35 = vsel %vm1369_vm7, %v1364_v17, %v1366_v28 }
 0x201   : > { %v1374_v9 = vsel %vm394_vm10, %v1370_v35, 0.0  ;;  %2019 = vrot.lane.b32.xlu0 %v2012_v1, %s2566_s23  ;;  %1986 = vrot.lane.b32.xlu1 %v1979_v6, %s2565_s17 }
 0x202   : > { %v1376_v31 = vadd.f32 %v1374_v9, %v1343_v46 }
 0x203   : > { %v1401_v20 = vpop.permute.xlu0 %1400  ;;  %v1368_v27 = vpop.permute.xlu1 %1367 }
 0x204   : > { %v1371_v21 = vsel %vm1369_vm7, %v1366_v28, %v1368_v27  ;;  %vm1499_vm7 = vcmask 490496  }
 0x205   : > { %v1375_v55 = vsel %vm3866_vm2, %v1371_v21, 0.0  ;;  %2017 = vrot.lane.b32.xlu1 %v2008_v44, %s2566_s23  ;;  %vm1532_vm2 = vcmask 482304  }
 0x206   : > { %v1377_v2 = vadd.f32 %v1375_v55, %v1344_v60 }
 0x207   : > { %v1432_v11 = vpop.permute.xlu0 %1431  ;;  %v1399_v16 = vpop.permute.xlu1 %1398 }
 0x208   : > { %v1403_v48 = vsel %vm1402_vm13, %v1397_v0, %v1399_v16  ;;  %v1404_v19 = vsel %vm1402_vm13, %v1399_v16, %v1401_v20  ;;  %vm1565_vm13 = vcmask 474112  }
 0x209   : > { %v1407_v33 = vsel %vm402_vm12, %v1403_v48, 0.0  ;;  %v1408_v56 = vsel %vm3867_vm3, %v1404_v19, 0.0  ;;  %2021 = vrot.lane.b32.xlu1 %v2016_v43, %s2566_s23  ;;  %vm1598_vm3 = vcmask 392192  }
 0x20a   : > { %v1409_v30 = vadd.f32 %v1407_v33, %v1376_v31  ;;  %v1410_v18 = vadd.f32 %v1408_v56, %v1377_v2 }
 0x20b   : > { %v1463_v5 = vpop.permute.xlu0 %1462  ;;  %v1430_v13 = vpop.permute.xlu1 %1429 }
 0x20c   : > { %v1436_v3 = vsel %vm1435_vm11, %v1430_v13, %v1432_v11 }
 0x20d   : > { %v1440_v34 = vsel %vm410_vm15, %v1436_v3, 0.0 }
 0x20e   : > { %v1442_v45 = vadd.f32 %v1440_v34, %v1409_v30 }
 0x20f   : > { %v1467_v59 = vpop.permute.xlu0 %1466  ;;  %v1434_v61 = vpop.permute.xlu1 %1433 }
 0x210   : > { %v1437_v63 = vsel %vm1435_vm11, %v1432_v11, %v1434_v61  ;;  %vm1631_vm11 = vcmask 384000  }
 0x211   : > { %v1441_v54 = vsel %vm3868_vm1, %v1437_v63, 0.0  ;;  %vm1664_vm1 = vcmask 375808  }
 0x212   : > { %v1443_v23 = vadd.f32 %v1441_v54, %v1410_v18 }
 0x213   : > { %v1496_v25 = vpop.permute.xlu0 %1495  ;;  %v1465_v8 = vpop.permute.xlu1 %1464 }
 0x214   : > { %v1469_v51 = vsel %vm1468_vm6, %v1463_v5, %v1465_v8  ;;  %v1470_v62 = vsel %vm1468_vm6, %v1465_v8, %v1467_v59  ;;  %vm3869_vm6 = vcmp.ge.s32.totalorder %v3046_v39, 0 }
 0x215   : > { %v1473_v32 = vadd.f32 %v1469_v51, %v1442_v45  ;;  %v1474_v7 = vadd.f32 %v1470_v62, %v1443_v23 }
 0x217   : > { %v1527_v4 = vpop.permute.xlu0 %1526  ;;  %v1494_v47 = vpop.permute.xlu1 %1493 }
 0x218   : > { %v1500_v50 = vsel %vm1499_vm7, %v1494_v47, %v1496_v25 }
 0x219   : > { %v1504_v28 = vsel %vm420_vm4, %v1500_v50, 0.0 }
 0x21a   : > { %v1506_v24 = vadd.f32 %v1504_v28, %v1473_v32 }
 0x21b   : > { %v1531_v37 = vpop.permute.xlu0 %1530  ;;  %v1498_v26 = vpop.permute.xlu1 %1497 }
 0x21c   : > { %v1501_v41 = vsel %vm1499_vm7, %v1496_v25, %v1498_v26  ;;  %vm1728_vm7 = vcmask 359424  }
 0x21d   : > { %v1505_v52 = vsel %vm421_vm5, %v1501_v41, 0.0 }
 0x21e   : > { %v1507_v42 = vadd.f32 %v1505_v52, %v1474_v7 }
 0x21f   : > { %v1562_v14 = vpop.permute.xlu0 %1561  ;;  %v1529_v58 = vpop.permute.xlu1 %1528 }
 0x220   : > { %v1533_v3 = vsel %vm1532_vm2, %v1527_v4, %v1529_v58  ;;  %v1534_v63 = vsel %vm1532_vm2, %v1529_v58, %v1531_v37  ;;  %vm1697_vm2 = vcmask 367616  }
 0x221   : > { %v1537_v45 = vsel %vm428_vm8, %v1533_v3, 0.0  ;;  %v1538_v62 = vsel %vm429_vm9, %v1534_v63, 0.0 }
 0x222   : > { %v1539_v25 = vadd.f32 %v1537_v45, %v1506_v24  ;;  %v1540_v26 = vadd.f32 %v1538_v62, %v1507_v42 }
 0x223   : > { %v1593_v46 = vpop.permute.xlu0 %1592  ;;  %v1560_v60 = vpop.permute.xlu1 %1559 }
 0x224   : > { %v1566_v34 = vsel %vm1565_vm13, %v1560_v60, %v1562_v14 }
 0x225   : > { %v1570_v23 = vsel %vm436_vm14, %v1566_v34, 0.0 }
 0x226   : > { %v1572_v47 = vadd.f32 %v1570_v23, %v1539_v25 }
 0x227   : > { %v1597_v0 = vpop.permute.xlu0 %1596  ;;  %v1564_v17 = vpop.permute.xlu1 %1563 }
 0x228   : > { %v1567_v8 = vsel %vm1565_vm13, %v1562_v14, %v1564_v17  ;;  %vm3870_vm13 = vcmp.ge.s32.totalorder %v3098_v40, 0 }
 0x229   : > { %v1571_v24 = vsel %vm437_vm0, %v1567_v8, 0.0 }
 0x22b   : > { %v1628_v1 = vpop.permute.xlu0 %1627  ;;  %v1595_v6 = vpop.permute.xlu1 %1594 }
 0x22c   : > { %v1599_v54 = vsel %vm1598_vm3, %v1593_v46, %v1595_v6  ;;  %v1600_v50 = vsel %vm1598_vm3, %v1595_v6, %v1597_v0  ;;  %v1573_v0 = vadd.f32 %v1571_v24, %v1540_v26  ;;  %vm1761_vm3 = vcmask 351232  }
 0x22d   : > { %v1603_v32 = vsel %vm394_vm10, %v1599_v54, 0.0  ;;  %v1604_v14 = vsel %vm3869_vm6, %v1600_v50, 0.0  ;;  %vm1794_vm6 = vcmask 343040  }
 0x22e   : > { %v1605_v41 = vadd.f32 %v1603_v32, %v1572_v47 }
 0x22f   : > { %v1659_v35 = vpop.permute.xlu0 %1658  ;;  %v1626_v9 = vpop.permute.xlu1 %1625 }
 0x230   : > { %v1632_v51 = vsel %vm1631_vm11, %v1626_v9, %v1628_v1 }
 0x231   : > { %v1636_v37 = vsel %vm402_vm12, %v1632_v51, 0.0 }
 0x232   : > { %v1638_v17 = vadd.f32 %v1636_v37, %v1605_v41 }
 0x233   : > { %v1663_v31 = vpop.permute.xlu0 %1662  ;;  %v1630_v20 = vpop.permute.xlu1 %1629 }
 0x234   : > { %v1633_v52 = vsel %vm1631_vm11, %v1628_v1, %v1630_v20  ;;  %v1606_v1 = vadd.f32 %v1604_v14, %v1573_v0  ;;  %vm3871_vm11 = vcmp.ge.s32.totalorder %v3106_v53, 0 }
 0x235   : > { %v1637_v42 = vsel %vm3870_vm13, %v1633_v52, 0.0  ;;  %vm3872_vm13 = vcmp.ge.s32.totalorder %v3046_v39, 0 }
 0x236   : > { %v1639_v63 = vadd.f32 %v1637_v42, %v1606_v1 }
 0x237   : > { %v3644_v27 = vpop.permute.xlu0 %1693  ;;  %v1661_v44 = vpop.permute.xlu1 %1660 }
 0x238   : > { %v1665_v28 = vsel %vm1664_vm1, %v1659_v35, %v1661_v44  ;;  %v1666_v6 = vsel %vm1664_vm1, %v1661_v44, %v1663_v31  ;;  %vm1827_vm1 = vcmask 261120  }
 0x239   : > { %v1669_v58 = vsel %vm410_vm15, %v1665_v28, 0.0  ;;  %v1670_v20 = vsel %vm3871_vm11, %v1666_v6, 0.0  ;;  %vm3873_vm11 = vcmp.ge.s32.totalorder %v3098_v40, 0 }
 0x23a   : > { %v1671_v35 = vadd.f32 %v1669_v58, %v1638_v17 }
 0x23b   : > { %v1723_v21 = vpop.permute.xlu0 %1722  ;;  %v1692_v55 = vpop.permute.xlu1 %1691 }
 0x23c   : > { %v1698_v3 = vsel %vm1697_vm2, %v1692_v55, %v3644_v27 }
 0x23d   : > { %v1702_v25 = vadd.f32 %v1698_v3, %v1671_v35 }
 0x23f   : > { %v1727_v2 = vpop.permute.xlu0 %1726  ;;  %v1696_v11 = vpop.permute.xlu1 %1695 }
 0x240   : > { %v1699_v54 = vsel %vm1697_vm2, %v3644_v27, %v1696_v11  ;;  %vm1893_vm2 = vcmask 244736  }
 0x243   : > { %v3646_v16 = vpop.permute.xlu0 %1757  ;;  %v1725_v43 = vpop.permute.xlu1 %1724 }
 0x244   : > { %v1729_v9 = vsel %vm1728_vm7, %v1723_v21, %v1725_v43  ;;  %v1730_v31 = vsel %vm1728_vm7, %v1725_v43, %v1727_v2  ;;  %v1672_v21 = vadd.f32 %v1670_v20, %v1639_v63  ;;  %vm1860_vm7 = vcmask 252928  }
 0x245   : > { %v1733_v23 = vsel %vm420_vm4, %v1729_v9, 0.0  ;;  %v1734_v2 = vsel %vm421_vm5, %v1730_v31, 0.0 }
 0x246   : > { %v1735_v51 = vadd.f32 %v1733_v23, %v1702_v25 }
 0x247   : > { %v3648_v48 = vpop.permute.xlu0 %1788  ;;  %v1756_v19 = vpop.permute.xlu1 %1755 }
 0x248   : > { %v1762_v44 = vsel %vm1761_vm3, %v1756_v19, %v3646_v16  ;;  %v1703_v19 = vadd.f32 %v1699_v54, %v1672_v21 }
 0x249   : > { %v1766_v43 = vsel %vm428_vm8, %v1762_v44, 0.0 }
 0x24a   : > { %v1736_v32 = vadd.f32 %v1734_v2, %v1703_v19  ;;  %v1768_v47 = vadd.f32 %v1766_v43, %v1735_v51 }
 0x24b   : > { %v3650_v33 = vpop.permute.xlu0 %1792  ;;  %v1760_v56 = vpop.permute.xlu1 %1759 }
 0x24c   : > { %v1763_v55 = vsel %vm1761_vm3, %v3646_v16, %v1760_v56  ;;  %vm1957_vm3 = vcmask 228352  }
 0x24f   : > { %v3652_v30 = vpop.permute.xlu0 %1823  ;;  %v3654_v18 = vpop.permute.xlu1 %1790 }
 0x250   : > { %v1795_v8 = vsel %vm1794_vm6, %v3648_v48, %v3654_v18  ;;  %v1796_v62 = vsel %vm1794_vm6, %v3654_v18, %v3650_v33  ;;  %v1767_v48 = vsel %vm429_vm9, %v1763_v55, 0.0  ;;  %vm1990_vm6 = vcmask 220160  }
 0x251   : > { %v1799_v56 = vsel %vm436_vm14, %v1795_v8, 0.0  ;;  %v1800_v18 = vsel %vm437_vm0, %v1796_v62, 0.0  ;;  %v1769_v37 = vadd.f32 %v1767_v48, %v1736_v32  ;;  %v3876_v32 = vlaneseq }
 0x252   : > { %v1801_v26 = vadd.f32 %v1799_v56, %v1768_v47 }
 0x253   : > { %v3656_v5 = vpop.permute.xlu0 %1854  ;;  %v3658_v13 = vpop.permute.xlu1 %1821 }
 0x254   : > { %v1828_v16 = vsel %vm1827_vm1, %v3658_v13, %v3652_v30 }
 0x255   : > { %v1832_v13 = vsel %vm394_vm10, %v1828_v16, 0.0  ;;  %vm1926_vm10 = vcmask 236544  }
 0x256   : > { %v1834_v29 = vadd.f32 %v1832_v13, %v1801_v26 }
 0x257   : > { %v3662_v59 = vpop.permute.xlu0 %1858  ;;  %v3664_v61 = vpop.permute.xlu1 %1825 }
 0x258   : > { %v1829_v50 = vsel %vm1827_vm1, %v3652_v30, %v3664_v61  ;;  %v1802_v61 = vadd.f32 %v1800_v18, %v1769_v37 }
 0x259   : > { %v1833_v30 = vsel %vm3872_vm13, %v1829_v50, 0.0 }
 0x25b   : > { %v3674_v7 = vpop.permute.xlu0 %1889  ;;  %v1857_v4 = vpop.permute.xlu1 %1856 }
 0x25c   : > { %v1861_v33 = vsel %vm1860_vm7, %v3656_v5, %v1857_v4  ;;  %v1862_v41 = vsel %vm1860_vm7, %v1857_v4, %v3662_v59 }
 0x25d   : > { %v1865_v5 = vsel %vm402_vm12, %v1861_v33, 0.0  ;;  %v1866_v58 = vsel %vm3873_vm11, %v1862_v41, 0.0  ;;  %vm3874_vm12 = vcmp.ge.s32.totalorder %v3106_v53, 0 }
 0x25e   : > { %v1867_v39 = vadd.f32 %v1865_v5, %v1834_v29 }
 0x25f   : > { %v3687_v46 = vpop.permute.xlu0 %1920  ;;  %v1888_v60 = vpop.permute.xlu1 %1887 }
 0x260   : > { %v1894_v52 = vsel %vm1893_vm2, %v1888_v60, %v3674_v7  ;;  %v1835_v60 = vadd.f32 %v1833_v30, %v1802_v61 }
 0x261   : > { %v1898_v59 = vsel %vm410_vm15, %v1894_v52, 0.0  ;;  %vm2023_vm15 = vcmask 211968  }
 0x262   : > { %v1900_v42 = vadd.f32 %v1898_v59, %v1867_v39 }
 0x263   : > { %v1925_v34 = vpop.permute.xlu0 %1924  ;;  %v1892_v45 = vpop.permute.xlu1 %1891 }
 0x264   : > { %v1895_v14 = vsel %vm1893_vm2, %v3674_v7, %v1892_v45  ;;  %v1868_v7 = vadd.f32 %v1866_v58, %v1835_v60 }
 0x265   : > { %v1899_v38 = vsel %vm3874_vm12, %v1895_v14, 0.0 }
 0x266   : > { %v1901_v1 = vadd.f32 %v1899_v38, %v1868_v7 }
 0x267   : > { %v1954_v27 = vpop.permute.xlu0 %1953  ;;  %v1923_v11 = vpop.permute.xlu1 %1922 }
 0x268   : > { %v1927_v17 = vsel %vm1926_vm10, %v3687_v46, %v1923_v11  ;;  %v1928_v3 = vsel %vm1926_vm10, %v1923_v11, %v1925_v34 }
 0x269   : > { %v1931_v35 = vadd.f32 %v1927_v17, %v1900_v42  ;;  %v1932_v44 = vadd.f32 %v1928_v3, %v1901_v1 }
 0x26b   : > { %v1985_v28 = vpop.permute.xlu0 %1984  ;;  %v1952_v24 = vpop.permute.xlu1 %1951 }
 0x26c   : > { %v1958_v0 = vsel %vm1957_vm3, %v1952_v24, %v1954_v27 }
 0x26d   : > { %v1962_v40 = vsel %vm420_vm4, %v1958_v0, 0.0  ;;  %vm2063_vm4 = vcmp.lt.s32.totalorder %v3876_v32, 256 }
 0x26e   : > { %v1964_v46 = vadd.f32 %v1962_v40, %v1931_v35 }
 0x26f   : > { %v1956_v4 = vpop.permute.xlu1 %1955  ;;  %v1989_v6 = vpop.permute.xlu0 %1988 }
 0x270   : > { %v1959_v9 = vsel %vm1957_vm3, %v1954_v27, %v1956_v4 }
 0x271   : > { %v1963_v63 = vsel %vm421_vm5, %v1959_v9, 0.0 }
 0x272   : > { %v1965_v36 = vadd.f32 %v1963_v63, %v1932_v44 }
 0x273   : > { %v1987_v49 = vpop.permute.xlu1 %1986  ;;  %v2020_v31 = vpop.permute.xlu0 %2019 }
 0x274   : > { %v1991_v20 = vsel %vm1990_vm6, %v1985_v28, %v1987_v49  ;;  %v1992_v45 = vsel %vm1990_vm6, %v1987_v49, %v1989_v6 }
 0x275   : > { %v1995_v53 = vsel %vm428_vm8, %v1991_v20, 0.0  ;;  %v1996_v21 = vsel %vm429_vm9, %v1992_v45, 0.0 }
 0x276   : > { %v1997_v54 = vadd.f32 %v1995_v53, %v1964_v46  ;;  %v1998_v8 = vadd.f32 %v1996_v21, %v1965_v36 }
 0x277   : > { %v2018_v10 = vpop.permute.xlu1 %2017 }
 0x278   : > { %v2024_v23 = vsel %vm2023_vm15, %v2018_v10, %v2020_v31 }
 0x279   : > { %v2028_v34 = vsel %vm436_vm14, %v2024_v23, 0.0 }
 0x27a   : > { %v2030_v25 = vadd.f32 %v2028_v34, %v1997_v54 }
 0x27b   : > { %v2022_v55 = vpop.permute.xlu1 %2021 }
 0x27c   : > { %v2271_v2 = vmul.f32 -1.442695, %v2030_v25  ;;  %v2025_v12 = vsel %vm2023_vm15, %v2020_v31, %v2022_v55 }
 0x27d   : > { %v2029_v43 = vsel %vm437_vm0, %v2025_v12, 0.0 }
 0x27e   : > { %2389 = vpow2.f32 %v2271_v2  ;;  %v2031_v27 = vadd.f32 %v2029_v43, %v1998_v8 }
 0x280   : > { %v2272_v11 = vmul.f32 -1.442695, %v2031_v27 }
 0x282   : > { %2391 = vpow2.f32 %v2272_v11 }
 0x288   : > { %v2390_v57 = vpop.eup %2389 }
 0x289   : > { %v2038_v19 = vadd.f32 1.0, %v2390_v57 }
 0x28b   : > { %2393 = vrcp.f32 %v2038_v19 }
 0x28c   : > { %v2392_v22 = vpop.eup %2391 }
 0x28d   : > { %v2039_v51 = vadd.f32 1.0, %v2392_v22 }
 0x28f   : > { %2395 = vrcp.f32 %v2039_v51 }
 0x295   : > { %v2394_v62 = vpop.eup %2393 }
 0x299   : > { %v2396_v16 = vpop.eup %2395 }
 0x29a   : > { %v2046_v48 = vcombine.low %v2394_v62, %v2396_v16 }
 0x29c   : > { %v2053_v56 = vrot.slane %v2046_v48, %v3875_v15 }
 0x29e   : > { %v2060_v47 = vrot.slane %v2053_v56, %v3875_v15 }
 0x2a0   : > { %2065 = vst.msk [vmem:[%s171_s26] sm:$0x3] %vm2063_vm4, %v2060_v47 }
 0x2a1   : > { %2455 = shalt.err (!%p2452_p0)
}
 0x2a2   : > { %s2456_s19 = scalar_lea.hbm %s3773_s30, 32  ;;  %s2460_s20 = scalar_lea.hbm %s3819_s2, 64 }
 0x2a3   : > { %p2457_p3 = scmp.ne.s32.totalorder %s3773_s30, %s2456_s19  ;;  %p2461_p6 = scmp.lt.u32.totalorder %s3773_s30, %s3819_s2 }
 0x2a4   : > { %p2462_p13 = scmp.lt.u32.totalorder %s2460_s20, %s2456_s19  ;;  %p2464_p8 = scmp.lt.u32.totalorder %s2456_s19, %s3773_s30 }
 0x2a5   : > { %p2458_p7 = pnand %p2457_p3, %p3877_p9 }
 0x2a6   : > { %p2463_p4 = por %p2462_p13, %p2461_p6 }
 0x2a7   : > { %p2459_p10 = pneg %p2458_p7 }
 0x2a8   : > { %p2465_p11 = por %p2464_p8, %p2463_p4 }
 0x2aa   : > { %p2466_p5 = pnand %p2465_p11, %p2459_p10 }
 0x2ac   : > { %2469 = shalt.err (!%p2466_p5)
}
 0x2ad   : > { %2286 = dma.vmem_to_hbm [thread:$0]  (%p3877_p9), %s3775_s27, 32, %s3773_s30, %s2067_s13  }
 0x2ae PF: > { %s2093_s17 = sand.u32 1, %s2500_s9   ;;  %p3878_p1 = scmp.ne.s32.totalorder %s3831_s16, 0 }
 0x2af   : > { %p3879_p2 = scmp.ge.s32.totalorder %s2512_s12, 2  ;;  %s2094_s23 = scalar_lea.sflag [#allocation5], %s2093_s17 }
 0x2b1   : > { %p2297_p12 = pnand %p3879_p2, %p3878_p1 }
 0x2b3   : > { %2495 = dma.done.wait (!%p2297_p12), %s2094_s23, 32  }
 0x2b4   : > { %2497 = vsyncadd (!%p2297_p12), %s2094_s23, 4294967264  ;;  %p16_p0 = scmp.ge.s32.totalorder %s2629_s18, 4   ;;  %s3880_s9 = smov %s2504_s10 }
 0x2b5   : > { %s3881_s10 = smov %s2508_s11  ;;  %s3882_s11 = smov %s2669_s5 }
 0x2b6   : > { %s3883_s12 = smov %s2629_s18  ;;  %18 = sbr.rel (!%p16_p0) target bundleno = 6 (0x6), region = 79 }
 0x2bd   :  { %2099 = vsyncpa [#allocation4], 1 }
 0x2be   :  { %2101 = vsyncpa [#allocation4 + $0x1], 1 }
 0x2bf   :  { %2102 = vsyncpa [#allocation5], 1 }
 0x2c0   :  { %2104 = vsyncpa [#allocation5 + $0x1], 1 }
 0x2c1   :  { %2105 = vsyncpa [#allocation6], 1 }
 0x2c2   :  { %2107 = vsyncpa [#allocation6 + $0x1], 1 }

</bundles_post_ra>
